<compile_context>
chip_gen: v5e
topology: v5e:2x2
jax: 0.10.0
libtpu: 0.0.40
codegen_flags: <defaults>
</compile_context>

<pallas_src>
import functools

import jax
import jax.numpy as jnp
from jax.experimental import pallas as pl
from jax.experimental.pallas import tpu as pltpu


# ---------------------------------------------------------------------------
# Kernel 1: fused Conv2d(3, s=2, p=1) + ReLU + MaxPool2d(2, 2) for one image.
# ---------------------------------------------------------------------------
def conv_relu_pool_kernel(x_ref, w_ref, b_ref, o_ref):
    """
    x_ref: (1, 4*M, K) bf16 -- pool-grouped im2col rows; row p*M+m is the conv patch
                               feeding maxpool-window position p of pooled pixel m.
    w_ref: (K, Cout) bf16   -- HWIO conv weight flattened to (9*Cin, Cout).
    b_ref: (1, Cout) f32
    o_ref: (1, M, Cout) bf16
    """
    M = o_ref.shape[1]
    Cout = o_ref.shape[2]
    # One tall MXU matmul: all 4 pool positions x all pooled pixels at once (f32 acc).
    z = jnp.dot(x_ref[0], w_ref[...], preferred_element_type=jnp.float32)   # (4*M, Cout)
    # 2x2 max-pool == max over the 4 pool-phase row groups (leading-axis reduce, VPU).
    pooled = jnp.max(z.reshape(4, M, Cout), axis=0)                          # (M, Cout)
    # Bias/ReLU commute with the pool max (bias is phase-independent); keep in f32.
    o_ref[0] = jnp.maximum(pooled + b_ref[...], 0.0).astype(o_ref.dtype)


# ---------------------------------------------------------------------------
# Kernel 2: fused stage-2 conv+ReLU+pool  ->  stage-3 conv+ReLU+pool
#           -> Flatten -> Linear(4F, 4) -> Softmax, all for one image.
# ---------------------------------------------------------------------------
def fused_tail_kernel(p2_ref, w2_ref, b2_ref, w3_ref, b3_ref, wo_ref, bo_ref,
                      o_ref, p3_ref, *, hp, wp):
    """
    p2_ref: (1, 4*hp*wp, 9*Cin2) bf16  -- pool-grouped im2col rows for stage 2.
    w2_ref: (9*Cin2, C2) bf16, b2_ref: (1, C2) f32
    w3_ref: (9*C2, C3)  bf16, b3_ref: (1, C3) f32
    wo_ref: (C3, 4)     bf16, bo_ref: (1, 4)  f32
    o_ref : (1, 1, 4) f32 probabilities
    p3_ref: VMEM scratch (4, 9*C2) f32 -- in-kernel stage-3 im2col assembly buffer.
    """
    C2 = w2_ref.shape[1]
    M2 = hp * wp

    # ---- stage 2: one MXU matmul, pool = max over the 4 phase groups ----
    z2 = jnp.dot(p2_ref[0], w2_ref[...], preferred_element_type=jnp.float32)  # (4*M2, C2)
    pooled2 = jnp.max(z2.reshape(4, M2, C2), axis=0)                          # (M2, C2)
    h2 = jnp.maximum(pooled2 + b2_ref[...], 0.0)                              # (M2, C2) f32

    # ---- stage-3 im2col done in-kernel (no HBM round-trip, no XLA glue) ----
    # The 3x3/stride-2 conv of the hp x wp grid gives a 2x2 output whose 4 pixels are
    # exactly the final 2x2 maxpool window.  Each patch row is 9 lane-aligned C2-wide
    # channel segments; out-of-range (conv padding) segments stay zero.
    p3_ref[...] = jnp.zeros_like(p3_ref)
    for i in range(2):
        for j in range(2):
            row = i * 2 + j
            for kh in range(3):
                for kw in range(3):
                    r = 2 * i - 1 + kh           # input row in the hp x wp grid
                    c = 2 * j - 1 + kw           # input col
                    if 0 <= r < hp and 0 <= c < wp:
                        seg = kh * 3 + kw        # matches (kh, kw, c) weight flattening
                        p3_ref[pl.ds(row, 1), pl.ds(seg * C2, C2)] = \
                            h2[r * wp + c: r * wp + c + 1, :]

    # ---- stage 3 conv (+bias/ReLU) with the pool folded as a row max ----
    z3 = jnp.dot(p3_ref[...].astype(jnp.bfloat16), w3_ref[...],
                 preferred_element_type=jnp.float32)                          # (4, C3)
    h3 = jnp.maximum(jnp.max(z3, axis=0, keepdims=True) + b3_ref[...], 0.0)   # (1, C3)

    # ---- flatten (spatial is 1x1) -> Linear -> Softmax ----
    logits = jnp.dot(h3.astype(wo_ref.dtype), wo_ref[...],
                     preferred_element_type=jnp.float32) + bo_ref[...]        # (1, 4)
    m = jnp.max(logits, axis=-1, keepdims=True)
    e = jnp.exp(logits - m)
    denom = jnp.sum(e, axis=-1, keepdims=True)
    o_ref[0] = e * pl.reciprocal(denom, approx=True)   # EUP slot, otherwise idle


# ---------------------------------------------------------------------------
# Wrapper glue (tiny XLA ops): im2col for stages 1 and 2 only.
# ---------------------------------------------------------------------------
def _pool_grouped_patches(x):
    """x: (B, H, W, C) -> (B, 4*Hp*Wp, 9*C) pool-grouped im2col rows (bf16).

    Row index = ((ph*2+pw)*Hp + hp)*Wp + wp holds the 3x3/stride-2 conv patch of conv
    output pixel (2*hp+ph, 2*wp+pw), i.e. maxpool-window position (ph, pw) of pooled
    pixel (hp, wp).  K ordering is (kh, kw, c), matching the flattened HWIO weights.
    """
    B, H, W, C = x.shape
    Ho, Wo = H // 2, W // 2
    Hp, Wp = Ho // 2, Wo // 2
    xp = jnp.pad(x, ((0, 0), (1, 1), (1, 1), (0, 0)))
    cols = []
    for kh in range(3):
        for kw in range(3):
            cols.append(xp[:, kh:kh + 2 * Ho - 1:2, kw:kw + 2 * Wo - 1:2, :])
    patches = jnp.concatenate(cols, axis=-1)                        # (B, Ho, Wo, 9C)
    K = 9 * C
    g = patches.reshape(B, Hp, 2, Wp, 2, K).transpose(0, 2, 4, 1, 3, 5)
    return g.reshape(B, 4 * Hp * Wp, K), Hp, Wp


def conv_relu_pool_stage(patches, w_flat, bias):
    """patches: (B, 4*M, K) bf16 -> (B, M, Cout) bf16 pooled activations."""
    B, M4, K = patches.shape
    M = M4 // 4
    Cout = w_flat.shape[1]
    return pl.pallas_call(
        conv_relu_pool_kernel,
        out_shape=jax.ShapeDtypeStruct((B, M, Cout), jnp.bfloat16),
        grid=(B,),
        in_specs=[
            pl.BlockSpec((1, M4, K), lambda b: (b, 0, 0)),
            pl.BlockSpec((K, Cout), lambda b: (0, 0)),
            pl.BlockSpec((1, Cout), lambda b: (0, 0)),
        ],
        out_specs=pl.BlockSpec((1, M, Cout), lambda b: (b, 0, 0)),
        compiler_params=pltpu.CompilerParams(dimension_semantics=("parallel",)),
    )(patches, w_flat, bias)


def fused_stage2_tail(p2, hp, wp, w2, b2, w3, b3, w_out, b_out):
    """Fused stage2 + stage3 + flatten + linear + softmax.  p2: (B, 4*hp*wp, 9*Cin2)."""
    assert hp == 4 and wp == 4, "Linear(4F,4) requires a 4x4 stage-2 grid (64x64 input)"
    B, M4, K2 = p2.shape
    C2 = w2.shape[1]
    C3 = w3.shape[1]
    nclass = w_out.shape[1]
    kernel = functools.partial(fused_tail_kernel, hp=hp, wp=wp)
    probs = pl.pallas_call(
        kernel,
        out_shape=jax.ShapeDtypeStruct((B, 1, nclass), jnp.float32),
        grid=(B,),
        in_specs=[
            pl.BlockSpec((1, M4, K2), lambda b: (b, 0, 0)),
            pl.BlockSpec((K2, C2), lambda b: (0, 0)),
            pl.BlockSpec((1, C2), lambda b: (0, 0)),
            pl.BlockSpec((9 * C2, C3), lambda b: (0, 0)),
            pl.BlockSpec((1, C3), lambda b: (0, 0)),
            pl.BlockSpec((C3, nclass), lambda b: (0, 0)),
            pl.BlockSpec((1, nclass), lambda b: (0, 0)),
        ],
        out_specs=pl.BlockSpec((1, 1, nclass), lambda b: (b, 0, 0)),
        scratch_shapes=[pltpu.VMEM((4, 9 * C2), jnp.float32)],
        compiler_params=pltpu.CompilerParams(dimension_semantics=("parallel",)),
    )(p2, w2, b2, w3, b3, w_out, b_out)
    return probs.reshape(B, nclass)


def prnet_forward(x_nchw, params):
    # PyTorch-style NCHW -> NHWC once; bf16 operands, f32 accumulation in-kernel.
    x = jnp.transpose(x_nchw, (0, 2, 3, 1)).astype(jnp.bfloat16)
    B = x.shape[0]

    p1, Hp1, Wp1 = _pool_grouped_patches(x)
    h1 = conv_relu_pool_stage(p1, params["w1"], params["b1"])        # (B, 256, F)
    h1 = h1.reshape(B, Hp1, Wp1, -1)                                 # (B, 16, 16, F)

    p2, Hp2, Wp2 = _pool_grouped_patches(h1)                         # (B, 64, 9F)
    # One fused kernel for everything downstream of stage-2 patches.
    return fused_stage2_tail(p2, Hp2, Wp2, params["w2"], params["b2"],
                             params["w3"], params["b3"],
                             params["w_out"], params["b_out"])


def init_params(key, F=64):
    # Deterministic synthetic init (shapes match PRNet.__init__(_F=F); no checkpoint).
    def conv_w(k, cin, cout):
        w = jax.random.normal(k, (3, 3, cin, cout), jnp.float32) * (2.0 / (9 * cin)) ** 0.5
        return w.reshape(9 * cin, cout).astype(jnp.bfloat16)   # HWIO flattened, (kh,kw,c)
    ks = jax.random.split(key, 8)
    return {
        "w1": conv_w(ks[0], 3, F),
        "b1": jax.random.normal(ks[1], (1, F), jnp.float32) * 0.01,
        "w2": conv_w(ks[2], F, 2 * F),
        "b2": jax.random.normal(ks[3], (1, 2 * F), jnp.float32) * 0.01,
        "w3": conv_w(ks[4], 2 * F, 4 * F),
        "b3": jax.random.normal(ks[5], (1, 4 * F), jnp.float32) * 0.01,
        "w_out": (jax.random.normal(ks[6], (4 * F, 4), jnp.float32)
                  * (1.0 / (4 * F)) ** 0.5).astype(jnp.bfloat16),
        "b_out": jax.random.normal(ks[7], (1, 4), jnp.float32) * 0.01,
    }


def prnet_reference(x_nchw, params):
    """Pure-JAX/XLA reference, mirroring the kernels' bf16 operands / bf16 activations."""
    x = jnp.transpose(x_nchw, (0, 2, 3, 1)).astype(jnp.bfloat16).astype(jnp.float32)

    def stage(h, w_flat, b):
        cin, cout = h.shape[-1], w_flat.shape[-1]
        w = w_flat.astype(jnp.float32).reshape(3, 3, cin, cout)
        y = jax.lax.conv_general_dilated(
            h, w, window_strides=(2, 2), padding=((1, 1), (1, 1)),
            dimension_numbers=("NHWC", "HWIO", "NHWC"))
        y = jnp.maximum(y + b.reshape(1, 1, 1, cout), 0.0)
        B, Ho, Wo, C = y.shape
        y = y.reshape(B, Ho // 2, 2, Wo // 2, 2, C).max(axis=(2, 4))
        return y.astype(jnp.bfloat16).astype(jnp.float32)   # bf16 activation storage

    h = stage(x, params["w1"], params["b1"])
    h = stage(h, params["w2"], params["b2"])
    h = stage(h, params["w3"], params["b3"])
    B = h.shape[0]
    logits = h.reshape(B, -1) @ params["w_out"].astype(jnp.float32) + params["b_out"]
    return jax.nn.softmax(logits, axis=-1)


if __name__ == "__main__":
    key = jax.random.PRNGKey(0)
    kx, kp = jax.random.split(key)
    F = 64  # module default; keeps every Cout >= 64 so stores stay lane-dense
    # Spatial must be 64x64 so three (stride-2 conv + 2x2 pool) stages reach 1x1,
    # as required by Linear(4F, 4) after Flatten.
    x = jax.random.normal(kx, (2, 3, 64, 64), jnp.float32)  # NCHW like PyTorch
    params = init_params(kp, F=F)

    out = jax.jit(prnet_forward)(x, params)
    out = jax.block_until_ready(out)

    assert out.shape == (2, 4)
    # rows are probabilities (loose tolerance: approx reciprocal in-kernel)
    assert bool(jnp.all(jnp.abs(jnp.sum(out, axis=-1) - 1.0) < 1e-2))
    # numerics vs. an independent pure-JAX/XLA reference of the same forward pass
    ref = jax.block_until_ready(jax.jit(prnet_reference)(x, params))
    assert bool(jnp.all(jnp.abs(out - ref) < 2e-2))
    print("KERNEL_OK")
</pallas_src>

<mosaic_0001>
module attributes {stable_mosaic.version = 11 : i64} {
  func.func @conv_relu_pool_kernel(%arg0: i32, %arg1: memref<1x1024x27xbf16, #tpu.memory_space<vmem>>, %arg2: memref<27x64xbf16, #tpu.memory_space<vmem>>, %arg3: memref<1x64xf32, #tpu.memory_space<vmem>>, %arg4: memref<1x256x64xbf16, #tpu.memory_space<vmem>>) attributes {dimension_semantics = [#tpu.dimension_semantics<parallel>], iteration_bounds = array<i64: 2>, scalar_prefetch = 0 : i64, scratch_operands = 0 : i64, tpu.core_type = #tpu.core_type<tc>, window_params = [{transform_indices = @transform_0, window_bounds = array<i64: 1, 1024, 27>}, {pipeline_mode = #tpu.pipeline_mode<synchronous>, transform_indices = @transform_1, window_bounds = array<i64: 27, 64>}, {pipeline_mode = #tpu.pipeline_mode<synchronous>, transform_indices = @transform_2, window_bounds = array<i64: 1, 64>}, {transform_indices = @transform_3, window_bounds = array<i64: 1, 256, 64>}]} {
    %c0 = arith.constant 0 : index
    %c0_0 = arith.constant 0 : index
    %c0_1 = arith.constant 0 : index
    %0 = vector.load %arg1[%c0, %c0_0, %c0_1] : memref<1x1024x27xbf16, #tpu.memory_space<vmem>>, vector<1x1024x27xbf16>
    %1 = vector.shape_cast %0 : vector<1x1024x27xbf16> to vector<1024x27xbf16>
    %c0_2 = arith.constant 0 : index
    %c0_3 = arith.constant 0 : index
    %2 = vector.load %arg2[%c0_2, %c0_3] : memref<27x64xbf16, #tpu.memory_space<vmem>>, vector<27x64xbf16>
    %cst = arith.constant dense<0.000000e+00> : vector<1024x64xf32>
    %3 = tpu.matmul %1, %2, %cst {dimension_numbers = #tpu.dot_dimension_numbers<[1], [0], [0], [1], [0, 0, 1, 1], [], []>} : vector<1024x27xbf16>, vector<27x64xbf16>, vector<1024x64xf32> -> vector<1024x64xf32>
    %4 = vector.shape_cast %3 : vector<1024x64xf32> to vector<4x256x64xf32>
    %cst_4 = arith.constant dense<0xFF800000> : vector<256x64xf32>
    %5 = vector.multi_reduction <maximumf>, %4, %cst_4 [0] : vector<4x256x64xf32> to vector<256x64xf32>
    %c0_5 = arith.constant 0 : index
    %c0_6 = arith.constant 0 : index
    %6 = vector.load %arg3[%c0_5, %c0_6] : memref<1x64xf32, #tpu.memory_space<vmem>>, vector<1x64xf32>
    %7 = vector.broadcast %6 : vector<1x64xf32> to vector<256x64xf32>
    %8 = arith.addf %5, %7 : vector<256x64xf32>
    %cst_7 = arith.constant 0.000000e+00 : f32
    %9 = vector.broadcast %cst_7 : f32 to vector<256x64xf32>
    %10 = arith.maximumf %8, %9 : vector<256x64xf32>
    %11 = arith.truncf %10 : vector<256x64xf32> to vector<256x64xbf16>
    %c0_8 = arith.constant 0 : index
    %c0_9 = arith.constant 0 : index
    %c0_10 = arith.constant 0 : index
    %12 = vector.load %arg4[%c0_8, %c0_9, %c0_10] : memref<1x256x64xbf16, #tpu.memory_space<vmem>>, vector<1x256x64xbf16>
    %13 = vector.shape_cast %12 : vector<1x256x64xbf16> to vector<256x64xbf16>
    %14 = vector.shape_cast %11 : vector<256x64xbf16> to vector<1x256x64xbf16>
    tpu.vector_store %arg4[%c0_8, %c0_9, %c0_10], %14 {strides = array<i32>} : memref<1x256x64xbf16, #tpu.memory_space<vmem>>, vector<1x256x64xbf16>,
    return
  }
  func.func @transform_0(%arg0: i32) -> (i32, i32, i32) {
    %c0_i32 = arith.constant 0 : i32
    %c0_i32_0 = arith.constant 0 : i32
    %c0_i32_1 = arith.constant 0 : i32
    return %arg0, %c0_i32, %c0_i32_0 : i32, i32, i32
  }
  func.func @transform_1(%arg0: i32) -> (i32, i32) {
    %c0_i32 = arith.constant 0 : i32
    %c0_i32_0 = arith.constant 0 : i32
    %c0_i32_1 = arith.constant 0 : i32
    return %c0_i32, %c0_i32_0 : i32, i32
  }
  func.func @transform_2(%arg0: i32) -> (i32, i32) {
    %c0_i32 = arith.constant 0 : i32
    %c0_i32_0 = arith.constant 0 : i32
    %c0_i32_1 = arith.constant 0 : i32
    return %c0_i32, %c0_i32_0 : i32, i32
  }
  func.func @transform_3(%arg0: i32) -> (i32, i32, i32) {
    %c0_i32 = arith.constant 0 : i32
    %c0_i32_0 = arith.constant 0 : i32
    %c0_i32_1 = arith.constant 0 : i32
    return %arg0, %c0_i32, %c0_i32_0 : i32, i32, i32
  }
}

module attributes {stable_mosaic.version = 11 : i64} {
  func.func @fused_tail_kernel(%arg0: i32, %arg1: memref<1x64x576xbf16, #tpu.memory_space<vmem>>, %arg2: memref<576x128xbf16, #tpu.memory_space<vmem>>, %arg3: memref<1x128xf32, #tpu.memory_space<vmem>>, %arg4: memref<1152x256xbf16, #tpu.memory_space<vmem>>, %arg5: memref<1x256xf32, #tpu.memory_space<vmem>>, %arg6: memref<256x4xbf16, #tpu.memory_space<vmem>>, %arg7: memref<1x4xf32, #tpu.memory_space<vmem>>, %arg8: memref<1x1x4xf32, #tpu.memory_space<vmem>>, %arg9: memref<4x1152xf32, #tpu.memory_space<vmem>>) attributes {dimension_semantics = [#tpu.dimension_semantics<parallel>], iteration_bounds = array<i64: 2>, scalar_prefetch = 0 : i64, scratch_operands = 1 : i64, tpu.core_type = #tpu.core_type<tc>, window_params = [{transform_indices = @transform_0, window_bounds = array<i64: 1, 64, 576>}, {pipeline_mode = #tpu.pipeline_mode<synchronous>, transform_indices = @transform_1, window_bounds = array<i64: 576, 128>}, {pipeline_mode = #tpu.pipeline_mode<synchronous>, transform_indices = @transform_2, window_bounds = array<i64: 1, 128>}, {pipeline_mode = #tpu.pipeline_mode<synchronous>, transform_indices = @transform_3, window_bounds = array<i64: 1152, 256>}, {pipeline_mode = #tpu.pipeline_mode<synchronous>, transform_indices = @transform_4, window_bounds = array<i64: 1, 256>}, {pipeline_mode = #tpu.pipeline_mode<synchronous>, transform_indices = @transform_5, window_bounds = array<i64: 256, 4>}, {pipeline_mode = #tpu.pipeline_mode<synchronous>, transform_indices = @transform_6, window_bounds = array<i64: 1, 4>}, {transform_indices = @transform_7, window_bounds = array<i64: 1, 1, 4>}]} {
    %c0 = arith.constant 0 : index
    %c0_0 = arith.constant 0 : index
    %c0_1 = arith.constant 0 : index
    %0 = vector.load %arg1[%c0, %c0_0, %c0_1] : memref<1x64x576xbf16, #tpu.memory_space<vmem>>, vector<1x64x576xbf16>
    %1 = vector.shape_cast %0 : vector<1x64x576xbf16> to vector<64x576xbf16>
    %c0_2 = arith.constant 0 : index
    %c0_3 = arith.constant 0 : index
    %2 = vector.load %arg2[%c0_2, %c0_3] : memref<576x128xbf16, #tpu.memory_space<vmem>>, vector<576x128xbf16>
    %cst = arith.constant dense<0.000000e+00> : vector<64x128xf32>
    %3 = tpu.matmul %1, %2, %cst {dimension_numbers = #tpu.dot_dimension_numbers<[1], [0], [0], [1], [0, 0, 1, 1], [], []>} : vector<64x576xbf16>, vector<576x128xbf16>, vector<64x128xf32> -> vector<64x128xf32>
    %4 = vector.shape_cast %3 : vector<64x128xf32> to vector<4x16x128xf32>
    %cst_4 = arith.constant dense<0xFF800000> : vector<16x128xf32>
    %5 = vector.multi_reduction <maximumf>, %4, %cst_4 [0] : vector<4x16x128xf32> to vector<16x128xf32>
    %c0_5 = arith.constant 0 : index
    %c0_6 = arith.constant 0 : index
    %6 = vector.load %arg3[%c0_5, %c0_6] : memref<1x128xf32, #tpu.memory_space<vmem>>, vector<1x128xf32>
    %7 = vector.broadcast %6 : vector<1x128xf32> to vector<16x128xf32>
    %8 = arith.addf %5, %7 : vector<16x128xf32>
    %cst_7 = arith.constant 0.000000e+00 : f32
    %9 = vector.broadcast %cst_7 : f32 to vector<16x128xf32>
    %10 = arith.maximumf %8, %9 : vector<16x128xf32>
    %cst_8 = arith.constant 0.000000e+00 : f32
    %11 = vector.broadcast %cst_8 : f32 to vector<4x1152xf32>
    %c0_9 = arith.constant 0 : index
    %c0_10 = arith.constant 0 : index
    %12 = vector.load %arg9[%c0_9, %c0_10] : memref<4x1152xf32, #tpu.memory_space<vmem>>, vector<4x1152xf32>
    tpu.vector_store %arg9[%c0_9, %c0_10], %11 {strides = array<i32>} : memref<4x1152xf32, #tpu.memory_space<vmem>>, vector<4x1152xf32>,
    %13 = vector.extract_strided_slice %10 {offsets = [0, 0], sizes = [1, 128], strides = [1, 1]} : vector<16x128xf32> to vector<1x128xf32>
    %c0_11 = arith.constant 0 : index
    %c512 = arith.constant 512 : index
    %14 = vector.load %arg9[%c0_11, %c512] : memref<4x1152xf32, #tpu.memory_space<vmem>>, vector<1x128xf32>
    tpu.vector_store %arg9[%c0_11, %c512], %13 {strides = array<i32>} : memref<4x1152xf32, #tpu.memory_space<vmem>>, vector<1x128xf32>,
    %15 = vector.extract_strided_slice %10 {offsets = [1, 0], sizes = [1, 128], strides = [1, 1]} : vector<16x128xf32> to vector<1x128xf32>
    %c0_12 = arith.constant 0 : index
    %c640 = arith.constant 640 : index
    %16 = vector.load %arg9[%c0_12, %c640] : memref<4x1152xf32, #tpu.memory_space<vmem>>, vector<1x128xf32>
    tpu.vector_store %arg9[%c0_12, %c640], %15 {strides = array<i32>} : memref<4x1152xf32, #tpu.memory_space<vmem>>, vector<1x128xf32>,
    %17 = vector.extract_strided_slice %10 {offsets = [4, 0], sizes = [1, 128], strides = [1, 1]} : vector<16x128xf32> to vector<1x128xf32>
    %c0_13 = arith.constant 0 : index
    %c896 = arith.constant 896 : index
    %18 = vector.load %arg9[%c0_13, %c896] : memref<4x1152xf32, #tpu.memory_space<vmem>>, vector<1x128xf32>
    tpu.vector_store %arg9[%c0_13, %c896], %17 {strides = array<i32>} : memref<4x1152xf32, #tpu.memory_space<vmem>>, vector<1x128xf32>,
    %19 = vector.extract_strided_slice %10 {offsets = [5, 0], sizes = [1, 128], strides = [1, 1]} : vector<16x128xf32> to vector<1x128xf32>
    %c0_14 = arith.constant 0 : index
    %c1024 = arith.constant 1024 : index
    %20 = vector.load %arg9[%c0_14, %c1024] : memref<4x1152xf32, #tpu.memory_space<vmem>>, vector<1x128xf32>
    tpu.vector_store %arg9[%c0_14, %c1024], %19 {strides = array<i32>} : memref<4x1152xf32, #tpu.memory_space<vmem>>, vector<1x128xf32>,
    %21 = vector.extract_strided_slice %10 {offsets = [1, 0], sizes = [1, 128], strides = [1, 1]} : vector<16x128xf32> to vector<1x128xf32>
    %c1 = arith.constant 1 : index
    %c384 = arith.constant 384 : index
    %22 = vector.load %arg9[%c1, %c384] : memref<4x1152xf32, #tpu.memory_space<vmem>>, vector<1x128xf32>
    tpu.vector_store %arg9[%c1, %c384], %21 {strides = array<i32>} : memref<4x1152xf32, #tpu.memory_space<vmem>>, vector<1x128xf32>,
    %23 = vector.extract_strided_slice %10 {offsets = [2, 0], sizes = [1, 128], strides = [1, 1]} : vector<16x128xf32> to vector<1x128xf32>
    %c1_15 = arith.constant 1 : index
    %c512_16 = arith.constant 512 : index
    %24 = vector.load %arg9[%c1_15, %c512_16] : memref<4x1152xf32, #tpu.memory_space<vmem>>, vector<1x128xf32>
    tpu.vector_store %arg9[%c1_15, %c512_16], %23 {strides = array<i32>} : memref<4x1152xf32, #tpu.memory_space<vmem>>, vector<1x128xf32>,
    %25 = vector.extract_strided_slice %10 {offsets = [3, 0], sizes = [1, 128], strides = [1, 1]} : vector<16x128xf32> to vector<1x128xf32>
    %c1_17 = arith.constant 1 : index
    %c640_18 = arith.constant 640 : index
    %26 = vector.load %arg9[%c1_17, %c640_18] : memref<4x1152xf32, #tpu.memory_space<vmem>>, vector<1x128xf32>
    tpu.vector_store %arg9[%c1_17, %c640_18], %25 {strides = array<i32>} : memref<4x1152xf32, #tpu.memory_space<vmem>>, vector<1x128xf32>,
    %27 = vector.extract_strided_slice %10 {offsets = [5, 0], sizes = [1, 128], strides = [1, 1]} : vector<16x128xf32> to vector<1x128xf32>
    %c1_19 = arith.constant 1 : index
    %c768 = arith.constant 768 : index
    %28 = vector.load %arg9[%c1_19, %c768] : memref<4x1152xf32, #tpu.memory_space<vmem>>, vector<1x128xf32>
    tpu.vector_store %arg9[%c1_19, %c768], %27 {strides = array<i32>} : memref<4x1152xf32, #tpu.memory_space<vmem>>, vector<1x128xf32>,
    %29 = vector.extract_strided_slice %10 {offsets = [6, 0], sizes = [1, 128], strides = [1, 1]} : vector<16x128xf32> to vector<1x128xf32>
    %c1_20 = arith.constant 1 : index
    %c896_21 = arith.constant 896 : index
    %30 = vector.load %arg9[%c1_20, %c896_21] : memref<4x1152xf32, #tpu.memory_space<vmem>>, vector<1x128xf32>
    tpu.vector_store %arg9[%c1_20, %c896_21], %29 {strides = array<i32>} : memref<4x1152xf32, #tpu.memory_space<vmem>>, vector<1x128xf32>,
    %31 = vector.extract_strided_slice %10 {offsets = [7, 0], sizes = [1, 128], strides = [1, 1]} : vector<16x128xf32> to vector<1x128xf32>
    %c1_22 = arith.constant 1 : index
    %c1024_23 = arith.constant 1024 : index
    %32 = vector.load %arg9[%c1_22, %c1024_23] : memref<4x1152xf32, #tpu.memory_space<vmem>>, vector<1x128xf32>
    tpu.vector_store %arg9[%c1_22, %c1024_23], %31 {strides = array<i32>} : memref<4x1152xf32, #tpu.memory_space<vmem>>, vector<1x128xf32>,
    %33 = vector.extract_strided_slice %10 {offsets = [4, 0], sizes = [1, 128], strides = [1, 1]} : vector<16x128xf32> to vector<1x128xf32>
    %c2 = arith.constant 2 : index
    %c128 = arith.constant 128 : index
    %34 = vector.load %arg9[%c2, %c128] : memref<4x1152xf32, #tpu.memory_space<vmem>>, vector<1x128xf32>
    tpu.vector_store %arg9[%c2, %c128], %33 {strides = array<i32>} : memref<4x1152xf32, #tpu.memory_space<vmem>>, vector<1x128xf32>,
    %35 = vector.extract_strided_slice %10 {offsets = [5, 0], sizes = [1, 128], strides = [1, 1]} : vector<16x128xf32> to vector<1x128xf32>
    %c2_24 = arith.constant 2 : index
    %c256 = arith.constant 256 : index
    %36 = vector.load %arg9[%c2_24, %c256] : memref<4x1152xf32, #tpu.memory_space<vmem>>, vector<1x128xf32>
    tpu.vector_store %arg9[%c2_24, %c256], %35 {strides = array<i32>} : memref<4x1152xf32, #tpu.memory_space<vmem>>, vector<1x128xf32>,
    %37 = vector.extract_strided_slice %10 {offsets = [8, 0], sizes = [1, 128], strides = [1, 1]} : vector<16x128xf32> to vector<1x128xf32>
    %c2_25 = arith.constant 2 : index
    %c512_26 = arith.constant 512 : index
    %38 = vector.load %arg9[%c2_25, %c512_26] : memref<4x1152xf32, #tpu.memory_space<vmem>>, vector<1x128xf32>
    tpu.vector_store %arg9[%c2_25, %c512_26], %37 {strides = array<i32>} : memref<4x1152xf32, #tpu.memory_space<vmem>>, vector<1x128xf32>,
    %39 = vector.extract_strided_slice %10 {offsets = [9, 0], sizes = [1, 128], strides = [1, 1]} : vector<16x128xf32> to vector<1x128xf32>
    %c2_27 = arith.constant 2 : index
    %c640_28 = arith.constant 640 : index
    %40 = vector.load %arg9[%c2_27, %c640_28] : memref<4x1152xf32, #tpu.memory_space<vmem>>, vector<1x128xf32>
    tpu.vector_store %arg9[%c2_27, %c640_28], %39 {strides = array<i32>} : memref<4x1152xf32, #tpu.memory_space<vmem>>, vector<1x128xf32>,
    %41 = vector.extract_strided_slice %10 {offsets = [12, 0], sizes = [1, 128], strides = [1, 1]} : vector<16x128xf32> to vector<1x128xf32>
    %c2_29 = arith.constant 2 : index
    %c896_30 = arith.constant 896 : index
    %42 = vector.load %arg9[%c2_29, %c896_30] : memref<4x1152xf32, #tpu.memory_space<vmem>>, vector<1x128xf32>
    tpu.vector_store %arg9[%c2_29, %c896_30], %41 {strides = array<i32>} : memref<4x1152xf32, #tpu.memory_space<vmem>>, vector<1x128xf32>,
    %43 = vector.extract_strided_slice %10 {offsets = [13, 0], sizes = [1, 128], strides = [1, 1]} : vector<16x128xf32> to vector<1x128xf32>
    %c2_31 = arith.constant 2 : index
    %c1024_32 = arith.constant 1024 : index
    %44 = vector.load %arg9[%c2_31, %c1024_32] : memref<4x1152xf32, #tpu.memory_space<vmem>>, vector<1x128xf32>
    tpu.vector_store %arg9[%c2_31, %c1024_32], %43 {strides = array<i32>} : memref<4x1152xf32, #tpu.memory_space<vmem>>, vector<1x128xf32>,
    %45 = vector.extract_strided_slice %10 {offsets = [5, 0], sizes = [1, 128], strides = [1, 1]} : vector<16x128xf32> to vector<1x128xf32>
    %c3 = arith.constant 3 : index
    %c0_33 = arith.constant 0 : index
    %46 = vector.load %arg9[%c3, %c0_33] : memref<4x1152xf32, #tpu.memory_space<vmem>>, vector<1x128xf32>
    tpu.vector_store %arg9[%c3, %c0_33], %45 {strides = array<i32>} : memref<4x1152xf32, #tpu.memory_space<vmem>>, vector<1x128xf32>,
    %47 = vector.extract_strided_slice %10 {offsets = [6, 0], sizes = [1, 128], strides = [1, 1]} : vector<16x128xf32> to vector<1x128xf32>
    %c3_34 = arith.constant 3 : index
    %c128_35 = arith.constant 128 : index
    %48 = vector.load %arg9[%c3_34, %c128_35] : memref<4x1152xf32, #tpu.memory_space<vmem>>, vector<1x128xf32>
    tpu.vector_store %arg9[%c3_34, %c128_35], %47 {strides = array<i32>} : memref<4x1152xf32, #tpu.memory_space<vmem>>, vector<1x128xf32>,
    %49 = vector.extract_strided_slice %10 {offsets = [7, 0], sizes = [1, 128], strides = [1, 1]} : vector<16x128xf32> to vector<1x128xf32>
    %c3_36 = arith.constant 3 : index
    %c256_37 = arith.constant 256 : index
    %50 = vector.load %arg9[%c3_36, %c256_37] : memref<4x1152xf32, #tpu.memory_space<vmem>>, vector<1x128xf32>
    tpu.vector_store %arg9[%c3_36, %c256_37], %49 {strides = array<i32>} : memref<4x1152xf32, #tpu.memory_space<vmem>>, vector<1x128xf32>,
    %51 = vector.extract_strided_slice %10 {offsets = [9, 0], sizes = [1, 128], strides = [1, 1]} : vector<16x128xf32> to vector<1x128xf32>
    %c3_38 = arith.constant 3 : index
    %c384_39 = arith.constant 384 : index
    %52 = vector.load %arg9[%c3_38, %c384_39] : memref<4x1152xf32, #tpu.memory_space<vmem>>, vector<1x128xf32>
    tpu.vector_store %arg9[%c3_38, %c384_39], %51 {strides = array<i32>} : memref<4x1152xf32, #tpu.memory_space<vmem>>, vector<1x128xf32>,
    %53 = vector.extract_strided_slice %10 {offsets = [10, 0], sizes = [1, 128], strides = [1, 1]} : vector<16x128xf32> to vector<1x128xf32>
    %c3_40 = arith.constant 3 : index
    %c512_41 = arith.constant 512 : index
    %54 = vector.load %arg9[%c3_40, %c512_41] : memref<4x1152xf32, #tpu.memory_space<vmem>>, vector<1x128xf32>
    tpu.vector_store %arg9[%c3_40, %c512_41], %53 {strides = array<i32>} : memref<4x1152xf32, #tpu.memory_space<vmem>>, vector<1x128xf32>,
    %55 = vector.extract_strided_slice %10 {offsets = [11, 0], sizes = [1, 128], strides = [1, 1]} : vector<16x128xf32> to vector<1x128xf32>
    %c3_42 = arith.constant 3 : index
    %c640_43 = arith.constant 640 : index
    %56 = vector.load %arg9[%c3_42, %c640_43] : memref<4x1152xf32, #tpu.memory_space<vmem>>, vector<1x128xf32>
    tpu.vector_store %arg9[%c3_42, %c640_43], %55 {strides = array<i32>} : memref<4x1152xf32, #tpu.memory_space<vmem>>, vector<1x128xf32>,
    %57 = vector.extract_strided_slice %10 {offsets = [13, 0], sizes = [1, 128], strides = [1, 1]} : vector<16x128xf32> to vector<1x128xf32>
    %c3_44 = arith.constant 3 : index
    %c768_45 = arith.constant 768 : index
    %58 = vector.load %arg9[%c3_44, %c768_45] : memref<4x1152xf32, #tpu.memory_space<vmem>>, vector<1x128xf32>
    tpu.vector_store %arg9[%c3_44, %c768_45], %57 {strides = array<i32>} : memref<4x1152xf32, #tpu.memory_space<vmem>>, vector<1x128xf32>,
    %59 = vector.extract_strided_slice %10 {offsets = [14, 0], sizes = [1, 128], strides = [1, 1]} : vector<16x128xf32> to vector<1x128xf32>
    %c3_46 = arith.constant 3 : index
    %c896_47 = arith.constant 896 : index
    %60 = vector.load %arg9[%c3_46, %c896_47] : memref<4x1152xf32, #tpu.memory_space<vmem>>, vector<1x128xf32>
    tpu.vector_store %arg9[%c3_46, %c896_47], %59 {strides = array<i32>} : memref<4x1152xf32, #tpu.memory_space<vmem>>, vector<1x128xf32>,
    %61 = vector.extract_strided_slice %10 {offsets = [15, 0], sizes = [1, 128], strides = [1, 1]} : vector<16x128xf32> to vector<1x128xf32>
    %c3_48 = arith.constant 3 : index
    %c1024_49 = arith.constant 1024 : index
    %62 = vector.load %arg9[%c3_48, %c1024_49] : memref<4x1152xf32, #tpu.memory_space<vmem>>, vector<1x128xf32>
    tpu.vector_store %arg9[%c3_48, %c1024_49], %61 {strides = array<i32>} : memref<4x1152xf32, #tpu.memory_space<vmem>>, vector<1x128xf32>,
    %c0_50 = arith.constant 0 : index
    %c0_51 = arith.constant 0 : index
    %63 = vector.load %arg9[%c0_50, %c0_51] : memref<4x1152xf32, #tpu.memory_space<vmem>>, vector<4x1152xf32>
    %64 = arith.truncf %63 : vector<4x1152xf32> to vector<4x1152xbf16>
    %c0_52 = arith.constant 0 : index
    %c0_53 = arith.constant 0 : index
    %65 = vector.load %arg4[%c0_52, %c0_53] : memref<1152x256xbf16, #tpu.memory_space<vmem>>, vector<1152x256xbf16>
    %cst_54 = arith.constant dense<0.000000e+00> : vector<4x256xf32>
    %66 = tpu.matmul %64, %65, %cst_54 {dimension_numbers = #tpu.dot_dimension_numbers<[1], [0], [0], [1], [0, 0, 1, 1], [], []>} : vector<4x1152xbf16>, vector<1152x256xbf16>, vector<4x256xf32> -> vector<4x256xf32>
    %cst_55 = arith.constant dense<0xFF800000> : vector<256xf32>
    %67 = vector.multi_reduction <maximumf>, %66, %cst_55 [0] : vector<4x256xf32> to vector<256xf32>
    %68 = vector.shape_cast %67 : vector<256xf32> to vector<1x256xf32>
    %c0_56 = arith.constant 0 : index
    %c0_57 = arith.constant 0 : index
    %69 = vector.load %arg5[%c0_56, %c0_57] : memref<1x256xf32, #tpu.memory_space<vmem>>, vector<1x256xf32>
    %70 = arith.addf %68, %69 : vector<1x256xf32>
    %cst_58 = arith.constant 0.000000e+00 : f32
    %71 = vector.broadcast %cst_58 : f32 to vector<1x256xf32>
    %72 = arith.maximumf %70, %71 : vector<1x256xf32>
    %73 = arith.truncf %72 : vector<1x256xf32> to vector<1x256xbf16>
    %c0_59 = arith.constant 0 : index
    %c0_60 = arith.constant 0 : index
    %74 = vector.load %arg6[%c0_59, %c0_60] : memref<256x4xbf16, #tpu.memory_space<vmem>>, vector<256x4xbf16>
    %cst_61 = arith.constant dense<0.000000e+00> : vector<1x4xf32>
    %75 = tpu.matmul %73, %74, %cst_61 {dimension_numbers = #tpu.dot_dimension_numbers<[1], [0], [0], [1], [0, 0, 1, 1], [], []>} : vector<1x256xbf16>, vector<256x4xbf16>, vector<1x4xf32> -> vector<1x4xf32>
    %c0_62 = arith.constant 0 : index
    %c0_63 = arith.constant 0 : index
    %76 = vector.load %arg7[%c0_62, %c0_63] : memref<1x4xf32, #tpu.memory_space<vmem>>, vector<1x4xf32>
    %77 = arith.addf %75, %76 : vector<1x4xf32>
    %cst_64 = arith.constant dense<0xFF800000> : vector<1xf32>
    %78 = vector.multi_reduction <maximumf>, %77, %cst_64 [1] : vector<1x4xf32> to vector<1xf32>
    %79 = vector.shape_cast %78 : vector<1xf32> to vector<1x1xf32>
    %80 = vector.broadcast %79 : vector<1x1xf32> to vector<1x4xf32>
    %81 = arith.subf %77, %80 : vector<1x4xf32>
    %82 = math.exp %81 : vector<1x4xf32>
    %cst_65 = arith.constant dense<0.000000e+00> : vector<1xf32>
    %83 = vector.multi_reduction <add>, %82, %cst_65 [1] : vector<1x4xf32> to vector<1xf32>
    %84 = vector.shape_cast %83 : vector<1xf32> to vector<1x1xf32>
    %85 = tpu.reciprocal %84 {approx = true} : vector<1x1xf32> -> vector<1x1xf32>
    %86 = vector.broadcast %85 : vector<1x1xf32> to vector<1x4xf32>
    %87 = arith.mulf %82, %86 : vector<1x4xf32>
    %c0_66 = arith.constant 0 : index
    %c0_67 = arith.constant 0 : index
    %c0_68 = arith.constant 0 : index
    %88 = vector.load %arg8[%c0_66, %c0_67, %c0_68] : memref<1x1x4xf32, #tpu.memory_space<vmem>>, vector<1x1x4xf32>
    %89 = vector.shape_cast %88 : vector<1x1x4xf32> to vector<1x4xf32>
    %90 = vector.shape_cast %87 : vector<1x4xf32> to vector<1x1x4xf32>
    tpu.vector_store %arg8[%c0_66, %c0_67, %c0_68], %90 {strides = array<i32>} : memref<1x1x4xf32, #tpu.memory_space<vmem>>, vector<1x1x4xf32>,
    return
  }
  func.func @transform_0(%arg0: i32) -> (i32, i32, i32) {
    %c0_i32 = arith.constant 0 : i32
    %c0_i32_0 = arith.constant 0 : i32
    %c0_i32_1 = arith.constant 0 : i32
    return %arg0, %c0_i32, %c0_i32_0 : i32, i32, i32
  }
  func.func @transform_1(%arg0: i32) -> (i32, i32) {
    %c0_i32 = arith.constant 0 : i32
    %c0_i32_0 = arith.constant 0 : i32
    %c0_i32_1 = arith.constant 0 : i32
    return %c0_i32, %c0_i32_0 : i32, i32
  }
  func.func @transform_2(%arg0: i32) -> (i32, i32) {
    %c0_i32 = arith.constant 0 : i32
    %c0_i32_0 = arith.constant 0 : i32
    %c0_i32_1 = arith.constant 0 : i32
    return %c0_i32, %c0_i32_0 : i32, i32
  }
  func.func @transform_3(%arg0: i32) -> (i32, i32) {
    %c0_i32 = arith.constant 0 : i32
    %c0_i32_0 = arith.constant 0 : i32
    %c0_i32_1 = arith.constant 0 : i32
    return %c0_i32, %c0_i32_0 : i32, i32
  }
  func.func @transform_4(%arg0: i32) -> (i32, i32) {
    %c0_i32 = arith.constant 0 : i32
    %c0_i32_0 = arith.constant 0 : i32
    %c0_i32_1 = arith.constant 0 : i32
    return %c0_i32, %c0_i32_0 : i32, i32
  }
  func.func @transform_5(%arg0: i32) -> (i32, i32) {
    %c0_i32 = arith.constant 0 : i32
    %c0_i32_0 = arith.constant 0 : i32
    %c0_i32_1 = arith.constant 0 : i32
    return %c0_i32, %c0_i32_0 : i32, i32
  }
  func.func @transform_6(%arg0: i32) -> (i32, i32) {
    %c0_i32 = arith.constant 0 : i32
    %c0_i32_0 = arith.constant 0 : i32
    %c0_i32_1 = arith.constant 0 : i32
    return %c0_i32, %c0_i32_0 : i32, i32
  }
  func.func @transform_7(%arg0: i32) -> (i32, i32, i32) {
    %c0_i32 = arith.constant 0 : i32
    %c0_i32_0 = arith.constant 0 : i32
    %c0_i32_1 = arith.constant 0 : i32
    return %arg0, %c0_i32, %c0_i32_0 : i32, i32, i32
  }
}

</mosaic_0001>

<bundles_post_ra>
// kernel: prnet_forward.2
= control target key start
LH: loop header
LB: loop body
LE: loop exit
PB: predicated region body
PF: predicated region fallthrough
CT: control target
= control target key end

     0   :  { %s2030_s12 = smov 0   ;;  %s2422_s0 = inlined_call_operand.vmem [shape: bf16[2,1024,27], index: 0, kind: input, shape index: {}]   ;;  %s2423_s1 = inlined_call_operand.vmem [shape: bf16[27,64], index: 1, kind: input, shape index: {}]   ;;  %s2424_s2 = inlined_call_operand.vmem [shape: f32[1,64], index: 2, kind: input, shape index: {}]   ;;  %s2425_s3 = inlined_call_operand.vmem [shape: bf16[2,256,64], index: 3, kind: output, shape index: {}]  }
   0x1 LB: > { %s1577_s13 = sadd.s32 4294967295, %s2007_s12   ;;  %p1581_p0 = scmp.ge.s32.totalorder %s2007_s12, 1  ;;  %s2007_s12 = sphi %s2030_s12, %s13_s12  }
   0x2   : > { %p137_p1 = scmp.lt.s32.totalorder %s2007_s12, 3 }
   0x4   : > { %p138_p2 = pnand %p1581_p0, %p137_p1 }
   0x5   : > { %p161_p3 = scmp.lt.s32.totalorder (!%p138_p2), %s1577_s13, 1 }
   0x6   : > { %141 = sbr.rel (%p138_p2) target bundleno = 417 (0x1a1), region = 32 }
   0xb   : > { %v1848_v0 = vld [vmem:[%s2423_s1 + $0x8] sm:$0xf]  ;;  %v1983_v1 = vld [vmem:[%s2423_s1 + $0x8] sm:$0x30]  ;;  %vm828_vm0 = vcmask 1044480   ;;  %vm829_vm1 = vcmask 1045504  }
   0xc   : > { %v1849_v2 = vor.u32 %v1983_v1, %v1848_v0  ;;  %v2009_v3 = vmov 65535   ;;  %s2427_s13 = smov (!%p161_p3, %s1577_s13), 1  ;;  %v1982_v7 = vld [vmem:[%s2423_s1] sm:$0xff]  ;;  %vm635_vm2 = vcmask 220160   ;;  %vm1164_vm3 = vcmask 523264  }
   0xd   : > { %v830_v4 = vsel %vm828_vm0, 4294967295, %v2009_v3  ;;  %s1916_s18 = sshll.u32 %s2427_s13, 9  ;;  %v2134_v56 = vld [vmem:[%s2424_s2] ss:$0 sm:$0xff]  ;;  %s1917_s26 = sshll.u32 %s2427_s13, 7  ;;  %vm1489_vm4 = vcmask 519168  }
   0xe   : > { %v831_v5 = vsel %vm829_vm1, %v830_v4, 0  ;;  %s2053_s23 = scalar_lea.vmem %s2422_s0, %s1916_s18  ;;  %s2145_s29 = scalar_lea.vmem %s2425_s3, %s1917_s26 }
   0xf   : > { %v833_v6 = vand.u32 %v1849_v2, %v831_v5  ;;  %v1918_v8 = vld [vmem:[%s2053_s23] sm:$0xff]  ;;  %v1919_v12 = vld [vmem:[%s2053_s23 + $0x8] sm:$0xff]  ;;  %v1920_v16 = vld [vmem:[%s2053_s23 + $0x10] sm:$0xff] }
  0x10   : > { %v1934_v9 = vld [vmem:[%s2053_s23 + $0x80] sm:$0xff]  ;;  %v1935_v13 = vld [vmem:[%s2053_s23 + $0x88] sm:$0xff]  ;;  %v1936_v17 = vld [vmem:[%s2053_s23 + $0x90] sm:$0xff] }
  0x11   : > { %841 = vmatpush.bf16.msra.mxu0 %v833_v6  ;;  %1984 = vmatpush.bf16.msra.mxu1 %v833_v6  ;;  %v1950_v10 = vld [vmem:[%s2053_s23 + $0x100] sm:$0xff]  ;;  %v1951_v14 = vld [vmem:[%s2053_s23 + $0x108] sm:$0xff]  ;;  %v1952_v18 = vld [vmem:[%s2053_s23 + $0x110] sm:$0xff] }
  0x12   : > { %1985 = vmatpush.bf16.msra.mxu2 %v833_v6  ;;  %1986 = vmatpush.bf16.msra.mxu3 %v833_v6  ;;  %v1966_v11 = vld [vmem:[%s2053_s23 + $0x180] sm:$0xff]  ;;  %v1967_v15 = vld [vmem:[%s2053_s23 + $0x188] sm:$0xff]  ;;  %v1968_v19 = vld [vmem:[%s2053_s23 + $0x190] sm:$0xff] }
  0x13   : > { %v1921_v20 = vld [vmem:[%s2053_s23 + $0x18] sm:$0xff]  ;;  %v1922_v24 = vld [vmem:[%s2053_s23 + $0x20] sm:$0xff]  ;;  %v1923_v28 = vld [vmem:[%s2053_s23 + $0x28] sm:$0xff] }
  0x14   : > { %v1937_v21 = vld [vmem:[%s2053_s23 + $0x98] sm:$0xff]  ;;  %v1938_v25 = vld [vmem:[%s2053_s23 + $0xa0] sm:$0xff]  ;;  %v1939_v29 = vld [vmem:[%s2053_s23 + $0xa8] sm:$0xff] }
  0x15   : > { %842 = vmatpush.bf16.msra.mxu0 %v1982_v7  ;;  %1987 = vmatpush.bf16.msra.mxu1 %v1982_v7  ;;  %v1953_v22 = vld [vmem:[%s2053_s23 + $0x118] sm:$0xff]  ;;  %v1954_v26 = vld [vmem:[%s2053_s23 + $0x120] sm:$0xff]  ;;  %v1955_v30 = vld [vmem:[%s2053_s23 + $0x128] sm:$0xff] }
  0x16   : > { %1988 = vmatpush.bf16.msra.mxu2 %v1982_v7  ;;  %1989 = vmatpush.bf16.msra.mxu3 %v1982_v7  ;;  %v1969_v23 = vld [vmem:[%s2053_s23 + $0x198] sm:$0xff]  ;;  %v1970_v27 = vld [vmem:[%s2053_s23 + $0x1a0] sm:$0xff]  ;;  %v1971_v31 = vld [vmem:[%s2053_s23 + $0x1a8] sm:$0xff] }
  0x17   : > { %v1924_v32 = vld [vmem:[%s2053_s23 + $0x30] sm:$0xff]  ;;  %v1925_v36 = vld [vmem:[%s2053_s23 + $0x38] sm:$0xff]  ;;  %v1926_v40 = vld [vmem:[%s2053_s23 + $0x40] sm:$0xff] }
  0x18   : > { %1850 = vmatmul.msk.bf16.vlgmr.msra.gmra.mxu0 %vm635_vm2, %v1918_v8  ;;  %1866 = vmatmul.msk.bf16.vlgmr.msra.gmra.mxu1 %vm635_vm2, %v1934_v9  ;;  %v1940_v33 = vld [vmem:[%s2053_s23 + $0xb0] sm:$0xff]  ;;  %v1941_v37 = vld [vmem:[%s2053_s23 + $0xb8] sm:$0xff]  ;;  %v1942_v41 = vld [vmem:[%s2053_s23 + $0xc0] sm:$0xff] }
  0x19   : > { %1882 = vmatmul.msk.bf16.vlgmr.msra.gmra.mxu2 %vm635_vm2, %v1950_v10  ;;  %1898 = vmatmul.msk.bf16.vlgmr.msra.gmra.mxu3 %vm635_vm2, %v1966_v11  ;;  %v1956_v34 = vld [vmem:[%s2053_s23 + $0x130] sm:$0xff]  ;;  %v1957_v38 = vld [vmem:[%s2053_s23 + $0x138] sm:$0xff]  ;;  %v1958_v44 = vld [vmem:[%s2053_s23 + $0x140] sm:$0xff] }
  0x1a   : > { %v1972_v35 = vld [vmem:[%s2053_s23 + $0x1b0] sm:$0xff]  ;;  %v1973_v39 = vld [vmem:[%s2053_s23 + $0x1b8] sm:$0xff]  ;;  %v1974_v45 = vld [vmem:[%s2053_s23 + $0x1c0] sm:$0xff] }
  0x1b   : > { %v1927_v1 = vld [vmem:[%s2053_s23 + $0x48] sm:$0xff] }
  0x1c   : > { %v1943_v2 = vld [vmem:[%s2053_s23 + $0xc8] sm:$0xff] }
  0x1d   : > { %v1959_v6 = vld [vmem:[%s2053_s23 + $0x148] sm:$0xff] }
  0x1e   : > { %v1975_v7 = vld [vmem:[%s2053_s23 + $0x1c8] sm:$0xff] }
  0x28   : > { %1851 = vmatmul.msk.bf16.gmra.mxu0 %vm635_vm2, %v1919_v12  ;;  %1867 = vmatmul.msk.bf16.gmra.mxu1 %vm635_vm2, %v1935_v13 }
  0x29   : > { %1883 = vmatmul.msk.bf16.gmra.mxu2 %vm635_vm2, %v1951_v14  ;;  %1899 = vmatmul.msk.bf16.gmra.mxu3 %vm635_vm2, %v1967_v15 }
  0x38   : > { %1852 = vmatmul.msk.bf16.gmra.mxu0 %vm635_vm2, %v1920_v16  ;;  %1868 = vmatmul.msk.bf16.gmra.mxu1 %vm635_vm2, %v1936_v17 }
  0x39   : > { %1884 = vmatmul.msk.bf16.gmra.mxu2 %vm635_vm2, %v1952_v18  ;;  %1900 = vmatmul.msk.bf16.gmra.mxu3 %vm635_vm2, %v1968_v19 }
  0x48   : > { %1853 = vmatmul.msk.bf16.gmra.mxu0 %vm635_vm2, %v1921_v20  ;;  %1869 = vmatmul.msk.bf16.gmra.mxu1 %vm635_vm2, %v1937_v21 }
  0x49   : > { %1885 = vmatmul.msk.bf16.gmra.mxu2 %vm635_vm2, %v1953_v22  ;;  %1901 = vmatmul.msk.bf16.gmra.mxu3 %vm635_vm2, %v1969_v23 }
  0x58   : > { %1854 = vmatmul.msk.bf16.gmra.mxu0 %vm635_vm2, %v1922_v24  ;;  %1870 = vmatmul.msk.bf16.gmra.mxu1 %vm635_vm2, %v1938_v25 }
  0x59   : > { %1886 = vmatmul.msk.bf16.gmra.mxu2 %vm635_vm2, %v1954_v26  ;;  %1902 = vmatmul.msk.bf16.gmra.mxu3 %vm635_vm2, %v1970_v27 }
  0x68   : > { %1855 = vmatmul.msk.bf16.gmra.mxu0 %vm635_vm2, %v1923_v28  ;;  %1871 = vmatmul.msk.bf16.gmra.mxu1 %vm635_vm2, %v1939_v29 }
  0x69   : > { %1887 = vmatmul.msk.bf16.gmra.mxu2 %vm635_vm2, %v1955_v30  ;;  %1903 = vmatmul.msk.bf16.gmra.mxu3 %vm635_vm2, %v1971_v31 }
  0x78   : > { %1856 = vmatmul.msk.bf16.gmra.mxu0 %vm635_vm2, %v1924_v32  ;;  %1872 = vmatmul.msk.bf16.gmra.mxu1 %vm635_vm2, %v1940_v33  ;;  %v1928_v33 = vld [vmem:[%s2053_s23 + $0x50] sm:$0xff] }
  0x79   : > { %1888 = vmatmul.msk.bf16.gmra.mxu2 %vm635_vm2, %v1956_v34  ;;  %1904 = vmatmul.msk.bf16.gmra.mxu3 %vm635_vm2, %v1972_v35  ;;  %v1944_v34 = vld [vmem:[%s2053_s23 + $0xd0] sm:$0xff] }
  0x88   : > { %1857 = vmatmul.msk.bf16.gmra.mxu0 %vm635_vm2, %v1925_v36  ;;  %1873 = vmatmul.msk.bf16.gmra.mxu1 %vm635_vm2, %v1941_v37 }
  0x89   : > { %1889 = vmatmul.msk.bf16.gmra.mxu2 %vm635_vm2, %v1957_v38  ;;  %1905 = vmatmul.msk.bf16.gmra.mxu3 %vm635_vm2, %v1973_v39  ;;  %v1960_v38 = vld [vmem:[%s2053_s23 + $0x150] sm:$0xff] }
  0x8a   : > { %v1976_v39 = vld [vmem:[%s2053_s23 + $0x1d0] sm:$0xff] }
  0x95   : > { %v844_v42 = vpop.f32.mrf.mxu0  ;;  %v924_v43 = vpop.f32.mrf.mxu1 }
  0x96   : > { %v1165_v46 = vsel %vm1164_vm3, %v844_v42, -inf  ;;  %v1166_v47 = vsel %vm1164_vm3, %v924_v43, -inf }
  0x97   : > { %v1167_v48 = vmax.f32 %v1165_v46, %v1166_v47 }
  0x98   : > { %1858 = vmatmul.msk.bf16.gmra.mxu0 %vm635_vm2, %v1926_v40  ;;  %1874 = vmatmul.msk.bf16.gmra.mxu1 %vm635_vm2, %v1942_v41 }
  0x99   : > { %1890 = vmatmul.msk.bf16.gmra.mxu2 %vm635_vm2, %v1958_v44  ;;  %1906 = vmatmul.msk.bf16.gmra.mxu3 %vm635_vm2, %v1974_v45 }
  0x9c   : > { %v1004_v49 = vpop.f32.mrf.mxu2  ;;  %v1084_v50 = vpop.f32.mrf.mxu3 }
  0x9d   : > { %v1168_v51 = vsel %vm1164_vm3, %v1004_v49, -inf  ;;  %v1170_v52 = vsel %vm1164_vm3, %v1084_v50, -inf  ;;  %v846_v53 = vpop.f32.mrf.mxu0  ;;  %v926_v54 = vpop.f32.mrf.mxu1 }
  0x9e   : > { %v1169_v55 = vmax.f32 %v1167_v48, %v1168_v51  ;;  %v1172_v58 = vsel %vm1164_vm3, %v846_v53, -inf  ;;  %v1173_v59 = vsel %vm1164_vm3, %v926_v54, -inf }
  0x9f   : > { %v1174_v62 = vmax.f32 %v1172_v58, %v1173_v59 }
  0xa0   : > { %v1171_v57 = vmax.f32 %v1169_v55, %v1170_v52 }
  0xa2   : > { %v1393_v60 = vadd.f32 %v2134_v56, %v1171_v57 }
  0xa4   : > { %v1425_v61 = vmax.f32 %v1393_v60, 0.0  ;;  %v1006_v63 = vpop.f32.mrf.mxu2  ;;  %v1086_v0 = vpop.f32.mrf.mxu3 }
  0xa5   : > { %v1175_v3 = vsel %vm1164_vm3, %v1006_v63, -inf  ;;  %v849_v4 = vpop.f32.mrf.mxu0  ;;  %v929_v5 = vpop.f32.mrf.mxu1  ;;  %v1177_v10 = vsel %vm1164_vm3, %v1086_v0, -inf }
  0xa6   : > { %v1457_v8 = vpack.c.bf16 %v1425_v61, %v1425_v61  ;;  %v1176_v9 = vmax.f32 %v1174_v62, %v1175_v3  ;;  %v1179_v11 = vsel %vm1164_vm3, %v849_v4, -inf  ;;  %v1180_v12 = vsel %vm1164_vm3, %v929_v5, -inf  ;;  %v1945_v3 = vld [vmem:[%s2053_s23 + $0xd8] sm:$0xff] }
  0xa7   : > { %v1181_v15 = vmax.f32 %v1179_v11, %v1180_v12 }
  0xa8   : > { %1490 = vst.msk [vmem:[%s2145_s29] sm:$0xf] %vm1489_vm4, %v1457_v8  ;;  %v1178_v13 = vmax.f32 %v1176_v9, %v1177_v10  ;;  %1859 = vmatmul.msk.bf16.gmra.mxu0 %vm635_vm2, %v1927_v1  ;;  %1875 = vmatmul.msk.bf16.gmra.mxu1 %vm635_vm2, %v1943_v2  ;;  %v1929_v2 = vld [vmem:[%s2053_s23 + $0x58] sm:$0xff] }
  0xa9   : > { %1891 = vmatmul.msk.bf16.gmra.mxu2 %vm635_vm2, %v1959_v6  ;;  %1907 = vmatmul.msk.bf16.gmra.mxu3 %vm635_vm2, %v1975_v7  ;;  %v1961_v7 = vld [vmem:[%s2053_s23 + $0x158] sm:$0xff] }
  0xaa   : > { %v1394_v14 = vadd.f32 %v2134_v56, %v1178_v13  ;;  %v1977_v8 = vld [vmem:[%s2053_s23 + $0x1d8] sm:$0xff] }
  0xac   : > { %v1426_v16 = vmax.f32 %v1394_v14, 0.0  ;;  %v1009_v17 = vpop.f32.mrf.mxu2  ;;  %v1089_v18 = vpop.f32.mrf.mxu3 }
  0xad   : > { %v1182_v19 = vsel %vm1164_vm3, %v1009_v17, -inf  ;;  %v1184_v20 = vsel %vm1164_vm3, %v1089_v18, -inf  ;;  %v851_v21 = vpop.f32.mrf.mxu0  ;;  %v931_v22 = vpop.f32.mrf.mxu1 }
  0xae   : > { %v1458_v23 = vpack.c.bf16 %v1426_v16, %v1426_v16  ;;  %v1183_v24 = vmax.f32 %v1181_v15, %v1182_v19  ;;  %v1186_v26 = vsel %vm1164_vm3, %v851_v21, -inf  ;;  %v1187_v27 = vsel %vm1164_vm3, %v931_v22, -inf }
  0xaf   : > { %v1188_v30 = vmax.f32 %v1186_v26, %v1187_v27 }
  0xb0   : > { %1491 = vst.msk [vmem:[%s2145_s29 + $0x4] sm:$0xf] %vm1489_vm4, %v1458_v23  ;;  %v1185_v25 = vmax.f32 %v1183_v24, %v1184_v20 }
  0xb2   : > { %v1395_v28 = vadd.f32 %v2134_v56, %v1185_v25 }
  0xb4   : > { %v1427_v29 = vmax.f32 %v1395_v28, 0.0  ;;  %v1011_v31 = vpop.f32.mrf.mxu2  ;;  %v1091_v32 = vpop.f32.mrf.mxu3 }
  0xb5   : > { %v1189_v35 = vsel %vm1164_vm3, %v1011_v31, -inf  ;;  %v854_v36 = vpop.f32.mrf.mxu0  ;;  %v934_v37 = vpop.f32.mrf.mxu1  ;;  %v1191_v42 = vsel %vm1164_vm3, %v1091_v32, -inf }
  0xb6   : > { %v1459_v40 = vpack.c.bf16 %v1427_v29, %v1427_v29  ;;  %v1190_v41 = vmax.f32 %v1188_v30, %v1189_v35  ;;  %v1193_v43 = vsel %vm1164_vm3, %v854_v36, -inf  ;;  %v1194_v44 = vsel %vm1164_vm3, %v934_v37, -inf  ;;  %v1946_v35 = vld [vmem:[%s2053_s23 + $0xe0] sm:$0xff] }
  0xb7   : > { %v1195_v47 = vmax.f32 %v1193_v43, %v1194_v44 }
  0xb8   : > { %1492 = vst.msk [vmem:[%s2145_s29 + $0x8] sm:$0xf] %vm1489_vm4, %v1459_v40  ;;  %v1192_v45 = vmax.f32 %v1190_v41, %v1191_v42  ;;  %1860 = vmatmul.msk.bf16.gmra.mxu0 %vm635_vm2, %v1928_v33  ;;  %1876 = vmatmul.msk.bf16.gmra.mxu1 %vm635_vm2, %v1944_v34  ;;  %v1930_v34 = vld [vmem:[%s2053_s23 + $0x60] sm:$0xff] }
  0xb9   : > { %1892 = vmatmul.msk.bf16.gmra.mxu2 %vm635_vm2, %v1960_v38  ;;  %1908 = vmatmul.msk.bf16.gmra.mxu3 %vm635_vm2, %v1976_v39  ;;  %v1962_v39 = vld [vmem:[%s2053_s23 + $0x160] sm:$0xff] }
  0xba   : > { %v1396_v46 = vadd.f32 %v2134_v56, %v1192_v45  ;;  %v1978_v40 = vld [vmem:[%s2053_s23 + $0x1e0] sm:$0xff] }
  0xbc   : > { %v1428_v48 = vmax.f32 %v1396_v46, 0.0  ;;  %v1014_v49 = vpop.f32.mrf.mxu2  ;;  %v1094_v50 = vpop.f32.mrf.mxu3 }
  0xbd   : > { %v1196_v51 = vsel %vm1164_vm3, %v1014_v49, -inf  ;;  %v1198_v52 = vsel %vm1164_vm3, %v1094_v50, -inf  ;;  %v856_v53 = vpop.f32.mrf.mxu0  ;;  %v936_v54 = vpop.f32.mrf.mxu1 }
  0xbe   : > { %v1460_v55 = vpack.c.bf16 %v1428_v48, %v1428_v48  ;;  %v1197_v57 = vmax.f32 %v1195_v47, %v1196_v51  ;;  %v1200_v59 = vsel %vm1164_vm3, %v856_v53, -inf  ;;  %v1201_v60 = vsel %vm1164_vm3, %v936_v54, -inf }
  0xbf   : > { %v1202_v63 = vmax.f32 %v1200_v59, %v1201_v60 }
  0xc0   : > { %1493 = vst.msk [vmem:[%s2145_s29 + $0xc] sm:$0xf] %vm1489_vm4, %v1460_v55  ;;  %v1199_v58 = vmax.f32 %v1197_v57, %v1198_v52 }
  0xc2   : > { %v1397_v61 = vadd.f32 %v2134_v56, %v1199_v58 }
  0xc4   : > { %v1429_v62 = vmax.f32 %v1397_v61, 0.0  ;;  %v1016_v0 = vpop.f32.mrf.mxu2  ;;  %v1096_v1 = vpop.f32.mrf.mxu3 }
  0xc5   : > { %v1203_v4 = vsel %vm1164_vm3, %v1016_v0, -inf  ;;  %v859_v5 = vpop.f32.mrf.mxu0  ;;  %v939_v6 = vpop.f32.mrf.mxu1  ;;  %v1205_v11 = vsel %vm1164_vm3, %v1096_v1, -inf }
  0xc6   : > { %v1461_v9 = vpack.c.bf16 %v1429_v62, %v1429_v62  ;;  %v1204_v10 = vmax.f32 %v1202_v63, %v1203_v4  ;;  %v1207_v12 = vsel %vm1164_vm3, %v859_v5, -inf  ;;  %v1208_v13 = vsel %vm1164_vm3, %v939_v6, -inf  ;;  %v1947_v4 = vld [vmem:[%s2053_s23 + $0xe8] sm:$0xff] }
  0xc7   : > { %v1209_v16 = vmax.f32 %v1207_v12, %v1208_v13 }
  0xc8   : > { %1494 = vst.msk [vmem:[%s2145_s29 + $0x10] sm:$0xf] %vm1489_vm4, %v1461_v9  ;;  %v1206_v14 = vmax.f32 %v1204_v10, %v1205_v11  ;;  %1861 = vmatmul.msk.bf16.gmra.mxu0 %vm635_vm2, %v1929_v2  ;;  %1877 = vmatmul.msk.bf16.gmra.mxu1 %vm635_vm2, %v1945_v3  ;;  %v1931_v3 = vld [vmem:[%s2053_s23 + $0x68] sm:$0xff] }
  0xc9   : > { %1893 = vmatmul.msk.bf16.gmra.mxu2 %vm635_vm2, %v1961_v7  ;;  %1909 = vmatmul.msk.bf16.gmra.mxu3 %vm635_vm2, %v1977_v8  ;;  %v1963_v8 = vld [vmem:[%s2053_s23 + $0x168] sm:$0xff] }
  0xca   : > { %v1398_v15 = vadd.f32 %v2134_v56, %v1206_v14  ;;  %v1979_v9 = vld [vmem:[%s2053_s23 + $0x1e8] sm:$0xff] }
  0xcc   : > { %v1430_v17 = vmax.f32 %v1398_v15, 0.0  ;;  %v1019_v18 = vpop.f32.mrf.mxu2  ;;  %v1099_v19 = vpop.f32.mrf.mxu3 }
  0xcd   : > { %v1210_v20 = vsel %vm1164_vm3, %v1019_v18, -inf  ;;  %v1212_v21 = vsel %vm1164_vm3, %v1099_v19, -inf  ;;  %v861_v22 = vpop.f32.mrf.mxu0  ;;  %v941_v23 = vpop.f32.mrf.mxu1 }
  0xce   : > { %v1462_v24 = vpack.c.bf16 %v1430_v17, %v1430_v17  ;;  %v1211_v25 = vmax.f32 %v1209_v16, %v1210_v20  ;;  %v1214_v27 = vsel %vm1164_vm3, %v861_v22, -inf  ;;  %v1215_v28 = vsel %vm1164_vm3, %v941_v23, -inf }
  0xcf   : > { %v1216_v31 = vmax.f32 %v1214_v27, %v1215_v28 }
  0xd0   : > { %1495 = vst.msk [vmem:[%s2145_s29 + $0x14] sm:$0xf] %vm1489_vm4, %v1462_v24  ;;  %v1213_v26 = vmax.f32 %v1211_v25, %v1212_v21 }
  0xd2   : > { %v1399_v29 = vadd.f32 %v2134_v56, %v1213_v26 }
  0xd4   : > { %v1431_v30 = vmax.f32 %v1399_v29, 0.0  ;;  %v1021_v32 = vpop.f32.mrf.mxu2  ;;  %v1101_v33 = vpop.f32.mrf.mxu3 }
  0xd5   : > { %v1217_v36 = vsel %vm1164_vm3, %v1021_v32, -inf  ;;  %v864_v37 = vpop.f32.mrf.mxu0  ;;  %v944_v38 = vpop.f32.mrf.mxu1  ;;  %v1219_v43 = vsel %vm1164_vm3, %v1101_v33, -inf }
  0xd6   : > { %v1463_v41 = vpack.c.bf16 %v1431_v30, %v1431_v30  ;;  %v1218_v42 = vmax.f32 %v1216_v31, %v1217_v36  ;;  %v1221_v44 = vsel %vm1164_vm3, %v864_v37, -inf  ;;  %v1222_v45 = vsel %vm1164_vm3, %v944_v38, -inf  ;;  %v1948_v36 = vld [vmem:[%s2053_s23 + $0xf0] sm:$0xff] }
  0xd7   : > { %v1223_v48 = vmax.f32 %v1221_v44, %v1222_v45 }
  0xd8   : > { %1496 = vst.msk [vmem:[%s2145_s29 + $0x18] sm:$0xf] %vm1489_vm4, %v1463_v41  ;;  %v1220_v46 = vmax.f32 %v1218_v42, %v1219_v43  ;;  %1862 = vmatmul.msk.bf16.gmra.mxu0 %vm635_vm2, %v1930_v34  ;;  %1878 = vmatmul.msk.bf16.gmra.mxu1 %vm635_vm2, %v1946_v35  ;;  %v1932_v35 = vld [vmem:[%s2053_s23 + $0x70] sm:$0xff] }
  0xd9   : > { %1894 = vmatmul.msk.bf16.gmra.mxu2 %vm635_vm2, %v1962_v39  ;;  %1910 = vmatmul.msk.bf16.gmra.mxu3 %vm635_vm2, %v1978_v40  ;;  %v1964_v40 = vld [vmem:[%s2053_s23 + $0x170] sm:$0xff] }
  0xda   : > { %v1400_v47 = vadd.f32 %v2134_v56, %v1220_v46  ;;  %v1980_v41 = vld [vmem:[%s2053_s23 + $0x1f0] sm:$0xff] }
  0xdc   : > { %v1432_v49 = vmax.f32 %v1400_v47, 0.0  ;;  %v1024_v50 = vpop.f32.mrf.mxu2  ;;  %v1104_v51 = vpop.f32.mrf.mxu3 }
  0xdd   : > { %v1224_v52 = vsel %vm1164_vm3, %v1024_v50, -inf  ;;  %v1226_v53 = vsel %vm1164_vm3, %v1104_v51, -inf  ;;  %v866_v54 = vpop.f32.mrf.mxu0  ;;  %v946_v55 = vpop.f32.mrf.mxu1 }
  0xde   : > { %v1464_v57 = vpack.c.bf16 %v1432_v49, %v1432_v49  ;;  %v1225_v58 = vmax.f32 %v1223_v48, %v1224_v52  ;;  %v1228_v60 = vsel %vm1164_vm3, %v866_v54, -inf  ;;  %v1229_v61 = vsel %vm1164_vm3, %v946_v55, -inf }
  0xdf   : > { %v1230_v0 = vmax.f32 %v1228_v60, %v1229_v61 }
  0xe0   : > { %1497 = vst.msk [vmem:[%s2145_s29 + $0x1c] sm:$0xf] %vm1489_vm4, %v1464_v57  ;;  %v1227_v59 = vmax.f32 %v1225_v58, %v1226_v53 }
  0xe2   : > { %v1401_v62 = vadd.f32 %v2134_v56, %v1227_v59 }
  0xe4   : > { %v1433_v63 = vmax.f32 %v1401_v62, 0.0  ;;  %v1026_v1 = vpop.f32.mrf.mxu2  ;;  %v1106_v2 = vpop.f32.mrf.mxu3 }
  0xe5   : > { %v1231_v5 = vsel %vm1164_vm3, %v1026_v1, -inf  ;;  %v869_v6 = vpop.f32.mrf.mxu0  ;;  %v949_v7 = vpop.f32.mrf.mxu1  ;;  %v1233_v12 = vsel %vm1164_vm3, %v1106_v2, -inf }
  0xe6   : > { %v1465_v10 = vpack.c.bf16 %v1433_v63, %v1433_v63  ;;  %v1232_v11 = vmax.f32 %v1230_v0, %v1231_v5  ;;  %v1235_v13 = vsel %vm1164_vm3, %v869_v6, -inf  ;;  %v1236_v14 = vsel %vm1164_vm3, %v949_v7, -inf  ;;  %v1949_v5 = vld [vmem:[%s2053_s23 + $0xf8] sm:$0xff] }
  0xe7   : > { %v1237_v17 = vmax.f32 %v1235_v13, %v1236_v14 }
  0xe8   : > { %1498 = vst.msk [vmem:[%s2145_s29 + $0x20] sm:$0xf] %vm1489_vm4, %v1465_v10  ;;  %v1234_v15 = vmax.f32 %v1232_v11, %v1233_v12  ;;  %1863 = vmatmul.msk.bf16.gmra.mxu0 %vm635_vm2, %v1931_v3  ;;  %1879 = vmatmul.msk.bf16.gmra.mxu1 %vm635_vm2, %v1947_v4  ;;  %v1933_v4 = vld [vmem:[%s2053_s23 + $0x78] sm:$0xff] }
  0xe9   : > { %1895 = vmatmul.msk.bf16.gmra.mxu2 %vm635_vm2, %v1963_v8  ;;  %1911 = vmatmul.msk.bf16.gmra.mxu3 %vm635_vm2, %v1979_v9  ;;  %v1965_v9 = vld [vmem:[%s2053_s23 + $0x178] sm:$0xff] }
  0xea   : > { %v1402_v16 = vadd.f32 %v2134_v56, %v1234_v15  ;;  %v1981_v10 = vld [vmem:[%s2053_s23 + $0x1f8] sm:$0xff] }
  0xec   : > { %v1434_v18 = vmax.f32 %v1402_v16, 0.0  ;;  %v1029_v19 = vpop.f32.mrf.mxu2  ;;  %v1109_v20 = vpop.f32.mrf.mxu3 }
  0xed   : > { %v1238_v21 = vsel %vm1164_vm3, %v1029_v19, -inf  ;;  %v1240_v22 = vsel %vm1164_vm3, %v1109_v20, -inf  ;;  %v871_v23 = vpop.f32.mrf.mxu0  ;;  %v951_v24 = vpop.f32.mrf.mxu1 }
  0xee   : > { %v1466_v25 = vpack.c.bf16 %v1434_v18, %v1434_v18  ;;  %v1239_v26 = vmax.f32 %v1237_v17, %v1238_v21  ;;  %v1242_v28 = vsel %vm1164_vm3, %v871_v23, -inf  ;;  %v1243_v29 = vsel %vm1164_vm3, %v951_v24, -inf }
  0xef   : > { %v1244_v32 = vmax.f32 %v1242_v28, %v1243_v29 }
  0xf0   : > { %1499 = vst.msk [vmem:[%s2145_s29 + $0x24] sm:$0xf] %vm1489_vm4, %v1466_v25  ;;  %v1241_v27 = vmax.f32 %v1239_v26, %v1240_v22 }
  0xf2   : > { %v1403_v30 = vadd.f32 %v2134_v56, %v1241_v27 }
  0xf4   : > { %v1435_v31 = vmax.f32 %v1403_v30, 0.0  ;;  %v1031_v33 = vpop.f32.mrf.mxu2  ;;  %v1111_v34 = vpop.f32.mrf.mxu3 }
  0xf5   : > { %v1245_v37 = vsel %vm1164_vm3, %v1031_v33, -inf  ;;  %v874_v38 = vpop.f32.mrf.mxu0  ;;  %v954_v39 = vpop.f32.mrf.mxu1  ;;  %v1247_v44 = vsel %vm1164_vm3, %v1111_v34, -inf }
  0xf6   : > { %v1467_v42 = vpack.c.bf16 %v1435_v31, %v1435_v31  ;;  %v1246_v43 = vmax.f32 %v1244_v32, %v1245_v37  ;;  %v1249_v45 = vsel %vm1164_vm3, %v874_v38, -inf  ;;  %v1250_v46 = vsel %vm1164_vm3, %v954_v39, -inf }
  0xf7   : > { %v1251_v49 = vmax.f32 %v1249_v45, %v1250_v46 }
  0xf8   : > { %1500 = vst.msk [vmem:[%s2145_s29 + $0x28] sm:$0xf] %vm1489_vm4, %v1467_v42  ;;  %v1248_v47 = vmax.f32 %v1246_v43, %v1247_v44  ;;  %1864 = vmatmul.msk.bf16.gmra.mxu0 %vm635_vm2, %v1932_v35  ;;  %1880 = vmatmul.msk.bf16.gmra.mxu1 %vm635_vm2, %v1948_v36 }
  0xf9   : > { %1896 = vmatmul.msk.bf16.gmra.mxu2 %vm635_vm2, %v1964_v40  ;;  %1912 = vmatmul.msk.bf16.gmra.mxu3 %vm635_vm2, %v1980_v41 }
  0xfa   : > { %v1404_v48 = vadd.f32 %v2134_v56, %v1248_v47 }
  0xfc   : > { %v1436_v50 = vmax.f32 %v1404_v48, 0.0  ;;  %v1034_v51 = vpop.f32.mrf.mxu2  ;;  %v1114_v52 = vpop.f32.mrf.mxu3 }
  0xfd   : > { %v1252_v53 = vsel %vm1164_vm3, %v1034_v51, -inf  ;;  %v1254_v54 = vsel %vm1164_vm3, %v1114_v52, -inf  ;;  %v876_v55 = vpop.f32.mrf.mxu0  ;;  %v956_v57 = vpop.f32.mrf.mxu1 }
  0xfe   : > { %v1468_v58 = vpack.c.bf16 %v1436_v50, %v1436_v50  ;;  %v1253_v59 = vmax.f32 %v1251_v49, %v1252_v53  ;;  %v1256_v61 = vsel %vm1164_vm3, %v876_v55, -inf  ;;  %v1257_v62 = vsel %vm1164_vm3, %v956_v57, -inf }
  0xff   : > { %v1258_v1 = vmax.f32 %v1256_v61, %v1257_v62 }
 0x100   : > { %1501 = vst.msk [vmem:[%s2145_s29 + $0x2c] sm:$0xf] %vm1489_vm4, %v1468_v58  ;;  %v1255_v60 = vmax.f32 %v1253_v59, %v1254_v54 }
 0x102   : > { %v1405_v63 = vadd.f32 %v2134_v56, %v1255_v60 }
 0x104   : > { %v1437_v0 = vmax.f32 %v1405_v63, 0.0  ;;  %v1036_v2 = vpop.f32.mrf.mxu2  ;;  %v1116_v3 = vpop.f32.mrf.mxu3 }
 0x105   : > { %v1259_v6 = vsel %vm1164_vm3, %v1036_v2, -inf  ;;  %v879_v7 = vpop.f32.mrf.mxu0  ;;  %v959_v8 = vpop.f32.mrf.mxu1  ;;  %v1261_v13 = vsel %vm1164_vm3, %v1116_v3, -inf }
 0x106   : > { %v1469_v11 = vpack.c.bf16 %v1437_v0, %v1437_v0  ;;  %v1260_v12 = vmax.f32 %v1258_v1, %v1259_v6  ;;  %v1263_v14 = vsel %vm1164_vm3, %v879_v7, -inf  ;;  %v1264_v15 = vsel %vm1164_vm3, %v959_v8, -inf }
 0x107   : > { %v1265_v18 = vmax.f32 %v1263_v14, %v1264_v15 }
 0x108   : > { %1502 = vst.msk [vmem:[%s2145_s29 + $0x30] sm:$0xf] %vm1489_vm4, %v1469_v11  ;;  %v1262_v16 = vmax.f32 %v1260_v12, %v1261_v13  ;;  %1865 = vmatmul.msk.bf16.gmra.mxu0 %vm635_vm2, %v1933_v4  ;;  %1881 = vmatmul.msk.bf16.gmra.mxu1 %vm635_vm2, %v1949_v5 }
 0x109   : > { %1897 = vmatmul.msk.bf16.gmra.mxu2 %vm635_vm2, %v1965_v9  ;;  %1913 = vmatmul.msk.bf16.gmra.mxu3 %vm635_vm2, %v1981_v10 }
 0x10a   : > { %v1406_v17 = vadd.f32 %v2134_v56, %v1262_v16 }
 0x10c   : > { %v1438_v19 = vmax.f32 %v1406_v17, 0.0  ;;  %v1039_v20 = vpop.f32.mrf.mxu2  ;;  %v1119_v21 = vpop.f32.mrf.mxu3 }
 0x10d   : > { %v1266_v22 = vsel %vm1164_vm3, %v1039_v20, -inf  ;;  %v1268_v23 = vsel %vm1164_vm3, %v1119_v21, -inf  ;;  %v881_v24 = vpop.f32.mrf.mxu0  ;;  %v961_v25 = vpop.f32.mrf.mxu1 }
 0x10e   : > { %v1470_v26 = vpack.c.bf16 %v1438_v19, %v1438_v19  ;;  %v1267_v27 = vmax.f32 %v1265_v18, %v1266_v22  ;;  %v1270_v29 = vsel %vm1164_vm3, %v881_v24, -inf  ;;  %v1271_v30 = vsel %vm1164_vm3, %v961_v25, -inf }
 0x10f   : > { %v1272_v33 = vmax.f32 %v1270_v29, %v1271_v30 }
 0x110   : > { %1503 = vst.msk [vmem:[%s2145_s29 + $0x34] sm:$0xf] %vm1489_vm4, %v1470_v26  ;;  %v1269_v28 = vmax.f32 %v1267_v27, %v1268_v23 }
 0x112   : > { %v1407_v31 = vadd.f32 %v2134_v56, %v1269_v28 }
 0x114   : > { %v1439_v32 = vmax.f32 %v1407_v31, 0.0  ;;  %v1041_v34 = vpop.f32.mrf.mxu2  ;;  %v1121_v35 = vpop.f32.mrf.mxu3 }
 0x115   : > { %v1273_v36 = vsel %vm1164_vm3, %v1041_v34, -inf  ;;  %v884_v37 = vpop.f32.mrf.mxu0  ;;  %v964_v38 = vpop.f32.mrf.mxu1  ;;  %v1275_v41 = vsel %vm1164_vm3, %v1121_v35, -inf }
 0x116   : > { %v1471_v39 = vpack.c.bf16 %v1439_v32, %v1439_v32  ;;  %v1274_v40 = vmax.f32 %v1272_v33, %v1273_v36  ;;  %v1277_v42 = vsel %vm1164_vm3, %v884_v37, -inf  ;;  %v1278_v43 = vsel %vm1164_vm3, %v964_v38, -inf }
 0x117   : > { %v1279_v46 = vmax.f32 %v1277_v42, %v1278_v43 }
 0x118   : > { %1504 = vst.msk [vmem:[%s2145_s29 + $0x38] sm:$0xf] %vm1489_vm4, %v1471_v39  ;;  %v1276_v44 = vmax.f32 %v1274_v40, %v1275_v41 }
 0x11a   : > { %v1408_v45 = vadd.f32 %v2134_v56, %v1276_v44 }
 0x11c   : > { %v1440_v47 = vmax.f32 %v1408_v45, 0.0  ;;  %v1044_v48 = vpop.f32.mrf.mxu2  ;;  %v1124_v49 = vpop.f32.mrf.mxu3 }
 0x11d   : > { %v1280_v50 = vsel %vm1164_vm3, %v1044_v48, -inf  ;;  %v1282_v51 = vsel %vm1164_vm3, %v1124_v49, -inf  ;;  %v886_v52 = vpop.f32.mrf.mxu0  ;;  %v966_v53 = vpop.f32.mrf.mxu1 }
 0x11e   : > { %v1472_v54 = vpack.c.bf16 %v1440_v47, %v1440_v47  ;;  %v1281_v55 = vmax.f32 %v1279_v46, %v1280_v50  ;;  %v1284_v58 = vsel %vm1164_vm3, %v886_v52, -inf  ;;  %v1285_v59 = vsel %vm1164_vm3, %v966_v53, -inf }
 0x11f   : > { %v1286_v62 = vmax.f32 %v1284_v58, %v1285_v59 }
 0x120   : > { %1505 = vst.msk [vmem:[%s2145_s29 + $0x3c] sm:$0xf] %vm1489_vm4, %v1472_v54  ;;  %v1283_v57 = vmax.f32 %v1281_v55, %v1282_v51 }
 0x122   : > { %v1409_v60 = vadd.f32 %v2134_v56, %v1283_v57 }
 0x124   : > { %v1441_v61 = vmax.f32 %v1409_v60, 0.0  ;;  %v1046_v63 = vpop.f32.mrf.mxu2  ;;  %v1126_v0 = vpop.f32.mrf.mxu3 }
 0x125   : > { %v1287_v1 = vsel %vm1164_vm3, %v1046_v63, -inf  ;;  %v889_v2 = vpop.f32.mrf.mxu0  ;;  %v969_v3 = vpop.f32.mrf.mxu1  ;;  %v1289_v6 = vsel %vm1164_vm3, %v1126_v0, -inf }
 0x126   : > { %v1473_v4 = vpack.c.bf16 %v1441_v61, %v1441_v61  ;;  %v1288_v5 = vmax.f32 %v1286_v62, %v1287_v1  ;;  %v1291_v7 = vsel %vm1164_vm3, %v889_v2, -inf  ;;  %v1292_v8 = vsel %vm1164_vm3, %v969_v3, -inf }
 0x127   : > { %v1293_v11 = vmax.f32 %v1291_v7, %v1292_v8 }
 0x128   : > { %1506 = vst.msk [vmem:[%s2145_s29 + $0x40] sm:$0xf] %vm1489_vm4, %v1473_v4  ;;  %v1290_v9 = vmax.f32 %v1288_v5, %v1289_v6 }
 0x12a   : > { %v1410_v10 = vadd.f32 %v2134_v56, %v1290_v9 }
 0x12c   : > { %v1442_v12 = vmax.f32 %v1410_v10, 0.0  ;;  %v1049_v13 = vpop.f32.mrf.mxu2  ;;  %v1129_v14 = vpop.f32.mrf.mxu3 }
 0x12d   : > { %v1294_v15 = vsel %vm1164_vm3, %v1049_v13, -inf  ;;  %v1296_v16 = vsel %vm1164_vm3, %v1129_v14, -inf  ;;  %v891_v17 = vpop.f32.mrf.mxu0  ;;  %v971_v18 = vpop.f32.mrf.mxu1 }
 0x12e   : > { %v1474_v19 = vpack.c.bf16 %v1442_v12, %v1442_v12  ;;  %v1295_v20 = vmax.f32 %v1293_v11, %v1294_v15  ;;  %v1298_v22 = vsel %vm1164_vm3, %v891_v17, -inf  ;;  %v1299_v23 = vsel %vm1164_vm3, %v971_v18, -inf }
 0x12f   : > { %v1300_v26 = vmax.f32 %v1298_v22, %v1299_v23 }
 0x130   : > { %1507 = vst.msk [vmem:[%s2145_s29 + $0x44] sm:$0xf] %vm1489_vm4, %v1474_v19  ;;  %v1297_v21 = vmax.f32 %v1295_v20, %v1296_v16 }
 0x132   : > { %v1411_v24 = vadd.f32 %v2134_v56, %v1297_v21 }
 0x134   : > { %v1443_v25 = vmax.f32 %v1411_v24, 0.0  ;;  %v1051_v27 = vpop.f32.mrf.mxu2  ;;  %v1131_v28 = vpop.f32.mrf.mxu3 }
 0x135   : > { %v1301_v29 = vsel %vm1164_vm3, %v1051_v27, -inf  ;;  %v894_v30 = vpop.f32.mrf.mxu0  ;;  %v974_v31 = vpop.f32.mrf.mxu1  ;;  %v1303_v34 = vsel %vm1164_vm3, %v1131_v28, -inf }
 0x136   : > { %v1475_v32 = vpack.c.bf16 %v1443_v25, %v1443_v25  ;;  %v1302_v33 = vmax.f32 %v1300_v26, %v1301_v29  ;;  %v1305_v35 = vsel %vm1164_vm3, %v894_v30, -inf  ;;  %v1306_v36 = vsel %vm1164_vm3, %v974_v31, -inf }
 0x137   : > { %v1307_v39 = vmax.f32 %v1305_v35, %v1306_v36 }
 0x138   : > { %1508 = vst.msk [vmem:[%s2145_s29 + $0x48] sm:$0xf] %vm1489_vm4, %v1475_v32  ;;  %v1304_v37 = vmax.f32 %v1302_v33, %v1303_v34 }
 0x13a   : > { %v1412_v38 = vadd.f32 %v2134_v56, %v1304_v37 }
 0x13c   : > { %v1444_v40 = vmax.f32 %v1412_v38, 0.0  ;;  %v1054_v41 = vpop.f32.mrf.mxu2  ;;  %v1134_v42 = vpop.f32.mrf.mxu3 }
 0x13d   : > { %v1308_v43 = vsel %vm1164_vm3, %v1054_v41, -inf  ;;  %v1310_v44 = vsel %vm1164_vm3, %v1134_v42, -inf  ;;  %v896_v45 = vpop.f32.mrf.mxu0  ;;  %v976_v46 = vpop.f32.mrf.mxu1 }
 0x13e   : > { %v1476_v47 = vpack.c.bf16 %v1444_v40, %v1444_v40  ;;  %v1309_v48 = vmax.f32 %v1307_v39, %v1308_v43  ;;  %v1312_v50 = vsel %vm1164_vm3, %v896_v45, -inf  ;;  %v1313_v51 = vsel %vm1164_vm3, %v976_v46, -inf }
 0x13f   : > { %v1314_v54 = vmax.f32 %v1312_v50, %v1313_v51 }
 0x140   : > { %1509 = vst.msk [vmem:[%s2145_s29 + $0x4c] sm:$0xf] %vm1489_vm4, %v1476_v47  ;;  %v1311_v49 = vmax.f32 %v1309_v48, %v1310_v44 }
 0x142   : > { %v1413_v52 = vadd.f32 %v2134_v56, %v1311_v49 }
 0x144   : > { %v1445_v53 = vmax.f32 %v1413_v52, 0.0  ;;  %v1056_v55 = vpop.f32.mrf.mxu2  ;;  %v1136_v57 = vpop.f32.mrf.mxu3 }
 0x145   : > { %v1315_v58 = vsel %vm1164_vm3, %v1056_v55, -inf  ;;  %v899_v59 = vpop.f32.mrf.mxu0  ;;  %v979_v60 = vpop.f32.mrf.mxu1  ;;  %v1317_v63 = vsel %vm1164_vm3, %v1136_v57, -inf }
 0x146   : > { %v1477_v61 = vpack.c.bf16 %v1445_v53, %v1445_v53  ;;  %v1316_v62 = vmax.f32 %v1314_v54, %v1315_v58  ;;  %v1319_v0 = vsel %vm1164_vm3, %v899_v59, -inf  ;;  %v1320_v1 = vsel %vm1164_vm3, %v979_v60, -inf }
 0x147   : > { %v1321_v4 = vmax.f32 %v1319_v0, %v1320_v1 }
 0x148   : > { %1510 = vst.msk [vmem:[%s2145_s29 + $0x50] sm:$0xf] %vm1489_vm4, %v1477_v61  ;;  %v1318_v2 = vmax.f32 %v1316_v62, %v1317_v63 }
 0x14a   : > { %v1414_v3 = vadd.f32 %v2134_v56, %v1318_v2 }
 0x14c   : > { %v1446_v5 = vmax.f32 %v1414_v3, 0.0  ;;  %v1059_v6 = vpop.f32.mrf.mxu2  ;;  %v1139_v7 = vpop.f32.mrf.mxu3 }
 0x14d   : > { %v1322_v8 = vsel %vm1164_vm3, %v1059_v6, -inf  ;;  %v1324_v9 = vsel %vm1164_vm3, %v1139_v7, -inf  ;;  %v901_v10 = vpop.f32.mrf.mxu0  ;;  %v981_v11 = vpop.f32.mrf.mxu1 }
 0x14e   : > { %v1478_v12 = vpack.c.bf16 %v1446_v5, %v1446_v5  ;;  %v1323_v13 = vmax.f32 %v1321_v4, %v1322_v8  ;;  %v1326_v15 = vsel %vm1164_vm3, %v901_v10, -inf  ;;  %v1327_v16 = vsel %vm1164_vm3, %v981_v11, -inf }
 0x14f   : > { %v1328_v19 = vmax.f32 %v1326_v15, %v1327_v16 }
 0x150   : > { %1511 = vst.msk [vmem:[%s2145_s29 + $0x54] sm:$0xf] %vm1489_vm4, %v1478_v12  ;;  %v1325_v14 = vmax.f32 %v1323_v13, %v1324_v9 }
 0x152   : > { %v1415_v17 = vadd.f32 %v2134_v56, %v1325_v14 }
 0x154   : > { %v1447_v18 = vmax.f32 %v1415_v17, 0.0  ;;  %v1061_v20 = vpop.f32.mrf.mxu2  ;;  %v1141_v21 = vpop.f32.mrf.mxu3 }
 0x155   : > { %v1329_v22 = vsel %vm1164_vm3, %v1061_v20, -inf  ;;  %v904_v23 = vpop.f32.mrf.mxu0  ;;  %v984_v24 = vpop.f32.mrf.mxu1  ;;  %v1331_v27 = vsel %vm1164_vm3, %v1141_v21, -inf }
 0x156   : > { %v1479_v25 = vpack.c.bf16 %v1447_v18, %v1447_v18  ;;  %v1330_v26 = vmax.f32 %v1328_v19, %v1329_v22  ;;  %v1333_v28 = vsel %vm1164_vm3, %v904_v23, -inf  ;;  %v1334_v29 = vsel %vm1164_vm3, %v984_v24, -inf }
 0x157   : > { %v1335_v32 = vmax.f32 %v1333_v28, %v1334_v29 }
 0x158   : > { %1512 = vst.msk [vmem:[%s2145_s29 + $0x58] sm:$0xf] %vm1489_vm4, %v1479_v25  ;;  %v1332_v30 = vmax.f32 %v1330_v26, %v1331_v27 }
 0x15a   : > { %v1416_v31 = vadd.f32 %v2134_v56, %v1332_v30 }
 0x15c   : > { %v1448_v33 = vmax.f32 %v1416_v31, 0.0  ;;  %v1064_v34 = vpop.f32.mrf.mxu2  ;;  %v1144_v35 = vpop.f32.mrf.mxu3 }
 0x15d   : > { %v1336_v36 = vsel %vm1164_vm3, %v1064_v34, -inf  ;;  %v1338_v37 = vsel %vm1164_vm3, %v1144_v35, -inf  ;;  %v906_v38 = vpop.f32.mrf.mxu0  ;;  %v986_v39 = vpop.f32.mrf.mxu1 }
 0x15e   : > { %v1480_v40 = vpack.c.bf16 %v1448_v33, %v1448_v33  ;;  %v1337_v41 = vmax.f32 %v1335_v32, %v1336_v36  ;;  %v1340_v43 = vsel %vm1164_vm3, %v906_v38, -inf  ;;  %v1341_v44 = vsel %vm1164_vm3, %v986_v39, -inf }
 0x15f   : > { %v1342_v47 = vmax.f32 %v1340_v43, %v1341_v44 }
 0x160   : > { %1513 = vst.msk [vmem:[%s2145_s29 + $0x5c] sm:$0xf] %vm1489_vm4, %v1480_v40  ;;  %v1339_v42 = vmax.f32 %v1337_v41, %v1338_v37 }
 0x162   : > { %v1417_v45 = vadd.f32 %v2134_v56, %v1339_v42 }
 0x164   : > { %v1449_v46 = vmax.f32 %v1417_v45, 0.0  ;;  %v1066_v48 = vpop.f32.mrf.mxu2  ;;  %v1146_v49 = vpop.f32.mrf.mxu3 }
 0x165   : > { %v1343_v50 = vsel %vm1164_vm3, %v1066_v48, -inf  ;;  %v909_v51 = vpop.f32.mrf.mxu0  ;;  %v989_v52 = vpop.f32.mrf.mxu1  ;;  %v1345_v55 = vsel %vm1164_vm3, %v1146_v49, -inf }
 0x166   : > { %v1481_v53 = vpack.c.bf16 %v1449_v46, %v1449_v46  ;;  %v1344_v54 = vmax.f32 %v1342_v47, %v1343_v50  ;;  %v1347_v57 = vsel %vm1164_vm3, %v909_v51, -inf  ;;  %v1348_v58 = vsel %vm1164_vm3, %v989_v52, -inf }
 0x167   : > { %v1349_v61 = vmax.f32 %v1347_v57, %v1348_v58 }
 0x168   : > { %1514 = vst.msk [vmem:[%s2145_s29 + $0x60] sm:$0xf] %vm1489_vm4, %v1481_v53  ;;  %v1346_v59 = vmax.f32 %v1344_v54, %v1345_v55 }
 0x16a   : > { %v1418_v60 = vadd.f32 %v2134_v56, %v1346_v59 }
 0x16c   : > { %v1450_v62 = vmax.f32 %v1418_v60, 0.0  ;;  %v1069_v63 = vpop.f32.mrf.mxu2  ;;  %v1149_v0 = vpop.f32.mrf.mxu3 }
 0x16d   : > { %v1350_v1 = vsel %vm1164_vm3, %v1069_v63, -inf  ;;  %v1352_v2 = vsel %vm1164_vm3, %v1149_v0, -inf  ;;  %v911_v3 = vpop.f32.mrf.mxu0  ;;  %v991_v4 = vpop.f32.mrf.mxu1 }
 0x16e   : > { %v1482_v5 = vpack.c.bf16 %v1450_v62, %v1450_v62  ;;  %v1351_v6 = vmax.f32 %v1349_v61, %v1350_v1  ;;  %v1354_v8 = vsel %vm1164_vm3, %v911_v3, -inf  ;;  %v1355_v9 = vsel %vm1164_vm3, %v991_v4, -inf }
 0x16f   : > { %v1356_v12 = vmax.f32 %v1354_v8, %v1355_v9 }
 0x170   : > { %1515 = vst.msk [vmem:[%s2145_s29 + $0x64] sm:$0xf] %vm1489_vm4, %v1482_v5  ;;  %v1353_v7 = vmax.f32 %v1351_v6, %v1352_v2  ;;  %v2000_v2 = vld [vmem:[%s2424_s2] ss:$0 sm:$0xff] }
 0x172   : > { %v1419_v10 = vadd.f32 %v2134_v56, %v1353_v7 }
 0x174   : > { %v1451_v11 = vmax.f32 %v1419_v10, 0.0  ;;  %v1071_v13 = vpop.f32.mrf.mxu2  ;;  %v1151_v14 = vpop.f32.mrf.mxu3 }
 0x175   : > { %v1357_v15 = vsel %vm1164_vm3, %v1071_v13, -inf  ;;  %v914_v16 = vpop.f32.mrf.mxu0  ;;  %v994_v17 = vpop.f32.mrf.mxu1  ;;  %v1359_v20 = vsel %vm1164_vm3, %v1151_v14, -inf }
 0x176   : > { %v1483_v18 = vpack.c.bf16 %v1451_v11, %v1451_v11  ;;  %v1358_v19 = vmax.f32 %v1356_v12, %v1357_v15  ;;  %v1361_v21 = vsel %vm1164_vm3, %v914_v16, -inf  ;;  %v1362_v22 = vsel %vm1164_vm3, %v994_v17, -inf }
 0x177   : > { %v1363_v25 = vmax.f32 %v1361_v21, %v1362_v22 }
 0x178   : > { %1516 = vst.msk [vmem:[%s2145_s29 + $0x68] sm:$0xf] %vm1489_vm4, %v1483_v18  ;;  %v1360_v23 = vmax.f32 %v1358_v19, %v1359_v20 }
 0x17a   : > { %v1420_v24 = vadd.f32 %v2134_v56, %v1360_v23 }
 0x17c   : > { %v1452_v26 = vmax.f32 %v1420_v24, 0.0  ;;  %v1074_v27 = vpop.f32.mrf.mxu2  ;;  %v1154_v28 = vpop.f32.mrf.mxu3 }
 0x17d   : > { %v1364_v29 = vsel %vm1164_vm3, %v1074_v27, -inf  ;;  %v1366_v30 = vsel %vm1164_vm3, %v1154_v28, -inf  ;;  %v916_v31 = vpop.f32.mrf.mxu0  ;;  %v996_v32 = vpop.f32.mrf.mxu1 }
 0x17e   : > { %v1484_v33 = vpack.c.bf16 %v1452_v26, %v1452_v26  ;;  %v1365_v34 = vmax.f32 %v1363_v25, %v1364_v29  ;;  %v1368_v36 = vsel %vm1164_vm3, %v916_v31, -inf  ;;  %v1369_v37 = vsel %vm1164_vm3, %v996_v32, -inf }
 0x17f   : > { %v1370_v40 = vmax.f32 %v1368_v36, %v1369_v37 }
 0x180   : > { %1517 = vst.msk [vmem:[%s2145_s29 + $0x6c] sm:$0xf] %vm1489_vm4, %v1484_v33  ;;  %v1367_v35 = vmax.f32 %v1365_v34, %v1366_v30 }
 0x182   : > { %v1421_v38 = vadd.f32 %v2134_v56, %v1367_v35 }
 0x184   : > { %v1453_v39 = vmax.f32 %v1421_v38, 0.0  ;;  %v1076_v41 = vpop.f32.mrf.mxu2  ;;  %v1156_v42 = vpop.f32.mrf.mxu3 }
 0x185   : > { %v1371_v43 = vsel %vm1164_vm3, %v1076_v41, -inf  ;;  %v919_v44 = vpop.f32.mrf.mxu0  ;;  %v999_v45 = vpop.f32.mrf.mxu1  ;;  %v1373_v48 = vsel %vm1164_vm3, %v1156_v42, -inf }
 0x186   : > { %v1485_v46 = vpack.c.bf16 %v1453_v39, %v1453_v39  ;;  %v1372_v47 = vmax.f32 %v1370_v40, %v1371_v43  ;;  %v1375_v49 = vsel %vm1164_vm3, %v919_v44, -inf  ;;  %v1376_v50 = vsel %vm1164_vm3, %v999_v45, -inf }
 0x187   : > { %v1377_v53 = vmax.f32 %v1375_v49, %v1376_v50 }
 0x188   : > { %1518 = vst.msk [vmem:[%s2145_s29 + $0x70] sm:$0xf] %vm1489_vm4, %v1485_v46  ;;  %v1374_v51 = vmax.f32 %v1372_v47, %v1373_v48 }
 0x18a   : > { %v1422_v52 = vadd.f32 %v2134_v56, %v1374_v51 }
 0x18c   : > { %v1454_v54 = vmax.f32 %v1422_v52, 0.0  ;;  %v1079_v55 = vpop.f32.mrf.mxu2  ;;  %v1159_v57 = vpop.f32.mrf.mxu3 }
 0x18d   : > { %v1378_v58 = vsel %vm1164_vm3, %v1079_v55, -inf  ;;  %v1380_v59 = vsel %vm1164_vm3, %v1159_v57, -inf  ;;  %v921_v62 = vpop.f32.mrf.mxu0  ;;  %v1001_v63 = vpop.f32.mrf.mxu1 }
 0x18e   : > { %v1486_v60 = vpack.c.bf16 %v1454_v54, %v1454_v54  ;;  %v1379_v61 = vmax.f32 %v1377_v53, %v1378_v58  ;;  %v1382_v1 = vsel %vm1164_vm3, %v921_v62, -inf  ;;  %v1383_v56 = vsel %vm1164_vm3, %v1001_v63, -inf }
 0x18f   : > { %v1384_v5 = vmax.f32 %v1382_v1, %v1383_v56 }
 0x190   : > { %1519 = vst.msk [vmem:[%s2145_s29 + $0x74] sm:$0xf] %vm1489_vm4, %v1486_v60  ;;  %v1381_v0 = vmax.f32 %v1379_v61, %v1380_v59 }
 0x192   : > { %v1423_v3 = vadd.f32 %v2000_v2, %v1381_v0 }
 0x194   : > { %v1455_v4 = vmax.f32 %v1423_v3, 0.0  ;;  %v1081_v6 = vpop.f32.mrf.mxu2  ;;  %v1161_v7 = vpop.f32.mrf.mxu3 }
 0x195   : > { %v1385_v8 = vsel %vm1164_vm3, %v1081_v6, -inf  ;;  %v1387_v11 = vsel %vm1164_vm3, %v1161_v7, -inf }
 0x196   : > { %v1487_v9 = vpack.c.bf16 %v1455_v4, %v1455_v4  ;;  %v1386_v10 = vmax.f32 %v1384_v5, %v1385_v8 }
 0x198   : > { %1520 = vst.msk [vmem:[%s2145_s29 + $0x78] sm:$0xf] %vm1489_vm4, %v1487_v9  ;;  %v1388_v12 = vmax.f32 %v1386_v10, %v1387_v11 }
 0x19a   : > { %v1424_v13 = vadd.f32 %v2000_v2, %v1388_v12 }
 0x19c   : > { %v1456_v14 = vmax.f32 %v1424_v13, 0.0 }
 0x19e   : > { %v1488_v15 = vpack.c.bf16 %v1456_v14, %v1456_v14 }
 0x1a0   : > { %1521 = vst.msk [vmem:[%s2145_s29 + $0x7c] sm:$0xf] %vm1489_vm4, %v1488_v15 }
 0x1a1 PF: > { %s13_s12 = sadd.s32 1, %s2007_s12  }
 0x1a2   : > { %p10_p4 = scmp.ge.s32.totalorder %s13_s12, 4  }
 0x1a4   :  { %12 = sbr.rel (!%p10_p4) target bundleno = 1 (0x1), region = 62 }

// kernel: prnet_forward.3
= control target key start
LH: loop header
LB: loop body
LE: loop exit
PB: predicated region body
PF: predicated region fallthrough
CT: control target
= control target key end

     0   :  { %12 = vsyncpa [#allocation4], 0  ;;  %s4889_s0 = inlined_call_operand.vmem [shape: bf16[2,64,576], index: 0, kind: input, shape index: {}]   ;;  %s4890_s1 = inlined_call_operand.vmem [shape: bf16[576,128], index: 1, kind: input, shape index: {}]   ;;  %s4891_s2 = inlined_call_operand.vmem [shape: f32[1,128], index: 2, kind: input, shape index: {}]   ;;  %s4892_s3 = inlined_call_operand.vmem [shape: bf16[1152,256], index: 3, kind: input, shape index: {}]   ;;  %s4893_s4 = inlined_call_operand.vmem [shape: f32[1,256], index: 4, kind: input, shape index: {}]   ;;  %s4894_s5 = inlined_call_operand.vmem [shape: bf16[256,4], index: 5, kind: input, shape index: {}]   ;;  %s4895_s6 = inlined_call_operand.vmem [shape: f32[1,4], index: 6, kind: input, shape index: {}]   ;;  %s4896_s7 = inlined_call_operand.hbm [shape: f32[2,1,4], index: 7, kind: output, shape index: {}]  }
   0x1   :  { %14 = vsyncpa [#allocation4 + $0x1], 0  ;;  %s3659_s24 = smov 0   ;;  %s3661_s25 = smov 0  }
   0x2   :  { %s3663_s26 = smov 0   ;;  %s3665_s27 = smov 0  }
   0x3 LB: > { %s3680_s28 = sadd.s32 4294967295, %s3616_s27   ;;  %s2401_s29 = sadd.s32 4294967294, %s3616_s27   ;;  %s3616_s27 = sphi %s3665_s27, %s4902_s27   ;;  %s3612_s26 = sphi %s3663_s26, %s4901_s26   ;;  %s3608_s25 = sphi %s3661_s25, %s4900_s25   ;;  %s3604_s24 = sphi %s3659_s24, %s4899_s24  }
   0x4   : > { %s3684_s30 = sadd.s32 1, %s3616_s27   ;;  %s179_s8 = sadd.s32 1, %s3612_s26 }
   0x5   : > { %s176_s9 = ssub.s32 %s3616_s27, %s3684_s30  ;;  %p189_p0 = scmp.ne.s32.totalorder %s3612_s26, %s3608_s25 }
   0x6   : > { %p177_p1 = scmp.eq.s32.totalorder %s176_s9, 0  ;;  %p190_p2 = scmp.eq.s32.totalorder %s3680_s28, 1 }
   0x7   : > { %p195_p3 = scmp.ne.s32.totalorder %s3608_s25, %s3604_s24  ;;  %p196_p4 = scmp.eq.s32.totalorder %s2401_s29, 1 }
   0x8   : > { %s3695_s10 = scalar_select %p177_p1, %s3612_s26, %s179_s8  }
   0x9   : > { %p3697_p5 = por %p190_p2, %p189_p0  ;;  %p3701_p6 = por %p196_p4, %p195_p3 }
   0xa   : > { %p2404_p7 = scmp.ge.s32.totalorder %s3616_s27, 1  ;;  %p240_p8 = scmp.lt.s32.totalorder %s3616_s27, 3 }
   0xc   : > { %p241_p9 = pnand %p2404_p7, %p240_p8 }
   0xd   : > { %p271_p10 = scmp.lt.s32.totalorder (!%p241_p9), %s3680_s28, 1  ;;  %s2342_s22 = scalar_lea.hbm (!%p241_p9), %s4896_s7, %s3680_s28 }
   0xe   : > { %244 = sbr.rel (%p241_p9) target bundleno = 1059 (0x423), region = 48  ;;  %s2346_s8 = sshll.u32 (!%p241_p9), %s2342_s22, 4  ;;  %s2347_s8 = int_to_ptr.hbm [resolvable:$true] %s2346_s8 }
   0xf   : > { %s3568_s9 = sshra.s32 (!%p241_p9), %s2347_s8, 4  ;;  %s3569_s9 = int_to_ptr.hbm [resolvable:$true] %s3568_s9 }
  0x10   : > { %s3570_s14 = scalar_lea.hbm (!%p241_p9), %s3569_s9, 1  ;;  %p3575_p0 = scmp.lt.s32.totalorder (!%p241_p9), %s3569_s9, %s4896_s7 }
  0x11   : > { %p3571_p11 = scmp.ne.s32.totalorder (!%p241_p9), %s3569_s9, %s3570_s14 }
  0x13   : > { %v3319_v0 = vld [vmem:[%s4890_s1 + $0x38] sm:$0xff]  ;;  %v3318_v4 = vld [vmem:[%s4890_s1 + $0x30] sm:$0xff]  ;;  %v3317_v8 = vld [vmem:[%s4890_s1 + $0x28] sm:$0xff]  ;;  %s272_s21 = scalar_select %p271_p10, %s3680_s28, 1  ;;  %vm689_vm0 = vcmask 523264   ;;  %vm2138_vm1 = vcmask 1043456  }
  0x14   : > { %v3327_v1 = vld [vmem:[%s4890_s1 + $0x78] sm:$0xff]  ;;  %702 = vmatpush.bf16.msra.mxu0 %v3319_v0  ;;  %v3326_v5 = vld [vmem:[%s4890_s1 + $0x70] sm:$0xff]  ;;  %v3325_v9 = vld [vmem:[%s4890_s1 + $0x68] sm:$0xff]  ;;  %vm2320_vm2 = vcmask 24576   ;;  %p3572_p12 = pnand %p3571_p11, %p3697_p5  ;;  %s3574_s28 = scalar_lea.hbm %s4896_s7, 2 }
  0x15   : > { %v3335_v2 = vld [vmem:[%s4890_s1 + $0xb8] sm:$0xff]  ;;  %731 = vmatpush.bf16.msra.mxu1 %v3327_v1  ;;  %v3334_v6 = vld [vmem:[%s4890_s1 + $0xb0] sm:$0xff]  ;;  %v3333_v10 = vld [vmem:[%s4890_s1 + $0xa8] sm:$0xff]  ;;  %s3508_s16 = smul.u32 160, %s272_s21  ;;  %p3576_p1 = scmp.lt.s32.totalorder %s3574_s28, %s3570_s14 }
  0x16   : > { %v3343_v3 = vld [vmem:[%s4890_s1 + $0xf8] sm:$0xff]  ;;  %760 = vmatpush.bf16.msra.mxu2 %v3335_v2  ;;  %v3342_v7 = vld [vmem:[%s4890_s1 + $0xf0] sm:$0xff]  ;;  %v3341_v11 = vld [vmem:[%s4890_s1 + $0xe8] sm:$0xff]  ;;  %p3573_p13 = pneg %p3572_p12 }
  0x17   : > { %789 = vmatpush.bf16.msra.mxu3 %v3343_v3  ;;  %v3316_v12 = vld [vmem:[%s4890_s1 + $0x20] sm:$0xff]  ;;  %v3315_v16 = vld [vmem:[%s4890_s1 + $0x18] sm:$0xff]  ;;  %v3314_v20 = vld [vmem:[%s4890_s1 + $0x10] sm:$0xff]  ;;  %s3790_s13 = scalar_lea.vmem %s4889_s0, %s3508_s16  ;;  %s269_s16 = sand.u32 1, %s3608_s25  }
  0x18   : > { %703 = vmatpush.bf16.msra.mxu0 %v3318_v4  ;;  %v3324_v13 = vld [vmem:[%s4890_s1 + $0x60] sm:$0xff]  ;;  %v3323_v17 = vld [vmem:[%s4890_s1 + $0x58] sm:$0xff]  ;;  %v3322_v21 = vld [vmem:[%s4890_s1 + $0x50] sm:$0xff]  ;;  %s270_s23 = scalar_lea.vmem [#allocation3], %s269_s16  ;;  %s2334_s21 = scalar_lea.sflag [#allocation4], %s269_s16 }
  0x19   : > { %732 = vmatpush.bf16.msra.mxu1 %v3326_v5  ;;  %v3332_v14 = vld [vmem:[%s4890_s1 + $0xa0] sm:$0xff]  ;;  %v3331_v18 = vld [vmem:[%s4890_s1 + $0x98] sm:$0xff]  ;;  %v3330_v22 = vld [vmem:[%s4890_s1 + $0x90] sm:$0xff]  ;;  %s2344_s29 = sshll.u32 %s270_s23, 4  ;;  %p3577_p2 = por %p3576_p1, %p3575_p0  ;;  %s2345_s29 = int_to_ptr.vmem [resolvable:$true] %s2344_s29 }
  0x1a   : > { %761 = vmatpush.bf16.msra.mxu2 %v3334_v6  ;;  %v3340_v15 = vld [vmem:[%s4890_s1 + $0xe0] sm:$0xff]  ;;  %v3339_v19 = vld [vmem:[%s4890_s1 + $0xd8] sm:$0xff]  ;;  %v3338_v23 = vld [vmem:[%s4890_s1 + $0xd0] sm:$0xff] }
  0x1b   : > { %790 = vmatpush.bf16.msra.mxu3 %v3342_v7  ;;  %v3313_v24 = vld [vmem:[%s4890_s1 + $0x8] sm:$0xff]  ;;  %v3312_v28 = vld [vmem:[%s4890_s1] sm:$0xff]  ;;  %v3294_v33 = vld [vmem:[%s3790_s13 + $0x10] sm:$0xf0]  ;;  %p3578_p3 = pnand %p3577_p2, %p3573_p13 }
  0x1c   : > { %704 = vmatpush.bf16.msra.mxu0 %v3317_v8  ;;  %v3321_v25 = vld [vmem:[%s4890_s1 + $0x48] sm:$0xff]  ;;  %v3320_v29 = vld [vmem:[%s4890_s1 + $0x40] sm:$0xff]  ;;  %v2410_v35 = vld [vmem:[%s3790_s13 + $0x14] sm:$0xf0] }
  0x1d   : > { %733 = vmatpush.bf16.msra.mxu1 %v3325_v9  ;;  %v3329_v26 = vld [vmem:[%s4890_s1 + $0x88] sm:$0xff]  ;;  %v3328_v30 = vld [vmem:[%s4890_s1 + $0x80] sm:$0xff]  ;;  %v3295_v37 = vld [vmem:[%s3790_s13 + $0x18] sm:$0xf0] }
  0x1e   : > { %762 = vmatpush.bf16.msra.mxu2 %v3333_v10  ;;  %v3337_v27 = vld [vmem:[%s4890_s1 + $0xc8] sm:$0xff]  ;;  %v3336_v31 = vld [vmem:[%s4890_s1 + $0xc0] sm:$0xff]  ;;  %v3347_v40 = vld [vmem:[%s4890_s1 + $0x118] sm:$0xff] }
  0x1f   : > { %791 = vmatpush.bf16.msra.mxu3 %v3341_v11  ;;  %v2408_v32 = vld [vmem:[%s3790_s13] sm:$0xf]  ;;  %v3292_v34 = vld [vmem:[%s3790_s13 + $0x4] sm:$0xf]  ;;  %v2416_v36 = vld [vmem:[%s3790_s13 + $0x8] sm:$0xf] }
  0x20   : > { %705 = vmatpush.bf16.msra.mxu0 %v3316_v12  ;;  %v3293_v38 = vld [vmem:[%s3790_s13 + $0xc] sm:$0xf]  ;;  %v2418_v39 = vld [vmem:[%s3790_s13 + $0x1c] sm:$0xf0]  ;;  %v2409_v41 = vor.u32 %v3294_v33, %v2408_v32  ;;  %v2413_v42 = vor.u32 %v3292_v34, %v2410_v35  ;;  %v2417_v43 = vor.u32 %v3295_v37, %v2416_v36  ;;  %v3346_v45 = vld [vmem:[%s4890_s1 + $0x110] sm:$0xff] }
  0x21   : > { %734 = vmatpush.bf16.msra.mxu1 %v3324_v13  ;;  %v2421_v44 = vor.u32 %v3293_v38, %v2418_v39  ;;  %v2428_v46 = vld [vmem:[%s3790_s13 + $0x28] sm:$0xf]  ;;  %v3299_v47 = vld [vmem:[%s3790_s13 + $0x38] sm:$0xf0]  ;;  %v3297_v48 = vld [vmem:[%s3790_s13 + $0x2c] sm:$0xf] }
  0x22   : > { %763 = vmatpush.bf16.msra.mxu2 %v3332_v14  ;;  %v2430_v49 = vld [vmem:[%s3790_s13 + $0x3c] sm:$0xf0]  ;;  %v2436_v50 = vld [vmem:[%s3790_s13 + $0x30] sm:$0xf]  ;;  %v3300_v51 = vld [vmem:[%s3790_s13 + $0x40] sm:$0xf0]  ;;  %v2429_v54 = vor.u32 %v3299_v47, %v2428_v46 }
  0x23   : > { %792 = vmatpush.bf16.msra.mxu3 %v3340_v15  ;;  %v3298_v52 = vld [vmem:[%s3790_s13 + $0x34] sm:$0xf]  ;;  %v2438_v53 = vld [vmem:[%s3790_s13 + $0x44] sm:$0xf0]  ;;  %v2433_v55 = vor.u32 %v3297_v48, %v2430_v49  ;;  %v2437_v56 = vor.u32 %v3300_v51, %v2436_v50  ;;  %v3344_v59 = vld [vmem:[%s4890_s1 + $0x100] sm:$0xff] }
  0x24   : > { %706 = vmatpush.bf16.msra.mxu0 %v3315_v16  ;;  %v2441_v57 = vor.u32 %v3298_v52, %v2438_v53  ;;  %v3345_v58 = vld [vmem:[%s4890_s1 + $0x108] sm:$0xff]  ;;  %v2448_v60 = vld [vmem:[%s3790_s13 + $0x50] sm:$0xf]  ;;  %v3304_v61 = vld [vmem:[%s3790_s13 + $0x60] sm:$0xf0] }
  0x25   : > { %735 = vmatpush.bf16.msra.mxu1 %v3323_v17  ;;  %v3302_v62 = vld [vmem:[%s3790_s13 + $0x54] sm:$0xf]  ;;  %v2450_v63 = vld [vmem:[%s3790_s13 + $0x64] sm:$0xf0]  ;;  %v2456_v0 = vld [vmem:[%s3790_s13 + $0x58] sm:$0xf]  ;;  %v2449_v4 = vor.u32 %v3304_v61, %v2448_v60 }
  0x26   : > { %764 = vmatpush.bf16.msra.mxu2 %v3331_v18  ;;  %v3305_v1 = vld [vmem:[%s3790_s13 + $0x68] sm:$0xf0]  ;;  %v3303_v2 = vld [vmem:[%s3790_s13 + $0x5c] sm:$0xf]  ;;  %v2458_v3 = vld [vmem:[%s3790_s13 + $0x6c] sm:$0xf0]  ;;  %v2453_v5 = vor.u32 %v3302_v62, %v2450_v63 }
  0x27   : > { %793 = vmatpush.bf16.msra.mxu3 %v3339_v19  ;;  %v2457_v6 = vor.u32 %v3305_v1, %v2456_v0  ;;  %v2461_v7 = vor.u32 %v3303_v2, %v2458_v3  ;;  %v2468_v8 = vld [vmem:[%s3790_s13 + $0x78] sm:$0xf]  ;;  %v3309_v9 = vld [vmem:[%s3790_s13 + $0x88] sm:$0xf0]  ;;  %v3307_v10 = vld [vmem:[%s3790_s13 + $0x7c] sm:$0xf] }
  0x28   : > { %707 = vmatpush.bf16.msra.mxu0 %v3314_v20  ;;  %v2470_v11 = vld [vmem:[%s3790_s13 + $0x8c] sm:$0xf0]  ;;  %v2476_v12 = vld [vmem:[%s3790_s13 + $0x80] sm:$0xf]  ;;  %v3310_v13 = vld [vmem:[%s3790_s13 + $0x90] sm:$0xf0]  ;;  %v2469_v16 = vor.u32 %v3309_v9, %v2468_v8 }
  0x29   : > { %736 = vmatpush.bf16.msra.mxu1 %v3322_v21  ;;  %v3308_v14 = vld [vmem:[%s3790_s13 + $0x84] sm:$0xf]  ;;  %v2478_v15 = vld [vmem:[%s3790_s13 + $0x94] sm:$0xf0]  ;;  %v2473_v17 = vor.u32 %v3307_v10, %v2470_v11  ;;  %v2477_v18 = vor.u32 %v3310_v13, %v2476_v12  ;;  %v2424_v20 = vld [vmem:[%s3790_s13 + $0x10] sm:$0xf] }
  0x2a   : > { %765 = vmatpush.bf16.msra.mxu2 %v3330_v22  ;;  %v2481_v19 = vor.u32 %v3308_v14, %v2478_v15  ;;  %v3296_v21 = vld [vmem:[%s3790_s13 + $0x20] sm:$0xf0]  ;;  %v3618_v0 = vmov 0.0  }
  0x2b   : > { %794 = vmatpush.bf16.msra.mxu3 %v3338_v23  ;;  %v2425_v22 = vor.u32 %v3296_v21, %v2424_v20  ;;  %v2444_v23 = vld [vmem:[%s3790_s13 + $0x38] sm:$0xf]  ;;  %861 = vst [vmem:[#allocation2] sm:$0xff] %v3618_v0 }
  0x2c   : > { %708 = vmatpush.bf16.msra.mxu0 %v3313_v24  ;;  %v3301_v24 = vld [vmem:[%s3790_s13 + $0x48] sm:$0xf0]  ;;  %862 = vst [vmem:[#allocation2 + $0x8] sm:$0xff] %v3618_v0 }
  0x2d   : > { %737 = vmatpush.bf16.msra.mxu1 %v3321_v25  ;;  %v2445_v25 = vor.u32 %v3301_v24, %v2444_v23  ;;  %863 = vst [vmem:[#allocation2 + $0x10] sm:$0xff] %v3618_v0 }
  0x2e   : > { %766 = vmatpush.bf16.msra.mxu2 %v3329_v26  ;;  %v2464_v26 = vld [vmem:[%s3790_s13 + $0x60] sm:$0xf]  ;;  %864 = vst [vmem:[#allocation2 + $0x18] sm:$0xff] %v3618_v0 }
  0x2f   : > { %795 = vmatpush.bf16.msra.mxu3 %v3337_v27  ;;  %v3306_v27 = vld [vmem:[%s3790_s13 + $0x70] sm:$0xf0]  ;;  %865 = vst [vmem:[#allocation2 + $0x20] sm:$0xf] %v3618_v0 }
  0x30   : > { %709 = vmatpush.bf16.msra.mxu0 %v3312_v28  ;;  %v2465_v28 = vor.u32 %v3306_v27, %v2464_v26 }
  0x31   : > { %738 = vmatpush.bf16.msra.mxu1 %v3320_v29  ;;  %v2484_v29 = vld [vmem:[%s3790_s13 + $0x88] sm:$0xf] }
  0x32   : > { %767 = vmatpush.bf16.msra.mxu2 %v3328_v30  ;;  %v3311_v30 = vld [vmem:[%s3790_s13 + $0x98] sm:$0xf0] }
  0x33   : > { %796 = vmatpush.bf16.msra.mxu3 %v3336_v31  ;;  %710 = vmatmul.bf16.vlgmr.msra.gmra.mxu0 %v2409_v41  ;;  %v2485_v31 = vor.u32 %v3311_v30, %v2484_v29 }
  0x34   : > { %822 = vmatpush.bf16.msrb.mxu0 %v3347_v40  ;;  %739 = vmatmul.bf16.vlgmr.msra.gmra.mxu1 %v2413_v42 }
  0x35   : > { %768 = vmatmul.bf16.vlgmr.msra.gmra.mxu2 %v2417_v43 }
  0x36   : > { %797 = vmatmul.bf16.vlgmr.msra.gmra.mxu3 %v2421_v44 }
  0x38   : > { %823 = vmatpush.bf16.msrb.mxu0 %v3346_v45 }
  0x3c   : > { %824 = vmatpush.bf16.msrb.mxu0 %v3345_v58 }
  0x40   : > { %825 = vmatpush.bf16.msrb.mxu0 %v3344_v59 }
  0x43   : > { %715 = vmatmul.bf16.gmra.mxu0 %v2429_v54 }
  0x44   : > { %744 = vmatmul.bf16.gmra.mxu1 %v2433_v55 }
  0x45   : > { %773 = vmatmul.bf16.gmra.mxu2 %v2437_v56 }
  0x46   : > { %802 = vmatmul.bf16.gmra.mxu3 %v2441_v57 }
  0x53   : > { %720 = vmatmul.bf16.gmra.mxu0 %v2449_v4 }
  0x54   : > { %749 = vmatmul.bf16.gmra.mxu1 %v2453_v5 }
  0x55   : > { %778 = vmatmul.bf16.gmra.mxu2 %v2457_v6 }
  0x56   : > { %807 = vmatmul.bf16.gmra.mxu3 %v2461_v7 }
  0x63   : > { %725 = vmatmul.bf16.gmra.mxu0 %v2469_v16 }
  0x64   : > { %754 = vmatmul.bf16.gmra.mxu1 %v2473_v17 }
  0x65   : > { %783 = vmatmul.bf16.gmra.mxu2 %v2477_v18 }
  0x66   : > { %812 = vmatmul.bf16.gmra.mxu3 %v2481_v19 }
  0x73   : > { %2630 = vmatmul.msk.bf16.vlgmr.msrb.gmra.mxu0 %vm689_vm0, %v2425_v22 }
  0x83   : > { %2631 = vmatmul.msk.bf16.gmra.mxu0 %vm689_vm0, %v2445_v25 }
  0x93   : > { %2632 = vmatmul.msk.bf16.gmra.mxu0 %vm689_vm0, %v2465_v28 }
  0xa3   : > { %2633 = vmatmul.msk.bf16.gmra.mxu0 %vm689_vm0, %v2485_v31 }
  0xb0   : > { %v711_v32 = vpop.f32.mrf.mxu0 }
  0xb1   : > { %v740_v37 = vpop.f32.mrf.mxu1 }
  0xb2   : > { %v741_v59 = vadd.f32 %v740_v37, %v711_v32 }
  0xb8   : > { %v713_v33 = vpop.f32.mrf.mxu0  ;;  %v769_v39 = vpop.f32.mrf.mxu2 }
  0xb9   : > { %v798_v40 = vpop.f32.mrf.mxu3  ;;  %v742_v42 = vpop.f32.mrf.mxu1  ;;  %v770_v62 = vadd.f32 %v769_v39, %v741_v59  ;;  %v3549_v39 = vld [vmem:[%s4891_s2] ss:$0 sm:$0xff] }
  0xba   : > { %v743_v6 = vadd.f32 %v742_v42, %v713_v33 }
  0xbb   : > { %v799_v2 = vadd.f32 %v798_v40, %v770_v62 }
  0xc0   : > { %v716_v34 = vpop.f32.mrf.mxu0  ;;  %v771_v43 = vpop.f32.mrf.mxu2 }
  0xc1   : > { %v800_v44 = vpop.f32.mrf.mxu3  ;;  %v745_v46 = vpop.f32.mrf.mxu1  ;;  %v772_v10 = vadd.f32 %v771_v43, %v743_v6 }
  0xc2   : > { %v746_v18 = vadd.f32 %v745_v46, %v716_v34 }
  0xc3   : > { %v801_v15 = vadd.f32 %v800_v44, %v772_v10  ;;  %v2708_v10 = vld [vmem:[%s4892_s3 + $0x70] sm:$0xf] }
  0xc8   : > { %v3862_v35 = vpop.f32.mrf.mxu0  ;;  %v774_v47 = vpop.f32.mrf.mxu2 }
  0xc9   : > { %v803_v49 = vpop.f32.mrf.mxu3  ;;  %v747_v50 = vpop.f32.mrf.mxu1  ;;  %v775_v23 = vadd.f32 %v774_v47, %v746_v18 }
  0xca   : > { %v748_v31 = vadd.f32 %v747_v50, %v3862_v35 }
  0xcb   : > { %v804_v27 = vadd.f32 %v803_v49, %v775_v23  ;;  %v2764_v23 = vld [vmem:[%s4892_s3 + $0xe0] sm:$0xf] }
  0xd0   : > { %v721_v36 = vpop.f32.mrf.mxu0  ;;  %v776_v51 = vpop.f32.mrf.mxu2 }
  0xd1   : > { %v805_v53 = vpop.f32.mrf.mxu3  ;;  %v750_v54 = vpop.f32.mrf.mxu1  ;;  %v777_v37 = vadd.f32 %v776_v51, %v748_v31  ;;  %v3359_v31 = vld [vmem:[%s4892_s3 + $0x54] sm:$0xf0] }
  0xd2   : > { %v751_v60 = vadd.f32 %v750_v54, %v721_v36 }
  0xd3   : > { %v806_v42 = vadd.f32 %v805_v53, %v777_v37  ;;  %v2804_v37 = vld [vmem:[%s4892_s3 + $0x130] sm:$0xf] }
  0xd8   : > { %v723_v38 = vpop.f32.mrf.mxu0  ;;  %v779_v56 = vpop.f32.mrf.mxu2 }
  0xd9   : > { %v808_v57 = vpop.f32.mrf.mxu3  ;;  %v752_v61 = vpop.f32.mrf.mxu1  ;;  %v780_v63 = vadd.f32 %v779_v56, %v751_v60 }
  0xda   : > { %v753_v7 = vadd.f32 %v752_v61, %v723_v38 }
  0xdb   : > { %v809_v3 = vadd.f32 %v808_v57, %v780_v63 }
  0xe0   : > { %v726_v41 = vpop.f32.mrf.mxu0  ;;  %v781_v1 = vpop.f32.mrf.mxu2 }
  0xe1   : > { %v810_v4 = vpop.f32.mrf.mxu3  ;;  %v782_v11 = vadd.f32 %v781_v1, %v753_v7  ;;  %v755_v13 = vpop.f32.mrf.mxu1  ;;  %v2828_v7 = vld [vmem:[%s4892_s3 + $0x160] sm:$0xf] }
  0xe2   : > { %v756_v19 = vadd.f32 %v755_v13, %v726_v41 }
  0xe3   : > { %v811_v16 = vadd.f32 %v810_v4, %v782_v11  ;;  %v3363_v11 = vld [vmem:[%s4892_s3 + $0x74] sm:$0xf0] }
  0xe4   : > { %v2709_v13 = vor.u32 %v3363_v11, %v2708_v10  ;;  %v3369_v10 = vld [vmem:[%s4892_s3 + $0xa4] sm:$0xf0] }
  0xe6   : > { %1904 = vmatpush.bf16.msrb.mxu1 %v2709_v13  ;;  %v2780_v13 = vld [vmem:[%s4892_s3 + $0x100] sm:$0xf] }
  0xe8   : > { %v728_v45 = vpop.f32.mrf.mxu0  ;;  %v784_v14 = vpop.f32.mrf.mxu2 }
  0xe9   : > { %v813_v22 = vpop.f32.mrf.mxu3  ;;  %v785_v24 = vadd.f32 %v784_v14, %v756_v19  ;;  %v757_v26 = vpop.f32.mrf.mxu1  ;;  %v3379_v14 = vld [vmem:[%s4892_s3 + $0xf4] sm:$0xf0] }
  0xea   : > { %v758_v32 = vadd.f32 %v757_v26, %v728_v45 }
  0xeb   : > { %v814_v28 = vadd.f32 %v813_v22, %v785_v24  ;;  %v3361_v22 = vld [vmem:[%s4892_s3 + $0x64] sm:$0xf0] }
  0xec   : > { %v3377_v24 = vld [vmem:[%s4892_s3 + $0xe4] sm:$0xf0] }
  0xed   : > { %v2765_v26 = vor.u32 %v3377_v24, %v2764_v23 }
  0xf0   : > { %v827_v48 = vpop.f32.mrf.mxu0  ;;  %v786_v29 = vpop.f32.mrf.mxu2 }
  0xf1   : > { %v828_v8 = vadd.f32 %v827_v48, %v799_v2  ;;  %v787_v38 = vadd.f32 %v786_v29, %v758_v32  ;;  %v815_v40 = vpop.f32.mrf.mxu3  ;;  %v2836_v2 = vld [vmem:[%s4892_s3 + $0x170] sm:$0xf] }
  0xf2   : > { %v2756_v32 = vld [vmem:[%s4892_s3 + $0xd0] sm:$0xf] }
  0xf3   : > { %v816_v43 = vadd.f32 %v815_v40, %v787_v38  ;;  %v3387_v38 = vld [vmem:[%s4892_s3 + $0x134] sm:$0xf0]  ;;  %v3092_v40 = vld [vmem:[%s4892_s3 + $0x370] sm:$0xf] }
  0xf8   : > { %v829_v52 = vpop.f32.mrf.mxu0 }
  0xf9   : > { %v830_v20 = vadd.f32 %v829_v52, %v801_v15  ;;  %v2820_v15 = vld [vmem:[%s4892_s3 + $0x150] sm:$0xf] }
 0x100   : > { %v832_v55 = vpop.f32.mrf.mxu0 }
 0x101   : > { %v833_v33 = vadd.f32 %v832_v55, %v804_v27  ;;  %v2812_v27 = vld [vmem:[%s4892_s3 + $0x140] sm:$0xf] }
 0x108   : > { %v834_v58 = vpop.f32.mrf.mxu0 }
 0x109   : > { %v835_v47 = vadd.f32 %v834_v58, %v806_v42 }
 0x110   : > { %v837_v5 = vpop.f32.mrf.mxu0 }
 0x111   : > { %v838_v9 = vadd.f32 %v837_v5, %v809_v3  ;;  %v3395_v3 = vld [vmem:[%s4892_s3 + $0x174] sm:$0xf0] }
 0x112   : > { %v2837_v4 = vor.u32 %v3395_v3, %v2836_v2  ;;  %v3076_v2 = vld [vmem:[%s4892_s3 + $0x350] sm:$0xf]  ;;  %v3455_v3 = vld [vmem:[%s4892_s3 + $0x354] sm:$0xf0] }
 0x113   : > { %v847_v12 = vmax.f32 %v828_v8, %v838_v9  ;;  %v3393_v8 = vld [vmem:[%s4892_s3 + $0x164] sm:$0xf0] }
 0x114   : > { %1930 = vmatpush.bf16.msrb.mxu3 %v2837_v4  ;;  %v2829_v9 = vor.u32 %v3393_v8, %v2828_v7  ;;  %v2668_v7 = vld [vmem:[%s4892_s3 + $0x20] sm:$0xf]  ;;  %v3353_v8 = vld [vmem:[%s4892_s3 + $0x24] sm:$0xf0] }
 0x115   : > { %v2669_v11 = vor.u32 %v3353_v8, %v2668_v7  ;;  %v3423_v7 = vld [vmem:[%s4892_s3 + $0x254] sm:$0xf0] }
 0x118   : > { %v839_v17 = vpop.f32.mrf.mxu0  ;;  %1931 = vmatpush.bf16.msrb.mxu3 %v2829_v9  ;;  %v2732_v9 = vld [vmem:[%s4892_s3 + $0xa0] sm:$0xf] }
 0x119   : > { %v840_v21 = vadd.f32 %v839_v17, %v811_v16  ;;  %v3391_v16 = vld [vmem:[%s4892_s3 + $0x154] sm:$0xf0] }
 0x11a   : > { %v2821_v18 = vor.u32 %v3391_v16, %v2820_v15  ;;  %v3028_v16 = vld [vmem:[%s4892_s3 + $0x2f0] sm:$0xf] }
 0x11b   : > { %v850_v25 = vmax.f32 %v830_v20, %v840_v21  ;;  %v2700_v20 = vld [vmem:[%s4892_s3 + $0x60] sm:$0xf] }
 0x11c   : > { %1932 = vmatpush.bf16.msrb.mxu3 %v2821_v18  ;;  %v3068_v18 = vld [vmem:[%s4892_s3 + $0x340] sm:$0xf] }
 0x120   : > { %v842_v30 = vpop.f32.mrf.mxu0 }
 0x121   : > { %v843_v36 = vadd.f32 %v842_v30, %v814_v28  ;;  %v3389_v28 = vld [vmem:[%s4892_s3 + $0x144] sm:$0xf0]  ;;  %v2692_v30 = vld [vmem:[%s4892_s3 + $0x50] sm:$0xf] }
 0x122   : > { %v2813_v29 = vor.u32 %v3389_v28, %v2812_v27  ;;  %v3020_v28 = vld [vmem:[%s4892_s3 + $0x2e0] sm:$0xf] }
 0x123   : > { %v848_v34 = vmax.f32 %v833_v33, %v843_v36  ;;  %v2693_v33 = vor.u32 %v3359_v31, %v2692_v30  ;;  %v3375_v36 = vld [vmem:[%s4892_s3 + $0xd4] sm:$0xf0]  ;;  %v3060_v30 = vld [vmem:[%s4892_s3 + $0x330] sm:$0xf] }
 0x124   : > { %1933 = vmatpush.bf16.msrb.mxu3 %v2813_v29  ;;  %v3441_v29 = vld [vmem:[%s4892_s3 + $0x2e4] sm:$0xf0] }
 0x125   : > { %v849_v41 = vmax.f32 %v847_v12, %v848_v34  ;;  %v2772_v12 = vld [vmem:[%s4892_s3 + $0xf0] sm:$0xf]  ;;  %v2757_v34 = vor.u32 %v3375_v36, %v2756_v32  ;;  %v3021_v32 = vor.u32 %v3441_v29, %v3020_v28  ;;  %v2766_v28 = vld [vmem:[%s4892_s3 + $0xe8] sm:$0xf0] }
 0x126   : > { %v2773_v17 = vor.u32 %v3379_v14, %v2772_v12  ;;  %v2733_v12 = vor.u32 %v3369_v10, %v2732_v9  ;;  %v3381_v14 = vld [vmem:[%s4892_s3 + $0x104] sm:$0xf0]  ;;  %v2996_v10 = vld [vmem:[%s4892_s3 + $0x2b0] sm:$0xf] }
 0x127   : > { %v857_v44 = vadd.f32 %v3549_v39, %v849_v41  ;;  %v3459_v41 = vld [vmem:[%s4892_s3 + $0x374] sm:$0xf0]  ;;  %v2781_v15 = vor.u32 %v3381_v14, %v2780_v13  ;;  %v3445_v14 = vld [vmem:[%s4892_s3 + $0x304] sm:$0xf0]  ;;  %v2868_v29 = vld [vmem:[%s4892_s3 + $0x1b0] sm:$0xf] }
 0x128   : > { %v844_v46 = vpop.f32.mrf.mxu0  ;;  %1917 = vmatpush.bf16.msrb.mxu2 %v2773_v17  ;;  %v3443_v17 = vld [vmem:[%s4892_s3 + $0x2f4] sm:$0xf0] }
 0x129   : > { %v3868_v48 = vmax.f32 %v857_v44, 0.0  ;;  %v845_v35 = vadd.f32 %v844_v46, %v816_v43  ;;  %v3093_v43 = vor.u32 %v3459_v41, %v3092_v40  ;;  %v2684_v44 = vld [vmem:[%s4892_s3 + $0x40] sm:$0xf]  ;;  %v3357_v46 = vld [vmem:[%s4892_s3 + $0x44] sm:$0xf0] }
 0x12a   : > { %v3365_v40 = vld [vmem:[%s4892_s3 + $0x84] sm:$0xf0]  ;;  %v2900_v41 = vld [vmem:[%s4892_s3 + $0x1f0] sm:$0xf] }
 0x12b   : > { %872 = vst.sshfl [vmem:[#allocation1] sm:$0xff pattern:$0x75316420] %v3868_v48  ;;  %v851_v45 = vmax.f32 %v835_v47, %v845_v35  ;;  %v868_v49 = vrot.slane %v3868_v48, 5  ;;  %v2635_v50 = vrot.slane %v3868_v48, 10  ;;  %v2636_v51 = vrot.slane %v3868_v48, 11  ;;  %1982 = vmatpush.bf16.msra.mxu0 %v3093_v43 }
 0x12c   : > { %866 = vst [vmem:[#allocation2 + $0x10] sm:$0x1] %v3868_v48  ;;  %1918 = vmatpush.bf16.msrb.mxu2 %v2765_v26  ;;  %v2748_v47 = vld [vmem:[%s4892_s3 + $0xc0] sm:$0xf]  ;;  %v2685_v35 = vor.u32 %v3357_v46, %v2684_v44  ;;  %v3367_v26 = vld [vmem:[%s4892_s3 + $0x94] sm:$0xf0] }
 0x12d   : > { %v852_v52 = vmax.f32 %v850_v25, %v851_v45  ;;  %v869_v53 = vrot.slane %v868_v49, 4  ;;  %888 = vst [vmem:[#allocation2 + $0x11] sm:$0x1] %v2635_v50  ;;  %v2701_v25 = vor.u32 %v3361_v22, %v2700_v20  ;;  %v3373_v45 = vld [vmem:[%s4892_s3 + $0xc4] sm:$0xf0] }
 0x12e   : > { %892 = vst [vmem:[#allocation2 + $0x15] sm:$0x1] %v2636_v51  ;;  %v2796_v49 = vld [vmem:[%s4892_s3 + $0x120] sm:$0xf]  ;;  %v3385_v50 = vld [vmem:[%s4892_s3 + $0x124] sm:$0xf0]  ;;  %v2749_v51 = vor.u32 %v3373_v45, %v2748_v47 }
 0x12f   : > { %v858_v54 = vadd.f32 %v3549_v39, %v852_v52  ;;  %871 = vst [vmem:[#allocation2 + $0x14] sm:$0x1] %v869_v53  ;;  %1905 = vmatpush.bf16.msrb.mxu1 %v2701_v25  ;;  %v2805_v39 = vor.u32 %v3387_v38, %v2804_v37  ;;  %v2797_v52 = vor.u32 %v3385_v50, %v2796_v49  ;;  %v3453_v20 = vld [vmem:[%s4892_s3 + $0x344] sm:$0xf0]  ;;  %v3351_v22 = vld [vmem:[%s4892_s3 + $0x14] sm:$0xf0] }
 0x130   : > { %884 = vst [vmem:[#allocation2 + $0xd] sm:$0x1] %v869_v53  ;;  %1919 = vmatpush.bf16.msrb.mxu2 %v2757_v34  ;;  %v3084_v53 = vld [vmem:[%s4892_s3 + $0x360] sm:$0xf]  ;;  %v3069_v23 = vor.u32 %v3453_v20, %v3068_v18  ;;  %v2724_v25 = vld [vmem:[%s4892_s3 + $0x90] sm:$0xf] }
 0x131   : > { %v3875_v55 = vmax.f32 %v858_v54, 0.0  ;;  %1934 = vmatpush.bf16.msrb.mxu3 %v2805_v39  ;;  %v3457_v54 = vld [vmem:[%s4892_s3 + $0x364] sm:$0xf0]  ;;  %v2725_v27 = vor.u32 %v3367_v26, %v2724_v25  ;;  %v2652_v37 = vld [vmem:[%s4892_s3] sm:$0xf] }
 0x132   : > { %v874_v56 = vld [vmem:[#allocation1 + $0x1] ss:$2 sm:$0xff]  ;;  %v2964_v46 = vld [vmem:[%s4892_s3 + $0x270] sm:$0xf]  ;;  %v3427_v47 = vld [vmem:[%s4892_s3 + $0x274] sm:$0xf0] }
 0x133   : > { %877 = vst.sshfl [vmem:[#allocation1] sm:$0xff pattern:$0x75316420] %v3868_v48  ;;  %v928_v57 = vrot.slane %v3875_v55, 5  ;;  %v2645_v58 = vrot.slane %v3875_v55, 10  ;;  %v2646_v59 = vrot.slane %v3875_v55, 11  ;;  %1906 = vmatpush.bf16.msrb.mxu1 %v2693_v33  ;;  %v2965_v45 = vor.u32 %v3427_v47, %v2964_v46 }
 0x134   : > { %926 = vst [vmem:[#allocation2 + $0x12] sm:$0x1] %v3875_v55  ;;  %1920 = vmatpush.bf16.msrb.mxu2 %v2749_v51  ;;  %v3451_v33 = vld [vmem:[%s4892_s3 + $0x334] sm:$0xf0]  ;;  %v3349_v38 = vld [vmem:[%s4892_s3 + $0x4] sm:$0xf0] }
 0x135   : > { %v929_v60 = vrot.slane %v928_v57, 4  ;;  %969 = vst [vmem:[#allocation2 + $0x13] sm:$0x1] %v2645_v58  ;;  %v2676_v57 = vld [vmem:[%s4892_s3 + $0x30] sm:$0xf]  ;;  %1935 = vmatpush.bf16.msrb.mxu3 %v2797_v52  ;;  %v3061_v36 = vor.u32 %v3451_v33, %v3060_v30  ;;  %v2653_v39 = vor.u32 %v3349_v38, %v2652_v37 }
 0x136   : > { %973 = vst [vmem:[#allocation2 + $0x17] sm:$0x1] %v2646_v59  ;;  %v3355_v58 = vld [vmem:[%s4892_s3 + $0x34] sm:$0xf0]  ;;  %v2740_v59 = vld [vmem:[%s4892_s3 + $0xb0] sm:$0xf] }
 0x137   : > { %931 = vst [vmem:[#allocation2 + $0x16] sm:$0x1] %v929_v60  ;;  %1907 = vmatpush.bf16.msrb.mxu1 %v2685_v35  ;;  %v2716_v34 = vld [vmem:[%s4892_s3 + $0x80] sm:$0xf]  ;;  %v3012_v35 = vld [vmem:[%s4892_s3 + $0x2d0] sm:$0xf] }
 0x138   : > { %965 = vst [vmem:[#allocation2 + $0xf] sm:$0x1] %v929_v60  ;;  %v2677_v60 = vor.u32 %v3355_v58, %v2676_v57  ;;  %v2717_v43 = vor.u32 %v3365_v40, %v2716_v34  ;;  %v3439_v49 = vld [vmem:[%s4892_s3 + $0x2d4] sm:$0xf0]  ;;  %v3052_v50 = vld [vmem:[%s4892_s3 + $0x320] sm:$0xf] }
 0x139   : > { %876 = vst [vmem:[#allocation2 + $0x1c] sm:$0x1] %v874_v56  ;;  %v3085_v56 = vor.u32 %v3457_v54, %v3084_v53  ;;  %v3449_v51 = vld [vmem:[%s4892_s3 + $0x324] sm:$0xf0]  ;;  %v3013_v52 = vor.u32 %v3439_v49, %v3012_v35  ;;  %v2892_v54 = vld [vmem:[%s4892_s3 + $0x1e0] sm:$0xf] }
 0x13a   : > { %v879_v61 = vld [vmem:[#allocation1 + $0x1] ss:$2 sm:$0xff]  ;;  %v3053_v53 = vor.u32 %v3449_v51, %v3052_v50  ;;  %v2932_v33 = vld [vmem:[%s4892_s3 + $0x230] sm:$0xf]  ;;  %v3419_v37 = vld [vmem:[%s4892_s3 + $0x234] sm:$0xf0] }
 0x13b   : > { %893 = vst.sshfl [vmem:[#allocation1] sm:$0xff pattern:$0x75316420] %v3868_v48  ;;  %v2634_v62 = vrot.slane %v879_v61, 9  ;;  %v3371_v61 = vld [vmem:[%s4892_s3 + $0xb4] sm:$0xf0]  ;;  %1983 = vmatpush.bf16.msra.mxu0 %v3085_v56  ;;  %1908 = vmatpush.bf16.msrb.mxu1 %v2677_v60 }
 0x13c   : > { %v3409_v56 = vld [vmem:[%s4892_s3 + $0x1e4] sm:$0xf0]  ;;  %v2956_v57 = vld [vmem:[%s4892_s3 + $0x260] sm:$0xf]  ;;  %v2980_v34 = vld [vmem:[%s4892_s3 + $0x290] sm:$0xf] }
 0x13d   : > { %883 = vst [vmem:[#allocation2 + $0x20] sm:$0x1] %v2634_v62  ;;  %v2788_v62 = vld [vmem:[%s4892_s3 + $0x110] sm:$0xf]  ;;  %v2893_v58 = vor.u32 %v3409_v56, %v2892_v54  ;;  %v3004_v60 = vld [vmem:[%s4892_s3 + $0x2c0] sm:$0xf] }
 0x13e   : > { %v997_v63 = vld [vmem:[#allocation2 + $0x10] sm:$0xff]  ;;  %v3405_v20 = vld [vmem:[%s4892_s3 + $0x1c4] sm:$0xf0]  ;;  %v3374_v40 = vld [vmem:[%s4892_s3 + $0xd4] sm:$0xf] }
 0x13f   : > { %1009 = vst [vmem:[#allocation1 + $0x20] ss:$2 sm:$0xff] %v997_v63  ;;  %v3383_v63 = vld [vmem:[%s4892_s3 + $0x114] sm:$0xf0]  ;;  %1909 = vmatpush.bf16.msrb.mxu1 %v2669_v11  ;;  %v3433_v25 = vld [vmem:[%s4892_s3 + $0x2a4] sm:$0xf0] }
 0x140   : > { %v3435_v11 = vld [vmem:[%s4892_s3 + $0x2b4] sm:$0xf0]  ;;  %v2924_v47 = vld [vmem:[%s4892_s3 + $0x220] sm:$0xf]  ;;  %v3417_v35 = vld [vmem:[%s4892_s3 + $0x224] sm:$0xf0] }
 0x141   : > { %v2997_v13 = vor.u32 %v3435_v11, %v2996_v10  ;;  %v2972_v49 = vld [vmem:[%s4892_s3 + $0x280] sm:$0xf]  ;;  %v3429_v50 = vld [vmem:[%s4892_s3 + $0x284] sm:$0xf0]  ;;  %v2925_v54 = vor.u32 %v3417_v35, %v2924_v47  ;;  %v2852_v56 = vld [vmem:[%s4892_s3 + $0x190] sm:$0xf] }
 0x142   : > { %v895_v0 = vld [vmem:[#allocation1 + $0x1] ss:$2 sm:$0xff] }
 0x143   : > { %900 = vst.sshfl [vmem:[#allocation1] sm:$0xff pattern:$0x75316420] %v3868_v48  ;;  %v2637_v1 = vrot.slane %v895_v0, 9  ;;  %v2741_v0 = vor.u32 %v3371_v61, %v2740_v59  ;;  %v3425_v59 = vld [vmem:[%s4892_s3 + $0x264] sm:$0xf0] }
 0x144   : > { %v3437_v61 = vld [vmem:[%s4892_s3 + $0x2c4] sm:$0xf0] }
 0x145   : > { %899 = vst [vmem:[#allocation2 + $0x19] sm:$0x1] %v2637_v1  ;;  %v2789_v1 = vor.u32 %v3383_v63, %v2788_v62  ;;  %1921 = vmatpush.bf16.msrb.mxu2 %v2741_v0  ;;  %v2957_v63 = vor.u32 %v3425_v59, %v2956_v57  ;;  %v3005_v0 = vor.u32 %v3437_v61, %v3004_v60  ;;  %v3399_v57 = vld [vmem:[%s4892_s3 + $0x194] sm:$0xf0]  ;;  %v2916_v61 = vld [vmem:[%s4892_s3 + $0x210] sm:$0xf] }
 0x146   : > { %v2973_v60 = vor.u32 %v3429_v50, %v2972_v49  ;;  %v3212_v49 = vld [vmem:[%s4892_s3 + $0x460] sm:$0xf] }
 0x147   : > { %1936 = vmatpush.bf16.msrb.mxu3 %v2789_v1  ;;  %v3044_v1 = vld [vmem:[%s4892_s3 + $0x310] sm:$0xf] }
 0x149   : > { %1922 = vmatpush.bf16.msrb.mxu2 %v2733_v12  ;;  %v3036_v12 = vld [vmem:[%s4892_s3 + $0x300] sm:$0xf] }
 0x14a   : > { %v902_v5 = vld [vmem:[#allocation1 + $0x1] ss:$2 sm:$0xff] }
 0x14b   : > { %907 = vst.sshfl [vmem:[#allocation1] sm:$0xff pattern:$0x75316420] %v3868_v48  ;;  %v2638_v6 = vrot.slane %v902_v5, 10  ;;  %v3077_v5 = vor.u32 %v3455_v3, %v3076_v2  ;;  %1937 = vmatpush.bf16.msrb.mxu3 %v2781_v15  ;;  %v3447_v2 = vld [vmem:[%s4892_s3 + $0x314] sm:$0xf0] }
 0x14c   : > { %v3045_v3 = vor.u32 %v3447_v2, %v3044_v1  ;;  %v3378_v15 = vld [vmem:[%s4892_s3 + $0xf4] sm:$0xf]  ;;  %v2853_v2 = vor.u32 %v3399_v57, %v2852_v56 }
 0x14d   : > { %906 = vst [vmem:[#allocation2 + $0x1d] sm:$0x1] %v2638_v6  ;;  %1984 = vmatpush.bf16.msra.mxu0 %v3077_v5  ;;  %1923 = vmatpush.bf16.msrb.mxu2 %v2725_v27  ;;  %v3407_v5 = vld [vmem:[%s4892_s3 + $0x1d4] sm:$0xf0]  ;;  %v3376_v27 = vld [vmem:[%s4892_s3 + $0xe4] sm:$0xf] }
 0x151   : > { %1985 = vmatpush.bf16.msra.mxu0 %v3069_v23  ;;  %1924 = vmatpush.bf16.msrb.mxu2 %v2717_v43  ;;  %v3421_v23 = vld [vmem:[%s4892_s3 + $0x244] sm:$0xf0]  ;;  %v2860_v43 = vld [vmem:[%s4892_s3 + $0x1a0] sm:$0xf] }
 0x152   : > { %v909_v19 = vld [vmem:[#allocation1 + $0x1] ss:$2 sm:$0xff] }
 0x153   : > { %914 = vst.sshfl [vmem:[#allocation1] sm:$0xff pattern:$0x75316420] %v3868_v48  ;;  %v2639_v21 = vrot.slane %v909_v19, 11  ;;  %v3029_v19 = vor.u32 %v3443_v17, %v3028_v16  ;;  %v2774_v16 = vld [vmem:[%s4892_s3 + $0xf8] sm:$0xf0]  ;;  %v3037_v17 = vor.u32 %v3445_v14, %v3036_v12 }
 0x154   : > { %v2777_v18 = vor.u32 %v3378_v15, %v2774_v16  ;;  %v3368_v14 = vld [vmem:[%s4892_s3 + $0xa4] sm:$0xf]  ;;  %v2734_v15 = vld [vmem:[%s4892_s3 + $0xa8] sm:$0xf0] }
 0x155   : > { %913 = vst [vmem:[#allocation2 + $0x21] sm:$0x1] %v2639_v21  ;;  %v2660_v21 = vld [vmem:[%s4892_s3 + $0x10] sm:$0xf]  ;;  %1969 = vmatpush.bf16.msra.mxu3 %v3029_v19  ;;  %1986 = vmatpush.bf16.msra.mxu0 %v3061_v36  ;;  %v2876_v19 = vld [vmem:[%s4892_s3 + $0x1c0] sm:$0xf]  ;;  %v2769_v36 = vor.u32 %v3376_v27, %v2766_v28  ;;  %v2737_v16 = vor.u32 %v3368_v14, %v2734_v15 }
 0x156   : > { %v2661_v24 = vor.u32 %v3351_v22, %v2660_v21  ;;  %1956 = vmatpush.bf16.msra.mxu2 %v2965_v45  ;;  %v2940_v21 = vld [vmem:[%s4892_s3 + $0x240] sm:$0xf]  ;;  %v2877_v22 = vor.u32 %v3405_v20, %v2876_v19  ;;  %v2726_v19 = vld [vmem:[%s4892_s3 + $0x98] sm:$0xf0]  ;;  %v3352_v14 = vld [vmem:[%s4892_s3 + $0x24] sm:$0xf] }
 0x157   : > { %v2941_v26 = vor.u32 %v3421_v23, %v2940_v21  ;;  %v3364_v23 = vld [vmem:[%s4892_s3 + $0x84] sm:$0xf]  ;;  %v2710_v27 = vld [vmem:[%s4892_s3 + $0x78] sm:$0xf0] }
 0x158   : > { %1910 = vmatpush.bf16.msrb.mxu1 %v2661_v24  ;;  %v2988_v24 = vld [vmem:[%s4892_s3 + $0x2a0] sm:$0xf] }
 0x159   : > { %1970 = vmatpush.bf16.msra.mxu3 %v3021_v32  ;;  %1987 = vmatpush.bf16.msra.mxu0 %v3053_v53  ;;  %v3403_v32 = vld [vmem:[%s4892_s3 + $0x1b4] sm:$0xf0]  ;;  %v2750_v53 = vld [vmem:[%s4892_s3 + $0xc8] sm:$0xf0] }
 0x15a   : > { %v916_v42 = vld [vmem:[#allocation1 + $0x1] ss:$2 sm:$0xff]  ;;  %1957 = vmatpush.bf16.msra.mxu2 %v2957_v63  ;;  %v2869_v38 = vor.u32 %v3403_v32, %v2868_v29  ;;  %v3415_v63 = vld [vmem:[%s4892_s3 + $0x214] sm:$0xf0] }
 0x15b   : > { %919 = vst.sshfl [vmem:[#allocation1] sm:$0xff pattern:$0x75316420] %v3868_v48 }
 0x15c   : > { %918 = vst [vmem:[#allocation2 + $0x6] sm:$0x1] %v916_v42  ;;  %v3411_v42 = vld [vmem:[%s4892_s3 + $0x1f4] sm:$0xf0]  ;;  %1911 = vmatpush.bf16.msrb.mxu1 %v2653_v39 }
 0x15d   : > { %v2901_v44 = vor.u32 %v3411_v42, %v2900_v41  ;;  %1971 = vmatpush.bf16.msra.mxu3 %v3013_v52  ;;  %1988 = vmatpush.bf16.msra.mxu0 %v3045_v3  ;;  %v3431_v39 = vld [vmem:[%s4892_s3 + $0x294] sm:$0xf0]  ;;  %v2933_v41 = vor.u32 %v3419_v37, %v2932_v33  ;;  %v2758_v42 = vld [vmem:[%s4892_s3 + $0xd8] sm:$0xf0]  ;;  %v3372_v52 = vld [vmem:[%s4892_s3 + $0xc4] sm:$0xf] }
 0x15e   : > { %v2981_v46 = vor.u32 %v3431_v39, %v2980_v34  ;;  %v2761_v45 = vor.u32 %v3374_v40, %v2758_v42  ;;  %v3370_v3 = vld [vmem:[%s4892_s3 + $0xb4] sm:$0xf]  ;;  %v2702_v37 = vld [vmem:[%s4892_s3 + $0x68] sm:$0xf0]  ;;  %v3475_v34 = vld [vmem:[%s4892_s3 + $0x3f4] sm:$0xf0] }
 0x15f   : > { %v3220_v39 = vld [vmem:[%s4892_s3 + $0x470] sm:$0xf]  ;;  %v3491_v40 = vld [vmem:[%s4892_s3 + $0x474] sm:$0xf0]  ;;  %v2694_v42 = vld [vmem:[%s4892_s3 + $0x58] sm:$0xf0] }
 0x160   : > { %1943 = vmatpush.bf16.msra.mxu1 %v2901_v44  ;;  %v3401_v44 = vld [vmem:[%s4892_s3 + $0x1a4] sm:$0xf0] }
 0x161   : > { %1972 = vmatpush.bf16.msra.mxu3 %v3005_v0  ;;  %1989 = vmatpush.bf16.msra.mxu0 %v3037_v17  ;;  %v2861_v51 = vor.u32 %v3401_v44, %v2860_v43  ;;  %v2753_v0 = vor.u32 %v3372_v52, %v2750_v53  ;;  %v3148_v44 = vld [vmem:[%s4892_s3 + $0x3e0] sm:$0xf]  ;;  %v3221_v52 = vor.u32 %v3491_v40, %v3220_v39 }
 0x162   : > { %v921_v4 = vld [vmem:[#allocation1 + $0x1] ss:$2 sm:$0xff] }
 0x163   : > { %v2640_v6 = vrot.slane %v921_v4, 9  ;;  %932 = vst.sshfl [vmem:[#allocation1] sm:$0xff pattern:$0x75316420] %v3875_v55  ;;  %v2884_v4 = vld [vmem:[%s4892_s3 + $0x1d0] sm:$0xf] }
 0x164   : > { %1944 = vmatpush.bf16.msra.mxu1 %v2893_v58  ;;  %v2885_v8 = vor.u32 %v3407_v5, %v2884_v4  ;;  %v2742_v4 = vld [vmem:[%s4892_s3 + $0xb8] sm:$0xf0] }
 0x165   : > { %925 = vst [vmem:[#allocation2 + $0xa] sm:$0x1] %v2640_v6  ;;  %v2948_v6 = vld [vmem:[%s4892_s3 + $0x250] sm:$0xf]  ;;  %1973 = vmatpush.bf16.msra.mxu3 %v2997_v13  ;;  %2034 = vmatpush.bf16.msrb.mxu0 %v2777_v18  ;;  %v3366_v18 = vld [vmem:[%s4892_s3 + $0x94] sm:$0xf] }
 0x166   : > { %v2949_v9 = vor.u32 %v3423_v7, %v2948_v6  ;;  %v2917_v6 = vor.u32 %v3415_v63, %v2916_v61  ;;  %v3397_v7 = vld [vmem:[%s4892_s3 + $0x184] sm:$0xf0] }
 0x168   : > { %1945 = vmatpush.bf16.msra.mxu1 %v2885_v8  ;;  %1958 = vmatpush.bf16.msra.mxu2 %v2949_v9  ;;  %v2908_v8 = vld [vmem:[%s4892_s3 + $0x200] sm:$0xf]  ;;  %v3413_v9 = vld [vmem:[%s4892_s3 + $0x204] sm:$0xf0] }
 0x169   : > { %2035 = vmatpush.bf16.msrb.mxu0 %v2769_v36  ;;  %v2909_v11 = vor.u32 %v3413_v9, %v2908_v8  ;;  %v3360_v36 = vld [vmem:[%s4892_s3 + $0x64] sm:$0xf]  ;;  %v3132_v9 = vld [vmem:[%s4892_s3 + $0x3c0] sm:$0xf] }
 0x16a   : > { %v934_v31 = vld [vmem:[#allocation1 + $0x1] ss:$2 sm:$0xff] }
 0x16b   : > { %937 = vst.sshfl [vmem:[#allocation1] sm:$0xff pattern:$0x75316420] %v3875_v55 }
 0x16c   : > { %936 = vst [vmem:[#allocation2 + $0x1e] sm:$0x1] %v934_v31  ;;  %v2989_v31 = vor.u32 %v3433_v25, %v2988_v24  ;;  %1946 = vmatpush.bf16.msra.mxu1 %v2877_v22  ;;  %1959 = vmatpush.bf16.msra.mxu2 %v2941_v26  ;;  %v2729_v22 = vor.u32 %v3366_v18, %v2726_v19  ;;  %v2718_v24 = vld [vmem:[%s4892_s3 + $0x88] sm:$0xf0]  ;;  %v3362_v26 = vld [vmem:[%s4892_s3 + $0x74] sm:$0xf] }
 0x16d   : > { %2036 = vmatpush.bf16.msrb.mxu0 %v2761_v45  ;;  %v2721_v25 = vor.u32 %v3364_v23, %v2718_v24  ;;  %v2713_v32 = vor.u32 %v3362_v26, %v2710_v27  ;;  %v1016_v26 = vld.sshfl [vmem:[#allocation1 + $0x20] sm:$0xff pattern:$0x75316420]  ;;  %v3124_v27 = vld [vmem:[%s4892_s3 + $0x3b0] sm:$0xf] }
 0x16e   : > { %1974 = vmatpush.bf16.msra.mxu3 %v2989_v31 }
 0x170   : > { %1947 = vmatpush.bf16.msra.mxu1 %v2869_v38  ;;  %1960 = vmatpush.bf16.msra.mxu2 %v2933_v41  ;;  %v3156_v38 = vld [vmem:[%s4892_s3 + $0x3f0] sm:$0xf]  ;;  %v3358_v41 = vld [vmem:[%s4892_s3 + $0x54] sm:$0xf] }
 0x171   : > { %2037 = vmatpush.bf16.msrb.mxu0 %v2753_v0  ;;  %v3157_v45 = vor.u32 %v3475_v34, %v3156_v38  ;;  %v2697_v53 = vor.u32 %v3358_v41, %v2694_v42  ;;  %v3140_v0 = vld [vmem:[%s4892_s3 + $0x3d0] sm:$0xf]  ;;  %v3014_v38 = vld [vmem:[%s4892_s3 + $0x2d8] sm:$0xf0]  ;;  %v3116_v41 = vld [vmem:[%s4892_s3 + $0x3a0] sm:$0xf] }
 0x172   : > { %v4117_v62 = vld [vmem:[#allocation1 + $0x1] ss:$2 sm:$0xff]  ;;  %1975 = vmatpush.bf16.msra.mxu3 %v2981_v46 }
 0x173   : > { %944 = vst.sshfl [vmem:[#allocation1] sm:$0xff pattern:$0x75316420] %v3868_v48  ;;  %v2641_v5 = vrot.slane %v4117_v62, 9  ;;  %v2745_v62 = vor.u32 %v3370_v3, %v2742_v4  ;;  %v3473_v46 = vld [vmem:[%s4892_s3 + $0x3e4] sm:$0xf0] }
 0x174   : > { %1948 = vmatpush.bf16.msra.mxu1 %v2861_v51  ;;  %1961 = vmatpush.bf16.msra.mxu2 %v2925_v54  ;;  %v3489_v54 = vld [vmem:[%s4892_s3 + $0x464] sm:$0xf0]  ;;  %v3204_v3 = vld [vmem:[%s4892_s3 + $0x450] sm:$0xf]  ;;  %v3487_v4 = vld [vmem:[%s4892_s3 + $0x454] sm:$0xf0] }
 0x175   : > { %943 = vst [vmem:[#allocation2 + $0x22] sm:$0x1] %v2641_v5  ;;  %2038 = vmatpush.bf16.msrb.mxu0 %v2745_v62  ;;  %v3213_v61 = vor.u32 %v3489_v54, %v3212_v49  ;;  %v3354_v5 = vld [vmem:[%s4892_s3 + $0x34] sm:$0xf]  ;;  %v3469_v62 = vld [vmem:[%s4892_s3 + $0x3c4] sm:$0xf0] }
 0x176   : > { %1976 = vmatpush.bf16.msra.mxu3 %v2973_v60  ;;  %v3149_v60 = vor.u32 %v3473_v46, %v3148_v44  ;;  %v3133_v23 = vor.u32 %v3469_v62, %v3132_v9  ;;  %v3465_v42 = vld [vmem:[%s4892_s3 + $0x3a4] sm:$0xf0]  ;;  %v2654_v49 = vld [vmem:[%s4892_s3 + $0x8] sm:$0xf0]  ;;  %v3426_v54 = vld [vmem:[%s4892_s3 + $0x274] sm:$0xf] }
 0x177   : > { %v3461_v9 = vld [vmem:[%s4892_s3 + $0x384] sm:$0xf0]  ;;  %v3164_v62 = vld [vmem:[%s4892_s3 + $0x400] sm:$0xf] }
 0x178   : > { %1949 = vmatpush.bf16.msra.mxu1 %v2853_v2  ;;  %1962 = vmatpush.bf16.msra.mxu2 %v2917_v6  ;;  %v1017_v2 = vld.sshfl [vmem:[#allocation1 + $0x28] sm:$0xff pattern:$0x75316420]  ;;  %v2678_v6 = vld [vmem:[%s4892_s3 + $0x38] sm:$0xf0] }
 0x179   : > { %2039 = vmatpush.bf16.msrb.mxu0 %v2737_v16  ;;  %v4378_v15 = vpack.c.bf16 %v1017_v2, %v1017_v2 }
 0x17a   : > { %v946_v30 = vld [vmem:[#allocation1 + $0x1] ss:$2 sm:$0xff] }
 0x17b   : > { %951 = vst.sshfl [vmem:[#allocation1] sm:$0xff pattern:$0x75316420] %v3868_v48  ;;  %v2642_v58 = vrot.slane %v946_v30, 9 }
 0x17c   : > { %1963 = vmatpush.bf16.msra.mxu2 %v2909_v11 }
 0x17d   : > { %950 = vst [vmem:[#allocation2 + $0x3] sm:$0x1] %v2642_v58  ;;  %2040 = vmatpush.bf16.msrb.mxu0 %v2729_v22  ;;  %v3356_v58 = vld [vmem:[%s4892_s3 + $0x44] sm:$0xf]  ;;  %v3022_v22 = vld [vmem:[%s4892_s3 + $0x2e8] sm:$0xf0] }
 0x181   : > { %2041 = vmatpush.bf16.msrb.mxu0 %v2721_v25 }
 0x182   : > { %v953_v59 = vld [vmem:[#allocation1 + $0x1] ss:$2 sm:$0xff] }
 0x183   : > { %958 = vst.sshfl [vmem:[#allocation1] sm:$0xff pattern:$0x75316420] %v3868_v48  ;;  %v2643_v1 = vrot.slane %v953_v59, 10  ;;  %v2844_v48 = vld [vmem:[%s4892_s3 + $0x180] sm:$0xf] }
 0x184   : > { %v2845_v10 = vor.u32 %v3397_v7, %v2844_v48  ;;  %v2686_v59 = vld [vmem:[%s4892_s3 + $0x48] sm:$0xf0]  ;;  %v3442_v48 = vld [vmem:[%s4892_s3 + $0x2f4] sm:$0xf]  ;;  %v3030_v7 = vld [vmem:[%s4892_s3 + $0x2f8] sm:$0xf0] }
 0x185   : > { %957 = vst [vmem:[#allocation2 + $0x7] sm:$0x1] %v2643_v1  ;;  %v2689_v63 = vor.u32 %v3356_v58, %v2686_v59  ;;  %v3471_v1 = vld [vmem:[%s4892_s3 + $0x3d4] sm:$0xf0]  ;;  %v3033_v18 = vor.u32 %v3442_v48, %v3030_v7  ;;  %v3108_v59 = vld [vmem:[%s4892_s3 + $0x390] sm:$0xf] }
 0x186   : > { %1950 = vmatpush.bf16.msra.mxu1 %v2845_v10  ;;  %v3141_v8 = vor.u32 %v3471_v1, %v3140_v0  ;;  %v3196_v10 = vld [vmem:[%s4892_s3 + $0x440] sm:$0xf]  ;;  %v3172_v0 = vld [vmem:[%s4892_s3 + $0x410] sm:$0xf]  ;;  %v3479_v1 = vld [vmem:[%s4892_s3 + $0x414] sm:$0xf0] }
 0x187   : > { %v2998_v48 = vld [vmem:[%s4892_s3 + $0x2b8] sm:$0xf0]  ;;  %v3173_v7 = vor.u32 %v3479_v1, %v3172_v0  ;;  %v3404_v0 = vld [vmem:[%s4892_s3 + $0x1c4] sm:$0xf]  ;;  %v2878_v1 = vld [vmem:[%s4892_s3 + $0x1c8] sm:$0xf0] }
 0x18a   : > { %v960_v12 = vld [vmem:[#allocation1 + $0x1] ss:$2 sm:$0xff] }
 0x18b   : > { %v2644_v13 = vrot.slane %v960_v12, 11  ;;  %974 = vst.sshfl [vmem:[#allocation1] sm:$0xff pattern:$0x75316420] %v3875_v55  ;;  %v3205_v12 = vor.u32 %v3487_v4, %v3204_v3  ;;  %v3424_v3 = vld [vmem:[%s4892_s3 + $0x264] sm:$0xf] }
 0x18c   : > { %v995_v29 = vld [vmem:[#allocation2] sm:$0xff] }
 0x18d   : > { %964 = vst [vmem:[#allocation2 + $0xb] sm:$0x1] %v2644_v13  ;;  %v3485_v13 = vld [vmem:[%s4892_s3 + $0x444] sm:$0xf0] }
 0x18e   : > { %v3197_v25 = vor.u32 %v3485_v13, %v3196_v10  ;;  %v3477_v10 = vld [vmem:[%s4892_s3 + $0x404] sm:$0xf0] }
 0x192   : > { %v976_v17 = vld [vmem:[#allocation1 + $0x1] ss:$2 sm:$0xff] }
 0x193   : > { %981 = vst.sshfl [vmem:[#allocation1] sm:$0xff pattern:$0x75316420] %v3875_v55  ;;  %v2647_v20 = vrot.slane %v976_v17, 9  ;;  %v2681_v17 = vor.u32 %v3354_v5, %v2678_v6  ;;  %v2958_v5 = vld [vmem:[%s4892_s3 + $0x268] sm:$0xf0] }
 0x194   : > { %v996_v21 = vld [vmem:[#allocation2 + $0x8] sm:$0xff]  ;;  %v2961_v13 = vor.u32 %v3424_v3, %v2958_v5  ;;  %v2926_v3 = vld [vmem:[%s4892_s3 + $0x228] sm:$0xf0]  ;;  %v2881_v5 = vor.u32 %v3404_v0, %v2878_v1 }
 0x195   : > { %1007 = vst [vmem:[#allocation1 + $0x10] ss:$2 sm:$0xff] %v996_v21  ;;  %v3440_v21 = vld [vmem:[%s4892_s3 + $0x2e4] sm:$0xf]  ;;  %v3434_v6 = vld [vmem:[%s4892_s3 + $0x2b4] sm:$0xf] }
 0x196   : > { %980 = vst [vmem:[#allocation2 + $0x1b] sm:$0x1] %v2647_v20  ;;  %v2670_v20 = vld [vmem:[%s4892_s3 + $0x28] sm:$0xf0]  ;;  %v3454_v1 = vld [vmem:[%s4892_s3 + $0x354] sm:$0xf] }
 0x19a   : > { %v983_v28 = vld [vmem:[#allocation1 + $0x1] ss:$2 sm:$0xff] }
 0x19b   : > { %988 = vst.sshfl [vmem:[#allocation1] sm:$0xff pattern:$0x75316420] %v3875_v55  ;;  %v2648_v30 = vrot.slane %v983_v28, 10  ;;  %v2705_v55 = vor.u32 %v3360_v36, %v2702_v37  ;;  %v3467_v28 = vld [vmem:[%s4892_s3 + $0x3b4] sm:$0xf0] }
 0x19c   : > { %v1014_v31 = vld.sshfl [vmem:[#allocation1 + $0x10] sm:$0xff pattern:$0x75316420]  ;;  %1005 = vst [vmem:[#allocation1] ss:$2 sm:$0xff] %v995_v29  ;;  %v2673_v29 = vor.u32 %v3352_v14, %v2670_v20  ;;  %v3125_v34 = vor.u32 %v3467_v28, %v3124_v27  ;;  %v3001_v14 = vor.u32 %v3434_v6, %v2998_v48 }
 0x19d   : > { %v4288_v33 = vpack.c.bf16 %v1014_v31, %v1014_v31  ;;  %987 = vst [vmem:[#allocation2 + $0x1f] sm:$0x1] %v2648_v30  ;;  %v1015_v24 = vld.sshfl [vmem:[#allocation1 + $0x18] sm:$0xff pattern:$0x75316420]  ;;  %v3025_v30 = vor.u32 %v3440_v21, %v3022_v22 }
 0x19e   : > { %v3188_v31 = vld [vmem:[%s4892_s3 + $0x430] sm:$0xf]  ;;  %v3350_v36 = vld [vmem:[%s4892_s3 + $0x14] sm:$0xf]  ;;  %v2662_v37 = vld [vmem:[%s4892_s3 + $0x18] sm:$0xf0]  ;;  %v4417_v39 = vpack.c.bf16 %v1015_v24, %v1015_v24  ;;  %v3165_v24 = vor.u32 %v3477_v10, %v3164_v62 }
 0x19f   : > { %1938 = vmatmul.bf16.vlgmr.msrb.gmra.mxu3 %v4288_v33  ;;  %v2665_v44 = vor.u32 %v3350_v36, %v2662_v37  ;;  %v2950_v21 = vld [vmem:[%s4892_s3 + $0x258] sm:$0xf0]  ;;  %v3432_v22 = vld [vmem:[%s4892_s3 + $0x2a4] sm:$0xf]  ;;  %v2942_v37 = vld [vmem:[%s4892_s3 + $0x248] sm:$0xf0] }
 0x1a0   : > { %2021 = vmatpush.bf16.msrb.mxu3 %v2713_v32  ;;  %v3483_v32 = vld [vmem:[%s4892_s3 + $0x434] sm:$0xf0]  ;;  %v3392_v27 = vld [vmem:[%s4892_s3 + $0x164] sm:$0xf]  ;;  %v3386_v6 = vld [vmem:[%s4892_s3 + $0x134] sm:$0xf] }
 0x1a1   : > { %v3189_v40 = vor.u32 %v3483_v32, %v3188_v31  ;;  %v2806_v48 = vld [vmem:[%s4892_s3 + $0x138] sm:$0xf0]  ;;  %v3414_v62 = vld [vmem:[%s4892_s3 + $0x214] sm:$0xf] }
 0x1a2   : > { %v990_v43 = vld [vmem:[#allocation1 + $0x1] ss:$2 sm:$0xff]  ;;  %v2918_v10 = vld [vmem:[%s4892_s3 + $0x218] sm:$0xf0] }
 0x1a3   : > { %v1012_v47 = vld.sshfl [vmem:[#allocation1] sm:$0xff pattern:$0x75316420]  ;;  %v2649_v35 = vrot.slane %v990_v43, 11  ;;  %v4425_v43 = vpack.c.bf16 %v1016_v26, %v1016_v26 }
 0x1a4   : > { %2022 = vmatpush.bf16.msrb.mxu3 %v2705_v55  ;;  %v4324_v50 = vpack.c.bf16 %v1012_v47, %v1012_v47  ;;  %v1013_v51 = vld.sshfl [vmem:[#allocation1 + $0x8] sm:$0xff pattern:$0x75316420]  ;;  %v998_v56 = vld [vmem:[#allocation2 + $0x18] sm:$0xff]  ;;  %v3438_v55 = vld [vmem:[%s4892_s3 + $0x2d4] sm:$0xf] }
 0x1a5   : > { %994 = vst [vmem:[#allocation2 + $0x23] sm:$0x1] %v2649_v35  ;;  %v4329_v57 = vpack.c.bf16 %v1013_v51, %v1013_v51  ;;  %v3017_v46 = vor.u32 %v3438_v55, %v3014_v38  ;;  %v3180_v47 = vld [vmem:[%s4892_s3 + $0x420] sm:$0xf]  ;;  %v3481_v35 = vld [vmem:[%s4892_s3 + $0x424] sm:$0xf0] }
 0x1a6   : > { %1912 = vmatmul.bf16.vlgmr.msrb.gmra.mxu1 %v4324_v50  ;;  %1011 = vst [vmem:[#allocation1 + $0x30] ss:$2 sm:$0xff] %v998_v56  ;;  %v3436_v51 = vld [vmem:[%s4892_s3 + $0x2c4] sm:$0xf]  ;;  %v2966_v56 = vld [vmem:[%s4892_s3 + $0x278] sm:$0xf0]  ;;  %v3181_v58 = vor.u32 %v3481_v35, %v3180_v47 }
 0x1a7   : > { %1925 = vmatmul.bf16.vlgmr.msrb.gmra.mxu2 %v4329_v57  ;;  %1995 = vmatpush.bf16.msrb.mxu1 %v3157_v45  ;;  %v3348_v45 = vld [vmem:[%s4892_s3 + $0x4] sm:$0xf]  ;;  %v2969_v2 = vor.u32 %v3426_v54, %v2966_v56  ;;  %v3430_v55 = vld [vmem:[%s4892_s3 + $0x294] sm:$0xf]  ;;  %v2982_v38 = vld [vmem:[%s4892_s3 + $0x298] sm:$0xf0] }
 0x1a8   : > { %2008 = vmatpush.bf16.msrb.mxu2 %v3221_v52  ;;  %2023 = vmatpush.bf16.msrb.mxu3 %v2697_v53  ;;  %v3006_v52 = vld [vmem:[%s4892_s3 + $0x2c8] sm:$0xf0]  ;;  %v3117_v53 = vor.u32 %v3465_v42, %v3116_v41  ;;  %v2985_v35 = vor.u32 %v3430_v55, %v2982_v38  ;;  %v3396_v55 = vld [vmem:[%s4892_s3 + $0x184] sm:$0xf] }
 0x1a9   : > { %v2974_v54 = vld [vmem:[%s4892_s3 + $0x288] sm:$0xf0] }
 0x1aa   : > { %v2846_v38 = vld [vmem:[%s4892_s3 + $0x188] sm:$0xf0] }
 0x1ab   : > { %1996 = vmatpush.bf16.msrb.mxu1 %v3149_v60  ;;  %v3463_v60 = vld [vmem:[%s4892_s3 + $0x394] sm:$0xf0] }
 0x1ac   : > { %v999_v11 = vld [vmem:[#allocation2 + $0x20] sm:$0xf]  ;;  %2009 = vmatpush.bf16.msrb.mxu2 %v3213_v61  ;;  %2024 = vmatpush.bf16.msrb.mxu3 %v2689_v63  ;;  %v2657_v61 = vor.u32 %v3348_v45, %v2654_v49  ;;  %v3009_v63 = vor.u32 %v3436_v51, %v3006_v52  ;;  %v3109_v4 = vor.u32 %v3463_v60, %v3108_v59  ;;  %v3406_v45 = vld [vmem:[%s4892_s3 + $0x1d4] sm:$0xf]  ;;  %v2886_v49 = vld [vmem:[%s4892_s3 + $0x1d8] sm:$0xf0] }
 0x1ad   : > { %1020 = vst [vmem:[#allocation1] ss:$2 sm:$0xff] %v999_v11  ;;  %v1018_v16 = vld.sshfl [vmem:[#allocation1 + $0x30] sm:$0xff pattern:$0x75316420] }
 0x1ae   : > { %v4380_v19 = vpack.c.bf16 %v1018_v16, %v1018_v16  ;;  %v3394_v11 = vld [vmem:[%s4892_s3 + $0x174] sm:$0xf]  ;;  %v1019_v26 = vld.sshfl [vmem:[#allocation1 + $0x38] sm:$0xff pattern:$0x75316420] }
 0x1af   : > { %1997 = vmatpush.bf16.msrb.mxu1 %v3141_v8  ;;  %1977 = vmatmul.bf16.vlgmr.msra.gmra.mxu3 %v4378_v15  ;;  %v3100_v8 = vld [vmem:[%s4892_s3 + $0x380] sm:$0xf]  ;;  %v3410_v16 = vld [vmem:[%s4892_s3 + $0x1f4] sm:$0xf]  ;;  %v2934_v52 = vld [vmem:[%s4892_s3 + $0x238] sm:$0xf0] }
 0x1b0   : > { %2010 = vmatpush.bf16.msrb.mxu2 %v3205_v12  ;;  %1990 = vmatmul.bf16.vlgmr.msra.gmra.mxu0 %v4380_v19  ;;  %v2838_v12 = vld [vmem:[%s4892_s3 + $0x178] sm:$0xf0]  ;;  %v3101_v20 = vor.u32 %v3461_v9, %v3100_v8  ;;  %v3418_v51 = vld [vmem:[%s4892_s3 + $0x234] sm:$0xf]  ;;  %v3388_v59 = vld [vmem:[%s4892_s3 + $0x144] sm:$0xf] }
 0x1b1   : > { %2025 = vmatpush.bf16.msrb.mxu3 %v2681_v17  ;;  %2086 = vmatpush.bf16.msra.mxu0 %v3033_v18  ;;  %v2902_v17 = vld [vmem:[%s4892_s3 + $0x1f8] sm:$0xf0]  ;;  %v3422_v18 = vld [vmem:[%s4892_s3 + $0x254] sm:$0xf]  ;;  %v2814_v60 = vld [vmem:[%s4892_s3 + $0x148] sm:$0xf0] }
 0x1b2   : > { %v2905_v28 = vor.u32 %v3410_v16, %v2902_v17  ;;  %v2953_v31 = vor.u32 %v3422_v18, %v2950_v21  ;;  %v3402_v8 = vld [vmem:[%s4892_s3 + $0x1b4] sm:$0xf]  ;;  %v2870_v9 = vld [vmem:[%s4892_s3 + $0x1b8] sm:$0xf0]  ;;  %v2921_v16 = vor.u32 %v3414_v62, %v2918_v10  ;;  %v3400_v17 = vld [vmem:[%s4892_s3 + $0x1a4] sm:$0xf] }
 0x1b3   : > { %1998 = vmatpush.bf16.msrb.mxu1 %v3133_v23  ;;  %v2990_v23 = vld [vmem:[%s4892_s3 + $0x2a8] sm:$0xf0]  ;;  %v3468_v62 = vld [vmem:[%s4892_s3 + $0x3c4] sm:$0xf] }
 0x1b4   : > { %2011 = vmatpush.bf16.msrb.mxu2 %v3197_v25  ;;  %v2841_v25 = vor.u32 %v3394_v11, %v2838_v12  ;;  %v2993_v32 = vor.u32 %v3432_v22, %v2990_v23  ;;  %v1021_v36 = vld.sshfl [vmem:[#allocation1] sm:$0xff pattern:$0x75316420]  ;;  %v2809_v11 = vor.u32 %v3386_v6, %v2806_v48  ;;  %v2873_v12 = vor.u32 %v3402_v8, %v2870_v9  ;;  %v2862_v18 = vld [vmem:[%s4892_s3 + $0x1a8] sm:$0xf0] }
 0x1b5   : > { %2026 = vmatpush.bf16.msrb.mxu3 %v2673_v29  ;;  %2087 = vmatpush.bf16.msra.mxu0 %v3025_v30  ;;  %v2830_v29 = vld [vmem:[%s4892_s3 + $0x168] sm:$0xf0]  ;;  %v3408_v30 = vld [vmem:[%s4892_s3 + $0x1e4] sm:$0xf]  ;;  %v4541_v41 = vpack.c.bf16 %v1021_v36, %v1021_v36  ;;  %v3490_v22 = vld [vmem:[%s4892_s3 + $0x474] sm:$0xf] }
 0x1b6   : > { %1951 = vmatmul.bf16.vlgmr.msra.gmra.mxu1 %v4417_v39  ;;  %v3222_v23 = vld [vmem:[%s4892_s3 + $0x478] sm:$0xf0]  ;;  %v3482_v6 = vld [vmem:[%s4892_s3 + $0x434] sm:$0xf]  ;;  %v3452_v8 = vld [vmem:[%s4892_s3 + $0x344] sm:$0xf] }
 0x1b7   : > { %1964 = vmatmul.bf16.vlgmr.msra.gmra.mxu2 %v4425_v43  ;;  %1999 = vmatpush.bf16.msrb.mxu1 %v3125_v34  ;;  %v2833_v34 = vor.u32 %v3392_v27, %v2830_v29  ;;  %v2854_v29 = vld [vmem:[%s4892_s3 + $0x198] sm:$0xf0]  ;;  %v3134_v10 = vld [vmem:[%s4892_s3 + $0x3c8] sm:$0xf0] }
 0x1b8   : > { %2012 = vmatpush.bf16.msrb.mxu2 %v3189_v40  ;;  %v4539_v40 = vpack.c.bf16 %v1019_v26, %v1019_v26  ;;  %v2790_v26 = vld [vmem:[%s4892_s3 + $0x118] sm:$0xf0] }
 0x1b9   : > { %2027 = vmatpush.bf16.msrb.mxu3 %v2665_v44  ;;  %2088 = vmatpush.bf16.msra.mxu0 %v3017_v46  ;;  %v3390_v44 = vld [vmem:[%s4892_s3 + $0x154] sm:$0xf]  ;;  %v2822_v46 = vld [vmem:[%s4892_s3 + $0x158] sm:$0xf0] }
 0x1ba   : > { %v2825_v56 = vor.u32 %v3390_v44, %v2822_v46  ;;  %v3474_v46 = vld [vmem:[%s4892_s3 + $0x3f4] sm:$0xf]  ;;  %v3190_v48 = vld [vmem:[%s4892_s3 + $0x438] sm:$0xf0] }
 0x1bb   : > { %2000 = vmatpush.bf16.msrb.mxu1 %v3117_v53  ;;  %v3428_v53 = vld [vmem:[%s4892_s3 + $0x284] sm:$0xf]  ;;  %v3193_v9 = vor.u32 %v3482_v6, %v3190_v48 }
 0x1bc   : > { %2013 = vmatpush.bf16.msrb.mxu2 %v3181_v58  ;;  %v2889_v58 = vor.u32 %v3406_v45, %v2886_v49  ;;  %v3486_v45 = vld [vmem:[%s4892_s3 + $0x454] sm:$0xf]  ;;  %v3206_v49 = vld [vmem:[%s4892_s3 + $0x458] sm:$0xf0] }
 0x1bd   : > { %2028 = vmatpush.bf16.msrb.mxu3 %v2657_v61  ;;  %2089 = vmatpush.bf16.msra.mxu0 %v3009_v63  ;;  %v2937_v61 = vor.u32 %v3418_v51, %v2934_v52  ;;  %v2977_v63 = vor.u32 %v3428_v53, %v2974_v54  ;;  %v2849_v51 = vor.u32 %v3396_v55, %v2846_v38  ;;  %v3456_v54 = vld [vmem:[%s4892_s3 + $0x364] sm:$0xf]  ;;  %v3462_v55 = vld [vmem:[%s4892_s3 + $0x394] sm:$0xf]  ;;  %v3110_v38 = vld [vmem:[%s4892_s3 + $0x398] sm:$0xf0] }
 0x1bf   : > { %2001 = vmatpush.bf16.msrb.mxu1 %v3109_v4  ;;  %v2817_v4 = vor.u32 %v3388_v59, %v2814_v60  ;;  %v3472_v59 = vld [vmem:[%s4892_s3 + $0x3e4] sm:$0xf] }
 0x1c0   : > { %2014 = vmatpush.bf16.msrb.mxu2 %v3173_v7  ;;  %2029 = vmatmul.bf16.vlgmr.msrb.gmra.mxu3 %v4324_v50  ;;  %v2894_v50 = vld [vmem:[%s4892_s3 + $0x1e8] sm:$0xf0]  ;;  %v3484_v60 = vld [vmem:[%s4892_s3 + $0x444] sm:$0xf] }
 0x1c1   : > { %2073 = vmatpush.bf16.msra.mxu3 %v2969_v2  ;;  %2042 = vmatmul.bf16.vlgmr.msrb.gmra.mxu0 %v4329_v57  ;;  %v3420_v57 = vld [vmem:[%s4892_s3 + $0x244] sm:$0xf]  ;;  %v2897_v42 = vor.u32 %v3408_v30, %v2894_v50  ;;  %v3225_v30 = vor.u32 %v3490_v22, %v3222_v23  ;;  %v3174_v22 = vld [vmem:[%s4892_s3 + $0x418] sm:$0xf0] }
 0x1c2   : > { %2090 = vmatpush.bf16.msra.mxu0 %v3001_v14  ;;  %v2945_v47 = vor.u32 %v3420_v57, %v2942_v37  ;;  %v3416_v2 = vld [vmem:[%s4892_s3 + $0x224] sm:$0xf]  ;;  %v2798_v14 = vld [vmem:[%s4892_s3 + $0x128] sm:$0xf0] }
 0x1c3   : > { %2002 = vmatpush.bf16.msrb.mxu1 %v3101_v20  ;;  %v2929_v7 = vor.u32 %v3416_v2, %v2926_v3  ;;  %v2910_v20 = vld [vmem:[%s4892_s3 + $0x208] sm:$0xf0]  ;;  %v3380_v57 = vld [vmem:[%s4892_s3 + $0x104] sm:$0xf]  ;;  %v3078_v2 = vld [vmem:[%s4892_s3 + $0x358] sm:$0xf0] }
 0x1c4   : > { %2015 = vmatpush.bf16.msrb.mxu2 %v3165_v24  ;;  %v2865_v24 = vor.u32 %v3400_v17, %v2862_v18  ;;  %v2782_v37 = vld [vmem:[%s4892_s3 + $0x108] sm:$0xf0]  ;;  %v3062_v17 = vld [vmem:[%s4892_s3 + $0x338] sm:$0xf0] }
 0x1c5   : > { %2074 = vmatpush.bf16.msra.mxu3 %v2961_v13  ;;  %v3384_v13 = vld [vmem:[%s4892_s3 + $0x124] sm:$0xf] }
 0x1c6   : > { %2091 = vmatpush.bf16.msra.mxu0 %v2993_v32  ;;  %2003 = vmatmul.bf16.vlgmr.msrb.gmra.mxu1 %v4539_v40  ;;  %v2801_v21 = vor.u32 %v3384_v13, %v2798_v14  ;;  %v3214_v32 = vld [vmem:[%s4892_s3 + $0x468] sm:$0xf0]  ;;  %v3137_v14 = vor.u32 %v3468_v62, %v3134_v10 }
 0x1c7   : > { %2047 = vmatpush.bf16.msra.mxu1 %v2841_v25  ;;  %2016 = vmatmul.bf16.vlgmr.msrb.gmra.mxu2 %v4541_v41  ;;  %v3382_v25 = vld [vmem:[%s4892_s3 + $0x114] sm:$0xf] }
 0x1c8   : > { %2060 = vmatpush.bf16.msra.mxu2 %v2905_v28  ;;  %v3398_v28 = vld [vmem:[%s4892_s3 + $0x194] sm:$0xf]  ;;  %v2793_v50 = vor.u32 %v3382_v25, %v2790_v26  ;;  %v3448_v25 = vld [vmem:[%s4892_s3 + $0x324] sm:$0xf]  ;;  %v3054_v26 = vld [vmem:[%s4892_s3 + $0x328] sm:$0xf0] }
 0x1c9   : > { %2075 = vmatpush.bf16.msra.mxu3 %v2953_v31  ;;  %v3488_v31 = vld [vmem:[%s4892_s3 + $0x464] sm:$0xf]  ;;  %v2857_v36 = vor.u32 %v3398_v28, %v2854_v29  ;;  %v3118_v29 = vld [vmem:[%s4892_s3 + $0x3a8] sm:$0xf0] }
 0x1ca   : > { %2092 = vmatpush.bf16.msra.mxu0 %v2985_v35  ;;  %v3217_v44 = vor.u32 %v3488_v31, %v3214_v32  ;;  %v2785_v35 = vor.u32 %v3380_v57, %v2782_v37  ;;  %v3464_v28 = vld [vmem:[%s4892_s3 + $0x3a4] sm:$0xf]  ;;  %v3057_v31 = vor.u32 %v3448_v25, %v3054_v26  ;;  %v3046_v57 = vld [vmem:[%s4892_s3 + $0x318] sm:$0xf0]  ;;  %v2153_v26 = vld [vmem:[%s4893_s4] sm:$0x3] }
 0x1cb   : > { %2048 = vmatpush.bf16.msra.mxu1 %v2833_v34  ;;  %v3458_v34 = vld [vmem:[%s4892_s3 + $0x374] sm:$0xf]  ;;  %v3121_v32 = vor.u32 %v3464_v28, %v3118_v29 }
 0x1cc   : > { %2061 = vmatpush.bf16.msra.mxu2 %v2897_v42  ;;  %v3094_v42 = vld [vmem:[%s4892_s3 + $0x378] sm:$0xf0] }
 0x1cd   : > { %2076 = vmatpush.bf16.msra.mxu3 %v2945_v47  ;;  %v3158_v47 = vld [vmem:[%s4892_s3 + $0x3f8] sm:$0xf0]  ;;  %v3097_v52 = vor.u32 %v3458_v34, %v3094_v42  ;;  %v3113_v42 = vor.u32 %v3462_v55, %v3110_v38 }
 0x1ce   : > { %2093 = vmatpush.bf16.msra.mxu0 %v2977_v63  ;;  %v3161_v53 = vor.u32 %v3474_v46, %v3158_v47  ;;  %v3038_v46 = vld [vmem:[%s4892_s3 + $0x308] sm:$0xf0]  ;;  %v3460_v47 = vld [vmem:[%s4892_s3 + $0x384] sm:$0xf] }
 0x1cf   : > { %2049 = vmatpush.bf16.msra.mxu1 %v2825_v56  ;;  %v3086_v56 = vld [vmem:[%s4892_s3 + $0x368] sm:$0xf0] }
 0x1d0   : > { %2062 = vmatpush.bf16.msra.mxu2 %v2889_v58  ;;  %v3209_v58 = vor.u32 %v3486_v45, %v3206_v49  ;;  %v3089_v63 = vor.u32 %v3456_v54, %v3086_v56  ;;  %v3498_v54 = vld [vmem:[%s4894_s5 + $0x30] sm:$0xff] }
 0x1d1   : > { %2077 = vmatpush.bf16.msra.mxu3 %v2937_v61  ;;  %2094 = vmatmul.bf16.vlgmr.msra.gmra.mxu0 %v4378_v15  ;;  %v3412_v15 = vld [vmem:[%s4892_s3 + $0x204] sm:$0xf]  ;;  %v3198_v61 = vld [vmem:[%s4892_s3 + $0x448] sm:$0xf0] }
 0x1d2   : > { %v2913_v27 = vor.u32 %v3412_v15, %v2910_v20  ;;  %v3201_v3 = vor.u32 %v3484_v60, %v3198_v61  ;;  %v3466_v15 = vld [vmem:[%s4892_s3 + $0x3b4] sm:$0xf]  ;;  %v3126_v20 = vld [vmem:[%s4892_s3 + $0x3b8] sm:$0xf0] }
 0x1d3   : > { %2050 = vmatpush.bf16.msra.mxu1 %v2817_v4  ;;  %v3470_v4 = vld [vmem:[%s4892_s3 + $0x3d4] sm:$0xf] }
 0x1d4   : > { %2063 = vmatpush.bf16.msra.mxu2 %v2881_v5  ;;  %v3142_v5 = vld [vmem:[%s4892_s3 + $0x3d8] sm:$0xf0] }
 0x1d5   : > { %2078 = vmatpush.bf16.msra.mxu3 %v2929_v7  ;;  %v3145_v7 = vor.u32 %v3470_v4, %v3142_v5 }
 0x1d7   : > { %2051 = vmatpush.bf16.msra.mxu1 %v2809_v11  ;;  %v3480_v11 = vld [vmem:[%s4892_s3 + $0x424] sm:$0xf] }
 0x1d8   : > { %2064 = vmatpush.bf16.msra.mxu2 %v2873_v12  ;;  %v3182_v12 = vld [vmem:[%s4892_s3 + $0x428] sm:$0xf0] }
 0x1d9   : > { %2079 = vmatpush.bf16.msra.mxu3 %v2921_v16  ;;  %v3450_v16 = vld [vmem:[%s4892_s3 + $0x334] sm:$0xf]  ;;  %v3185_v18 = vor.u32 %v3480_v11, %v3182_v12  ;;  %v3492_v12 = vld [vmem:[%s4894_s5] sm:$0xff] }
 0x1da   : > { %v3065_v23 = vor.u32 %v3450_v16, %v3062_v17 }
 0x1db   : > { %2052 = vmatpush.bf16.msra.mxu1 %v2801_v21  ;;  %v3478_v21 = vld [vmem:[%s4892_s3 + $0x414] sm:$0xf] }
 0x1dc   : > { %2065 = vmatpush.bf16.msra.mxu2 %v2865_v24  ;;  %v3129_v24 = vor.u32 %v3466_v15, %v3126_v20 }
 0x1dd   : > { %2080 = vmatpush.bf16.msra.mxu3 %v2913_v27  ;;  %v3177_v27 = vor.u32 %v3478_v21, %v3174_v22 }
 0x1df   : > { %2053 = vmatpush.bf16.msra.mxu1 %v2793_v50  ;;  %v3166_v50 = vld [vmem:[%s4892_s3 + $0x408] sm:$0xf0] }
 0x1e0   : > { %2066 = vmatpush.bf16.msra.mxu2 %v2857_v36  ;;  %2081 = vmatmul.bf16.vlgmr.msra.gmra.mxu3 %v4425_v43  ;;  %v3150_v43 = vld [vmem:[%s4892_s3 + $0x3e8] sm:$0xf0]  ;;  %v3446_v36 = vld [vmem:[%s4892_s3 + $0x314] sm:$0xf] }
 0x1e1   : > { %2125 = vmatpush.bf16.msrb.mxu3 %v3225_v30  ;;  %v3153_v0 = vor.u32 %v3472_v59, %v3150_v43  ;;  %v3476_v30 = vld [vmem:[%s4892_s3 + $0x404] sm:$0xf]  ;;  %v3049_v34 = vor.u32 %v3446_v36, %v3046_v57  ;;  %v3507_v36 = vld [vmem:[%s4894_s5 + $0x78] sm:$0xff] }
 0x1e2   : > { %v3169_v37 = vor.u32 %v3476_v30, %v3166_v50  ;;  %v2155_v30 = vperm.slane %v2153_v26, 0 }
 0x1e3   : > { %2054 = vmatpush.bf16.msra.mxu1 %v2785_v35  ;;  %v3102_v35 = vld [vmem:[%s4892_s3 + $0x388] sm:$0xf0] }
 0x1e4   : > { %2067 = vmatpush.bf16.msra.mxu2 %v2849_v51  ;;  %v3105_v49 = vor.u32 %v3460_v47, %v3102_v35  ;;  %v3499_v51 = vld [vmem:[%s4894_s5 + $0x38] sm:$0xff]  ;;  %v3505_v47 = vld [vmem:[%s4894_s5 + $0x68] sm:$0xff] }
 0x1e5   : > { %2126 = vmatpush.bf16.msrb.mxu3 %v3217_v44  ;;  %v3444_v44 = vld [vmem:[%s4892_s3 + $0x304] sm:$0xf]  ;;  %2294 = vmatpush.bf16.msrb.mxu0 %v3499_v51 }
 0x1e6   : > { %2055 = vmatmul.bf16.vlgmr.msra.gmra.mxu1 %v4288_v33  ;;  %v3081_v33 = vor.u32 %v3454_v1, %v3078_v2  ;;  %v3041_v45 = vor.u32 %v3444_v44, %v3038_v46 }
 0x1e7   : > { %2099 = vmatpush.bf16.msrb.mxu1 %v3097_v52  ;;  %2068 = vmatmul.bf16.vlgmr.msra.gmra.mxu2 %v4417_v39  ;;  %v3070_v39 = vld [vmem:[%s4892_s3 + $0x348] sm:$0xf0] }
 0x1e8   : > { %2112 = vmatpush.bf16.msrb.mxu2 %v3161_v53  ;;  %v3073_v13 = vor.u32 %v3452_v8, %v3070_v39  ;;  %v3493_v39 = vld [vmem:[%s4894_s5 + $0x8] sm:$0xff] }
 0x1e9   : > { %2127 = vmatpush.bf16.msrb.mxu3 %v3209_v58  ;;  %2295 = vmatpush.bf16.msrb.mxu0 %v3498_v54 }
 0x1eb   : > { %2100 = vmatpush.bf16.msrb.mxu1 %v3089_v63 }
 0x1ec   : > { %2113 = vmatpush.bf16.msrb.mxu2 %v3153_v0  ;;  %v3496_v0 = vld [vmem:[%s4894_s5 + $0x20] sm:$0xff] }
 0x1ed   : > { %2128 = vmatpush.bf16.msrb.mxu3 %v3201_v3  ;;  %v3495_v3 = vld [vmem:[%s4894_s5 + $0x18] sm:$0xff] }
 0x1ef   : > { %2101 = vmatpush.bf16.msrb.mxu1 %v3081_v33  ;;  %v3494_v33 = vld [vmem:[%s4894_s5 + $0x10] sm:$0xff] }
 0x1f0   : > { %2114 = vmatpush.bf16.msrb.mxu2 %v3145_v7 }
 0x1f1   : > { %2129 = vmatpush.bf16.msrb.mxu3 %v3193_v9 }
 0x1f3   : > { %2102 = vmatpush.bf16.msrb.mxu1 %v3073_v13 }
 0x1f4   : > { %2115 = vmatpush.bf16.msrb.mxu2 %v3137_v14 }
 0x1f5   : > { %2130 = vmatpush.bf16.msrb.mxu3 %v3185_v18 }
 0x1f7   : > { %2103 = vmatpush.bf16.msrb.mxu1 %v3065_v23 }
 0x1f8   : > { %2116 = vmatpush.bf16.msrb.mxu2 %v3129_v24 }
 0x1f9   : > { %2131 = vmatpush.bf16.msrb.mxu3 %v3177_v27 }
 0x1fb   : > { %2104 = vmatpush.bf16.msrb.mxu1 %v3057_v31 }
 0x1fc   : > { %2117 = vmatpush.bf16.msrb.mxu2 %v3121_v32 }
 0x1fd   : > { %2132 = vmatpush.bf16.msrb.mxu3 %v3169_v37  ;;  %v3506_v37 = vld [vmem:[%s4894_s5 + $0x70] sm:$0xff] }
 0x1ff   : > { %2105 = vmatpush.bf16.msrb.mxu1 %v3049_v34 }
 0x200   : > { %2118 = vmatpush.bf16.msrb.mxu2 %v3113_v42  ;;  %2133 = vmatmul.bf16.vlgmr.msrb.gmra.mxu3 %v4541_v41  ;;  %v3497_v41 = vld [vmem:[%s4894_s5 + $0x28] sm:$0xff] }
 0x201   : > { %2296 = vmatpush.bf16.msrb.mxu0 %v3497_v41 }
 0x203   : > { %2106 = vmatpush.bf16.msrb.mxu1 %v3041_v45  ;;  %v3504_v45 = vld [vmem:[%s4894_s5 + $0x60] sm:$0xff] }
 0x204   : > { %2119 = vmatpush.bf16.msrb.mxu2 %v3105_v49 }
 0x205   : > { %2297 = vmatpush.bf16.msrb.mxu0 %v3496_v0 }
 0x206   : > { %2107 = vmatmul.bf16.vlgmr.msrb.gmra.mxu1 %v4380_v19 }
 0x207   : > { %2120 = vmatmul.bf16.vlgmr.msrb.gmra.mxu2 %v4539_v40  ;;  %2307 = vmatpush.bf16.msra.mxu1 %v3507_v36 }
 0x209   : > { %2298 = vmatpush.bf16.msrb.mxu0 %v3495_v3 }
 0x20b   : > { %2308 = vmatpush.bf16.msra.mxu1 %v3506_v37 }
 0x20d   : > { %2299 = vmatpush.bf16.msrb.mxu0 %v3494_v33  ;;  %v2156_v33 = vperm.slane %v2153_v26, 1 }
 0x20f   : > { %2309 = vmatpush.bf16.msra.mxu1 %v3505_v47 }
 0x211   : > { %2300 = vmatpush.bf16.msrb.mxu0 %v3493_v39 }
 0x213   : > { %2310 = vmatpush.bf16.msra.mxu1 %v3504_v45 }
 0x215   : > { %2301 = vmatpush.bf16.msrb.mxu0 %v3492_v12 }
 0x222   : > { %v1939_v52 = vpop.f32.mrf.mxu3 }
 0x223   : > { %v1913_v53 = vpop.f32.mrf.mxu1 }
 0x22a   : > { %v1926_v56 = vpop.f32.mrf.mxu2  ;;  %v1941_v19 = vpop.f32.mrf.mxu3 }
 0x22b   : > { %v1915_v58 = vpop.f32.mrf.mxu1  ;;  %v1927_v63 = vadd.f32 %v1926_v56, %v1913_v53  ;;  %v3502_v56 = vld [vmem:[%s4894_s5 + $0x50] sm:$0xff] }
 0x22c   : > { %v3501_v58 = vld [vmem:[%s4894_s5 + $0x48] sm:$0xff] }
 0x22d   : > { %v1991_v40 = vpop.f32.mrf.mxu0  ;;  %v1940_v4 = vadd.f32 %v1939_v52, %v1927_v63  ;;  %v3503_v52 = vld [vmem:[%s4894_s5 + $0x58] sm:$0xff]  ;;  %v3500_v63 = vld [vmem:[%s4894_s5 + $0x40] sm:$0xff] }
 0x22e   : > { %2311 = vmatpush.bf16.msra.mxu1 %v3503_v52 }
 0x232   : > { %v1928_v59 = vpop.f32.mrf.mxu2  ;;  %v1978_v43 = vpop.f32.mrf.mxu3  ;;  %2312 = vmatpush.bf16.msra.mxu1 %v3502_v56 }
 0x233   : > { %v1952_v60 = vpop.f32.mrf.mxu1 }
 0x234   : > { %v1953_v6 = vadd.f32 %v1952_v60, %v1940_v4 }
 0x235   : > { %v1993_v61 = vpop.f32.mrf.mxu0 }
 0x236   : > { %2313 = vmatpush.bf16.msra.mxu1 %v3501_v58 }
 0x23a   : > { %v1965_v1 = vpop.f32.mrf.mxu2  ;;  %v1980_v2 = vpop.f32.mrf.mxu3  ;;  %2314 = vmatpush.bf16.msra.mxu1 %v3500_v63 }
 0x23b   : > { %v1954_v5 = vpop.f32.mrf.mxu1  ;;  %v1966_v7 = vadd.f32 %v1965_v1, %v1953_v6 }
 0x23d   : > { %v1979_v9 = vadd.f32 %v1978_v43, %v1966_v7 }
 0x23e   : > { %v2043_v48 = vpop.f32.mrf.mxu0 }
 0x23f   : > { %v1992_v13 = vadd.f32 %v1991_v40, %v1979_v9 }
 0x242   : > { %v1967_v8 = vpop.f32.mrf.mxu2 }
 0x243   : > { %v2030_v62 = vpop.f32.mrf.mxu3  ;;  %v2004_v10 = vpop.f32.mrf.mxu1 }
 0x244   : > { %v2005_v14 = vadd.f32 %v2004_v10, %v1992_v13  ;;  %v2044_v35 = vadd.f32 %v2043_v48, %v2030_v62 }
 0x246   : > { %v2045_v11 = vpop.f32.mrf.mxu0 }
 0x247   : > { %v2197_v11 = vld [vmem:[%s4895_s6] sm:$0x1] }
 0x24a   : > { %v2017_v16 = vpop.f32.mrf.mxu2 }
 0x24b   : > { %v2018_v17 = vadd.f32 %v2017_v16, %v2005_v14  ;;  %v2032_v18 = vpop.f32.mrf.mxu3  ;;  %v2006_v15 = vpop.f32.mrf.mxu1 }
 0x24d   : > { %v2139_v20 = vsel %vm2138_vm1, %v2018_v17, -inf }
 0x24e   : > { %v2140_v21 = vrot.slane %v2139_v20, 4  ;;  %v2095_v22 = vpop.f32.mrf.mxu0 }
 0x250   : > { %v2141_v23 = vmax.f32 %v2139_v20, %v2140_v21 }
 0x252   : > { %v2142_v24 = vrot.slane %v2141_v23, 2  ;;  %v2019_v25 = vpop.f32.mrf.mxu2 }
 0x254   : > { %v2143_v27 = vmax.f32 %v2141_v23, %v2142_v24 }
 0x256   : > { %v2144_v28 = vrot.slane %v2143_v27, 1  ;;  %v2097_v29 = vpop.f32.mrf.mxu0 }
 0x258   : > { %v2145_v50 = vmax.f32 %v2143_v27, %v2144_v28 }
 0x25a   : > { %v2159_v31 = vadd.f32 %v2155_v30, %v2145_v50 }
 0x25c   : > { %v2161_v32 = vmax.f32 %v2159_v31, 0.0 }
 0x25e   : > { %v2163_v57 = vpack.c.bf16 %v2161_v32, %v2161_v32 }
 0x260   : > { %2302 = vmatmul.bf16.vlgmr.msrb.gmra.mxu0 %v2163_v57 }
 0x263   : > { %v2082_v55 = vpop.f32.mrf.mxu3  ;;  %v2056_v38 = vpop.f32.mrf.mxu1 }
 0x264   : > { %v2057_v49 = vadd.f32 %v2056_v38, %v2044_v35 }
 0x26a   : > { %v2069_v34 = vpop.f32.mrf.mxu2 }
 0x26b   : > { %v2084_v42 = vpop.f32.mrf.mxu3  ;;  %v2058_v44 = vpop.f32.mrf.mxu1  ;;  %v2070_v51 = vadd.f32 %v2069_v34, %v2057_v49 }
 0x26d   : > { %v2083_v53 = vadd.f32 %v2082_v55, %v2070_v51 }
 0x26f   : > { %v2096_v19 = vadd.f32 %v2095_v22, %v2083_v53 }
 0x272   : > { %v2071_v46 = vpop.f32.mrf.mxu2 }
 0x283   : > { %v2134_v54 = vpop.f32.mrf.mxu3  ;;  %v2108_v41 = vpop.f32.mrf.mxu1 }
 0x284   : > { %v2109_v40 = vadd.f32 %v2108_v41, %v2096_v19 }
 0x28a   : > { %v2121_v59 = vpop.f32.mrf.mxu2 }
 0x28b   : > { %v2122_v43 = vadd.f32 %v2121_v59, %v2109_v40  ;;  %v2136_v60 = vpop.f32.mrf.mxu3  ;;  %v2110_v61 = vpop.f32.mrf.mxu1 }
 0x28d   : > { %v2135_v0 = vadd.f32 %v2134_v54, %v2122_v43 }
 0x28f   : > { %v2146_v1 = vsel %vm2138_vm1, %v2135_v0, -inf }
 0x290   : > { %v2147_v2 = vrot.slane %v2146_v1, 4 }
 0x292   : > { %v2148_v3 = vmax.f32 %v2146_v1, %v2147_v2  ;;  %v2123_v4 = vpop.f32.mrf.mxu2 }
 0x294   : > { %v2149_v5 = vrot.slane %v2148_v3, 2 }
 0x296   : > { %v2150_v6 = vmax.f32 %v2148_v3, %v2149_v5 }
 0x298   : > { %v2151_v48 = vrot.slane %v2150_v6, 1 }
 0x29a   : > { %v2152_v7 = vmax.f32 %v2150_v6, %v2151_v48 }
 0x29c   : > { %v2160_v8 = vadd.f32 %v2156_v33, %v2152_v7 }
 0x29e   : > { %v2162_v39 = vmax.f32 %v2160_v8, 0.0 }
 0x2a0   : > { %v2164_v9 = vpack.c.bf16 %v2162_v39, %v2162_v39 }
 0x2a2   : > { %2315 = vmatmul.bf16.vlgmr.msra.gmra.mxu1 %v2164_v9 }
 0x2dd   : > { %v2303_v62 = vpop.f32.mrf.mxu0 }
 0x2de   : > { %v2304_v12 = vadd.f32 %v2303_v62, %v2197_v11 }
 0x2e5   : > { %v2305_v10 = vpop.f32.mrf.mxu0 }
 0x31f   : > { %v2316_v13 = vpop.f32.mrf.mxu1 }
 0x320   : > { %v2317_v14 = vadd.f32 %v2316_v13, %v2304_v12 }
 0x322   : > { %v2321_v16 = vsel %vm2320_vm2, %v2317_v14, -inf }
 0x323   : > { %2322 = vmax.xlane.f32.xlu0 %v2321_v16 }
 0x327   : > { %v2318_v17 = vpop.f32.mrf.mxu1 }
 0x396   : > { %v2323_v18 = vpop.xlane.xlu0 %2322 }
 0x397   : > { %v2324_v15 = vsub.f32 %v2317_v14, %v2323_v18 }
 0x399   : > { %v2325_v20 = vmul.f32 1.442695, %v2324_v15 }
 0x39b   : > { %3550 = vpow2.f32 %v2325_v20 }
 0x3a1   : > { %v3551_v21 = vpop.eup %3550 }
 0x3a2   : > { %v2327_v22 = vsel %vm2320_vm2, %v3551_v21, 0.0 }
 0x3a3   : > { %2328 = vadd.xlane.f32.xlu0 %v2327_v22 }
 0x416   : > { %v2329_v23 = vpop.xlane.xlu0 %2328 }
 0x417   : > { %3552 = vrcp.f32 %v2329_v23 }
 0x41d   : > { %v3553_v24 = vpop.eup %3552 }
 0x41e   : > { %v2331_v25 = vmul.f32 %v3553_v24, %v3551_v21 }
 0x420   : > { %2332 = vst.msk [vmem:[%s270_s23] sm:$0x1] %vm2320_vm2, %v2331_v25 }
 0x421   : > { %3581 = shalt.err (!%p3578_p3)
}
 0x422   : > { %3509 = dma.vmem_to_hbm [thread:$0]  (%p3697_p5), %s2345_s29, 16, %s2347_s8, %s2334_s21  }
 0x423 PF: > { %p3515_p4 = scmp.ge.s32.totalorder %s3616_s27, 2  ;;  %s2358_s16 = sand.u32 1, %s3604_s24  }
 0x424   : > { %s2359_s20 = scalar_lea.sflag [#allocation4], %s2358_s16 }
 0x425   : > { %p3512_p7 = pnand %p3515_p4, %p3701_p6 }
 0x427   : > { %p3513_p8 = pneg %p3512_p7 }
 0x429   : > { %3599 = dma.done.wait (%p3513_p8), %s2359_s20, 16  }
 0x42a   : > { %3601 = vsyncadd (%p3513_p8), %s2359_s20, 4294967280  ;;  %p17_p9 = scmp.ge.s32.totalorder %s3684_s30, 4   ;;  %s4899_s24 = smov %s3608_s25 }
 0x42b   : > { %s4900_s25 = smov %s3612_s26  ;;  %s4901_s26 = smov %s3695_s10 }
 0x42c   : > { %s4902_s27 = smov %s3684_s30  ;;  %19 = sbr.rel (!%p17_p9) target bundleno = 3 (0x3), region = 101 }
 0x431   :  { %2364 = vsyncpa [#allocation4], 1 }
 0x432   :  { %2366 = vsyncpa [#allocation4 + $0x1], 1 }

</bundles_post_ra>
